<compile_context>
chip_gen: v7x
topology: tpu7x:2x2x1
jax: 0.10.0
libtpu: 0.0.40
codegen_flags: <defaults>
</compile_context>

<pallas_src>
import functools
import math

import jax
import jax.numpy as jnp
from jax import lax
from jax.experimental import pallas as pl
from jax.experimental.pallas import tpu as pltpu


# ------------------------- generation-aware sizing --------------------------


def _vmem_capacity():
    try:
        info = pltpu.get_tpu_info()
        cap = getattr(info, "vmem_capacity_bytes", None)
        if cap:
            return int(cap)
    except Exception:
        pass
    return 64 << 20  # conservative (v7x) if the query is unavailable


_VMEM_CAP = _vmem_capacity()
_BIG_VMEM = _VMEM_CAP >= (100 << 20)          # v5e / v6e (128 MiB physical)
_TM_CAP = 512 if _BIG_VMEM else 256
_TN_CAP = 1024 if _BIG_VMEM else 512
_TK_CAP = 1024 if _BIG_VMEM else 512
_MHA_TK_CAP = 1024 if _BIG_VMEM else 512


def _pick_tile(dim, cap, aligns):
    """Largest tile <= cap that divides dim, preferring coarser alignment.
    Falls back to the full dim (a full-extent block is always legal)."""
    if dim <= cap:
        return dim
    for align in aligns:
        t = (cap // align) * align
        while t >= align:
            if dim % t == 0:
                return t
            t -= align
    return dim


def _vmem_limit(est_bytes):
    """Raise the scoped-VMEM limit only when the estimated footprint needs it;
    never exceed ~85% of the physical VMEM of the current generation."""
    if est_bytes <= (12 << 20):
        return None
    cap = int(_VMEM_CAP * 0.85)
    return int(min(max(int(est_bytes * 1.4) + (2 << 20), 24 << 20), cap))


def _bf16(x):
    return x if x.dtype == jnp.bfloat16 else x.astype(jnp.bfloat16)


def _f32(x):
    return x if x.dtype == jnp.float32 else x.astype(jnp.float32)


# ------------------------------ linear kernels -------------------------------


def _linear_kernel(x_ref, w_ref, b_ref, o_ref, acc_ref, *, activation):
    """Tiled matmul: y = act(x @ w + b). bf16 operands, f32 accumulator."""

    @pl.when(pl.program_id(2) == 0)
    def _():
        acc_ref[...] = jnp.zeros_like(acc_ref)

    acc_ref[...] += jnp.dot(x_ref[...], w_ref[...],
                            preferred_element_type=jnp.float32)

    @pl.when(pl.program_id(2) == pl.num_programs(2) - 1)
    def _():
        out = acc_ref[...] + b_ref[...]
        if activation == "relu":
            out = jnp.maximum(out, 0.0)
        o_ref[...] = out.astype(o_ref.dtype)


def linear(x, w, b, activation=None, out_dtype=jnp.bfloat16):
    """x: (M, K) @ w: (K, N) + b: (N,) -> (M, N). bf16 MXU path, f32 accum."""
    M, K = x.shape
    N = w.shape[1]
    tm = _pick_tile(M, _TM_CAP, (256, 128, 16, 8))
    tk = _pick_tile(K, _TK_CAP, (256, 128))
    tn = _pick_tile(N, _TN_CAP, (256, 128))
    grid = (M // tm, N // tn, K // tk)

    out_sz = jnp.dtype(out_dtype).itemsize
    est = (2 * tm * tk * 2 + 2 * tk * tn * 2 + 2 * tn * 4
           + 2 * tm * tn * out_sz + tm * tn * 4     # out dbuf + acc
           + 2 * tm * tn * 4)                       # epilogue temporaries
    return pl.pallas_call(
        functools.partial(_linear_kernel, activation=activation),
        out_shape=jax.ShapeDtypeStruct((M, N), out_dtype),
        grid=grid,
        in_specs=[
            pl.BlockSpec((tm, tk), lambda i, j, k: (i, k)),
            pl.BlockSpec((tk, tn), lambda i, j, k: (k, j)),
            pl.BlockSpec((1, tn), lambda i, j, k: (0, j)),
        ],
        out_specs=pl.BlockSpec((tm, tn), lambda i, j, k: (i, j)),
        scratch_shapes=[pltpu.VMEM((tm, tn), jnp.float32)],
        compiler_params=pltpu.CompilerParams(
            dimension_semantics=("parallel", "parallel", "arbitrary"),
            vmem_limit_bytes=_vmem_limit(est),
        ),
    )(_bf16(x), _bf16(w), b.reshape(1, N).astype(jnp.float32))


def _qkv_kernel(x_ref, wq_ref, wk_ref, wv_ref, bq_ref, bk_ref, bv_ref,
                q_ref, k_ref, v_ref, aq_ref, ak_ref, av_ref):
    """Fused qkv projection: x read once, three outputs. f32 accumulators."""

    @pl.when(pl.program_id(2) == 0)
    def _():
        aq_ref[...] = jnp.zeros_like(aq_ref)
        ak_ref[...] = jnp.zeros_like(ak_ref)
        av_ref[...] = jnp.zeros_like(av_ref)

    x = x_ref[...]
    aq_ref[...] += jnp.dot(x, wq_ref[...], preferred_element_type=jnp.float32)
    ak_ref[...] += jnp.dot(x, wk_ref[...], preferred_element_type=jnp.float32)
    av_ref[...] += jnp.dot(x, wv_ref[...], preferred_element_type=jnp.float32)

    @pl.when(pl.program_id(2) == pl.num_programs(2) - 1)
    def _():
        q_ref[...] = (aq_ref[...] + bq_ref[...]).astype(q_ref.dtype)
        k_ref[...] = (ak_ref[...] + bk_ref[...]).astype(k_ref.dtype)
        v_ref[...] = (av_ref[...] + bv_ref[...]).astype(v_ref.dtype)


def qkv_linear(x, wq, wk, wv, bq, bk, bv, out_dtype=jnp.bfloat16):
    """Fused self-attn q/k/v projection: one pass over x, three (M, N) outputs."""
    M, K = x.shape
    N = wq.shape[1]
    tm = _pick_tile(M, _TM_CAP, (256, 128, 16, 8))
    tk = _pick_tile(K, _TK_CAP, (256, 128))
    tn = _pick_tile(N, min(_TN_CAP, 512), (256, 128))
    grid = (M // tm, N // tn, K // tk)

    est = (2 * tm * tk * 2 + 3 * 2 * tk * tn * 2 + 3 * 2 * tn * 4
           + 3 * 2 * tm * tn * 2 + 3 * tm * tn * 4 + 2 * tm * tn * 4)
    osd = jax.ShapeDtypeStruct((M, N), out_dtype)
    spec_w = pl.BlockSpec((tk, tn), lambda i, j, k: (k, j))
    spec_b = pl.BlockSpec((1, tn), lambda i, j, k: (0, j))
    spec_o = pl.BlockSpec((tm, tn), lambda i, j, k: (i, j))
    return pl.pallas_call(
        _qkv_kernel,
        out_shape=(osd, osd, osd),
        grid=grid,
        in_specs=[pl.BlockSpec((tm, tk), lambda i, j, k: (i, k)),
                  spec_w, spec_w, spec_w, spec_b, spec_b, spec_b],
        out_specs=(spec_o, spec_o, spec_o),
        scratch_shapes=[pltpu.VMEM((tm, tn), jnp.float32),
                        pltpu.VMEM((tm, tn), jnp.float32),
                        pltpu.VMEM((tm, tn), jnp.float32)],
        compiler_params=pltpu.CompilerParams(
            dimension_semantics=("parallel", "parallel", "arbitrary"),
            vmem_limit_bytes=_vmem_limit(est),
        ),
    )(_bf16(x), _bf16(wq), _bf16(wk), _bf16(wv),
      bq.reshape(1, N).astype(jnp.float32),
      bk.reshape(1, N).astype(jnp.float32),
      bv.reshape(1, N).astype(jnp.float32))


def _linear_res_ln_kernel(x_ref, w_ref, b_ref, r_ref, g_ref, be_ref, o_ref,
                          acc_ref, *, eps):
    """Tiled matmul with fused epilogue: LayerNorm(residual + (x @ w + b))."""

    @pl.when(pl.program_id(1) == 0)
    def _():
        acc_ref[...] = jnp.zeros_like(acc_ref)

    acc_ref[...] += jnp.dot(x_ref[...], w_ref[...],
                            preferred_element_type=jnp.float32)

    @pl.when(pl.program_id(1) == pl.num_programs(1) - 1)
    def _():
        z = acc_ref[...] + b_ref[...] + r_ref[...]
        mean = jnp.mean(z, axis=-1, keepdims=True)
        var = jnp.mean(jnp.square(z - mean), axis=-1, keepdims=True)
        o_ref[...] = (
            (z - mean) * lax.rsqrt(var + eps) * g_ref[...] + be_ref[...]
        ).astype(o_ref.dtype)


def linear_residual_layernorm(x, w, b, residual, gamma, beta, eps=1e-6):
    """LayerNorm(residual + x @ w + b) over the last dim. Full-N blocks so LN
    statistics are computed in the matmul epilogue; tm is VMEM-budget-driven
    so the footprint fits v7x's 64 MiB as well as v6e/v5e's 128 MiB."""
    M, K = x.shape
    N = w.shape[1]
    budget = int(_VMEM_CAP * 0.6)

    tk_cap = _TK_CAP
    while tk_cap > 128 and 2 * tk_cap * N * 2 > budget // 3:
        tk_cap //= 2
    tk = _pick_tile(K, tk_cap, (256, 128))

    # per-row resident bytes: x dbuf (bf16) + acc/res/out (f32) + LN temps
    w_bytes = 2 * tk * N * 2 + 6 * N * 4
    per_row = 4 * tk + 32 * N
    row_cap = max((budget - w_bytes) // max(per_row, 1), 16)
    tm = _pick_tile(M, max(16, min(_TM_CAP, int(row_cap))), (256, 128, 16, 8))
    grid = (M // tm, K // tk)

    est = (2 * tm * tk * 2 + 2 * tk * N * 2 + 6 * N * 4
           + 2 * tm * N * 4 + 2 * tm * N * 4 + tm * N * 4 + 3 * tm * N * 4)
    return pl.pallas_call(
        functools.partial(_linear_res_ln_kernel, eps=eps),
        out_shape=jax.ShapeDtypeStruct((M, N), jnp.float32),
        grid=grid,
        in_specs=[
            pl.BlockSpec((tm, tk), lambda i, k: (i, k)),
            pl.BlockSpec((tk, N), lambda i, k: (k, 0)),
            pl.BlockSpec((1, N), lambda i, k: (0, 0)),
            pl.BlockSpec((tm, N), lambda i, k: (i, 0)),
            pl.BlockSpec((1, N), lambda i, k: (0, 0)),
            pl.BlockSpec((1, N), lambda i, k: (0, 0)),
        ],
        out_specs=pl.BlockSpec((tm, N), lambda i, k: (i, 0)),
        scratch_shapes=[pltpu.VMEM((tm, N), jnp.float32)],
        compiler_params=pltpu.CompilerParams(
            dimension_semantics=("parallel", "arbitrary"),
            vmem_limit_bytes=_vmem_limit(est),
        ),
    )(
        _bf16(x), _bf16(w),
        b.reshape(1, N).astype(jnp.float32),
        _f32(residual),
        gamma.reshape(1, N).astype(jnp.float32),
        beta.reshape(1, N).astype(jnp.float32),
    )


# --------------------------- flash-style attention ---------------------------


def _mha_kernel(*refs, nhead, scale, has_attn_mask, has_kpm):
    """Flash-style multi-head attention, heads folded in the lane dim (D=H*hd).
    Grid: (batch, Tq blocks, Tk blocks); Tk is the online-softmax reduction.
    All HBM-facing loads/stores are lane-dense (full D / full tk tiles)."""
    q_ref, k_ref, v_ref = refs[0], refs[1], refs[2]
    idx = 3
    bias = None
    if has_attn_mask:
        bias = refs[idx][...]                      # (tq, tk) additive, f32
        idx += 1
    if has_kpm:
        kb = refs[idx][0]                          # (1, tk) additive, f32
        bias = kb if bias is None else bias + kb
        idx += 1
    o_ref = refs[idx]
    m_sc, l_sc, acc_sc = refs[idx + 1], refs[idx + 2], refs[idx + 3]

    tq, D = q_ref.shape[1], q_ref.shape[2]
    hd = D // nhead
    ik = pl.program_id(2)

    @pl.when(ik == 0)
    def _():
        m_sc[...] = jnp.full_like(m_sc, -jnp.inf)
        l_sc[...] = jnp.zeros_like(l_sc)
        acc_sc[...] = jnp.zeros_like(acc_sc)

    # Hoisted out of the head loop: one lane-dense scale/cast pass per tile.
    q = (q_ref[0] * scale).astype(jnp.bfloat16)    # (tq, D)
    k = k_ref[0].astype(jnp.bfloat16)              # (tk, D)
    v = v_ref[0].astype(jnp.bfloat16)              # (tk, D)
    acc_prev = acc_sc[...]                         # (tq, D) f32, lane-dense

    # TODO(synk): for nhead > 8 switch to lax.fori_loop + pl.ds head indexing
    #             to bound vreg live ranges (static loop is fine for small H).
    pv_cols, alpha_cols, l_new_list = [], [], []
    for h in range(nhead):
        sl = slice(h * hd, (h + 1) * hd)
        s = lax.dot_general(q[:, sl], k[:, sl], (((1,), (1,)), ((), ())),
                            preferred_element_type=jnp.float32)   # (tq, tk)
        if bias is not None:
            s = s + bias
        m_prev = m_sc[h]                                           # (tq, 1)
        m_new = jnp.maximum(m_prev, jnp.max(s, axis=-1, keepdims=True))
        alpha = jnp.exp(m_prev - m_new)                            # (tq, 1)
        p = jnp.exp(s - m_new)                                     # (tq, tk)
        l_new = alpha * l_sc[h] + jnp.sum(p, axis=-1, keepdims=True)
        m_sc[h] = m_new
        l_sc[h] = l_new
        l_new_list.append(l_new)
        pv = lax.dot_general(p.astype(jnp.bfloat16), v[:, sl],
                             (((1,), (0,)), ((), ())),
                             preferred_element_type=jnp.float32)   # (tq, hd)
        pv_cols.append(pv)
        alpha_cols.append(jnp.broadcast_to(alpha, (tq, hd)))

    # Single lane-dense read-modify-write of the accumulator per grid step.
    acc_new = acc_prev * jnp.concatenate(alpha_cols, axis=-1) \
        + jnp.concatenate(pv_cols, axis=-1)
    acc_sc[...] = acc_new

    @pl.when(ik == pl.num_programs(2) - 1)
    def _():
        inv_cols = [jnp.broadcast_to(pl.reciprocal(l, approx=True), (tq, hd))
                    for l in l_new_list]
        o_ref[0] = (acc_new * jnp.concatenate(inv_cols, axis=-1)
                    ).astype(o_ref.dtype)


def multi_head_attention(q, k, v, nhead, scale, attn_bias=None, kpm=None,
                         out_dtype=jnp.bfloat16):
    """q: (B, Tq, D), k/v: (B, Tk, D), bf16 preferred.
    attn_bias: (Tq, Tk) additive f32 (shared across batch/heads).
    kpm: (B, 1, Tk) additive f32 key-padding bias. Returns (B, Tq, D)."""
    B, Tq, D = q.shape
    Tk = k.shape[1]
    assert D % nhead == 0
    tq = _pick_tile(Tq, 256, (128, 16, 8))
    tk = _pick_tile(Tk, _MHA_TK_CAP, (512, 256, 128))
    grid = (B, Tq // tq, Tk // tk)

    in_specs = [
        pl.BlockSpec((1, tq, D), lambda b, iq, ik: (b, iq, 0)),
        pl.BlockSpec((1, tk, D), lambda b, iq, ik: (b, ik, 0)),
        pl.BlockSpec((1, tk, D), lambda b, iq, ik: (b, ik, 0)),
    ]
    args = [q, k, v]
    if attn_bias is not None:
        in_specs.append(pl.BlockSpec((tq, tk), lambda b, iq, ik: (iq, ik)))
        args.append(attn_bias)
    if kpm is not None:
        in_specs.append(pl.BlockSpec((1, 1, tk), lambda b, iq, ik: (b, 0, ik)))
        args.append(kpm)

    in_sz = jnp.dtype(q.dtype).itemsize
    out_sz = jnp.dtype(out_dtype).itemsize
    est = (2 * tq * D * in_sz + 2 * 2 * tk * D * in_sz      # q, k, v dbuf
           + 2 * tq * D * out_sz                            # out dbuf
           + 2 * tq * tk * 4 + 2 * tk * 4                   # bias blocks
           + 2 * nhead * tq * 128 * 4 + tq * max(D, 128) * 4  # m/l/acc scratch
           + 4 * tq * tk * 4 + 3 * tq * max(D, 128) * 4)    # s/p + concat temps
    return pl.pallas_call(
        functools.partial(_mha_kernel, nhead=nhead, scale=scale,
                          has_attn_mask=attn_bias is not None,
                          has_kpm=kpm is not None),
        out_shape=jax.ShapeDtypeStruct((B, Tq, D), out_dtype),
        grid=grid,
        in_specs=in_specs,
        out_specs=pl.BlockSpec((1, tq, D), lambda b, iq, ik: (b, iq, 0)),
        scratch_shapes=[pltpu.VMEM((nhead, tq, 1), jnp.float32),
                        pltpu.VMEM((nhead, tq, 1), jnp.float32),
                        pltpu.VMEM((tq, D), jnp.float32)],
        compiler_params=pltpu.CompilerParams(
            dimension_semantics=("parallel", "parallel", "arbitrary"),
            vmem_limit_bytes=_vmem_limit(est),
        ),
    )(*args)


# -------------------------------- module glue --------------------------------


def init_params(key, d_model, nhead, dim_feedforward):
    """PyTorch-style f32 initialization (matches nn.Linear defaults)."""
    ks = jax.random.split(key, 12)

    def u(k, shape, fan_in):
        bound = 1.0 / math.sqrt(fan_in)
        return jax.random.uniform(k, shape, jnp.float32, -bound, bound)

    p = {}
    p["sa_w_qkv"] = u(ks[0], (d_model, 3 * d_model), d_model)
    p["sa_b_qkv"] = u(ks[1], (3 * d_model,), d_model)
    p["sa_w_out"] = u(ks[2], (d_model, d_model), d_model)
    p["sa_b_out"] = u(ks[3], (d_model,), d_model)
    p["ca_w_qkv"] = u(ks[4], (d_model, 3 * d_model), d_model)
    p["ca_b_qkv"] = u(ks[5], (3 * d_model,), d_model)
    p["ca_w_out"] = u(ks[6], (d_model, d_model), d_model)
    p["ca_b_out"] = u(ks[7], (d_model,), d_model)
    p["w1"] = u(ks[8], (d_model, dim_feedforward), d_model)
    p["b1"] = u(ks[9], (dim_feedforward,), d_model)
    p["w2"] = u(ks[10], (dim_feedforward, d_model), dim_feedforward)
    p["b2"] = u(ks[11], (d_model,), dim_feedforward)
    for i in (1, 2, 3):
        p[f"ln{i}_g"] = jnp.ones((d_model,), jnp.float32)
        p[f"ln{i}_b"] = jnp.zeros((d_model,), jnp.float32)
    return p


def prepare_params(p):
    """One-time conversion into the kernel-friendly layout: matmul weights in
    bf16 (pre-cast once, not per call), fused qkv weights pre-split, biases and
    LayerNorm parameters kept in f32."""
    bf, f32 = jnp.bfloat16, jnp.float32
    D = p["sa_w_out"].shape[0]
    q = {}
    q["sa_wq"] = p["sa_w_qkv"][:, :D].astype(bf)
    q["sa_wk"] = p["sa_w_qkv"][:, D:2 * D].astype(bf)
    q["sa_wv"] = p["sa_w_qkv"][:, 2 * D:].astype(bf)
    q["sa_bq"] = p["sa_b_qkv"][:D].astype(f32)
    q["sa_bk"] = p["sa_b_qkv"][D:2 * D].astype(f32)
    q["sa_bv"] = p["sa_b_qkv"][2 * D:].astype(f32)
    q["sa_w_out"] = p["sa_w_out"].astype(bf)
    q["sa_b_out"] = p["sa_b_out"].astype(f32)
    q["ca_wq"] = p["ca_w_qkv"][:, :D].astype(bf)
    q["ca_wk"] = p["ca_w_qkv"][:, D:2 * D].astype(bf)
    q["ca_wv"] = p["ca_w_qkv"][:, 2 * D:].astype(bf)
    q["ca_bq"] = p["ca_b_qkv"][:D].astype(f32)
    q["ca_bk"] = p["ca_b_qkv"][D:2 * D].astype(f32)
    q["ca_bv"] = p["ca_b_qkv"][2 * D:].astype(f32)
    q["ca_w_out"] = p["ca_w_out"].astype(bf)
    q["ca_b_out"] = p["ca_b_out"].astype(f32)
    q["w1"] = p["w1"].astype(bf)
    q["b1"] = p["b1"].astype(f32)
    q["w2"] = p["w2"].astype(bf)
    q["b2"] = p["b2"].astype(f32)
    for i in (1, 2, 3):
        q[f"ln{i}_g"] = p[f"ln{i}_g"].astype(f32)
        q[f"ln{i}_b"] = p[f"ln{i}_b"].astype(f32)
    return q


def _as_additive(mask):
    if mask is None:
        return None
    if mask.dtype == jnp.bool_:
        return jnp.where(mask, -1e9, 0.0).astype(jnp.float32)
    return mask.astype(jnp.float32)


def transformer_decoder_layer(params, tgt, memory, nhead,
                              memory_key_padding_mask=None, pos=None,
                              self_attn_mask=None, pre_kv=None, query_pos=None):
    """forward_post (normalize_before=False), eval mode.
    tgt: (T, B, D), memory: (S, B, D). Returns (tgt', pre_kv).
    TODO(synk): Dropout / DropPath are RNG-driven, training-only; identities here."""
    T, B, D = tgt.shape
    S = memory.shape[0]
    hd = D // nhead
    scale = 1.0 / math.sqrt(hd)

    # Batch-major working layout (one transpose each; all further layout
    # selection happens via BlockSpec index maps).
    tgt_b = jnp.transpose(tgt, (1, 0, 2)).astype(jnp.float32)       # (B, T, D)
    qpos_b = None if query_pos is None else jnp.transpose(query_pos, (1, 0, 2))
    mem_b = jnp.transpose(memory, (1, 0, 2))                        # (B, S, D)
    pos_b = None if pos is None else jnp.transpose(pos, (1, 0, 2))

    # ----------------------------- self-attention -----------------------------
    x_sa = tgt_b if qpos_b is None else tgt_b + qpos_b
    q2d, k2d, v2d = qkv_linear(
        x_sa.reshape(B * T, D),
        params["sa_wq"], params["sa_wk"], params["sa_wv"],
        params["sa_bq"], params["sa_bk"], params["sa_bv"])
    q_sa = q2d.reshape(B, T, D)
    k_new = k2d.reshape(B, T, D)
    v_new = v2d.reshape(B, T, D)

    if pre_kv is not None:
        # TODO(synk): for incremental decode, write k/v into a preallocated
        #             cache via input_output_aliases instead of concatenating.
        k_prev = jnp.transpose(pre_kv[0], (0, 2, 1, 3)).reshape(B, -1, D)
        v_prev = jnp.transpose(pre_kv[1], (0, 2, 1, 3)).reshape(B, -1, D)
        k_all = jnp.concatenate([k_prev.astype(k_new.dtype), k_new], axis=1)
        v_all = jnp.concatenate([v_prev.astype(v_new.dtype), v_new], axis=1)
    else:
        k_all, v_all = k_new, v_new
    Tk = k_all.shape[1]
    new_pre_kv = jnp.stack([
        jnp.transpose(k_all.reshape(B, Tk, nhead, hd), (0, 2, 1, 3)),
        jnp.transpose(v_all.reshape(B, Tk, nhead, hd), (0, 2, 1, 3)),
    ], axis=0)                                                      # (2,B,H,Tk,hd)

    sa = multi_head_attention(q_sa, k_all, v_all, nhead, scale,
                              attn_bias=_as_additive(self_attn_mask))  # bf16
    # out_proj + residual + LayerNorm1 fused
    tgt_b = linear_residual_layernorm(
        sa.reshape(B * T, D), params["sa_w_out"], params["sa_b_out"],
        tgt_b.reshape(B * T, D), params["ln1_g"], params["ln1_b"],
    ).reshape(B, T, D)

    # ----------------------------- cross-attention ----------------------------
    xq = tgt_b if qpos_b is None else tgt_b + qpos_b
    xk = mem_b if pos_b is None else mem_b + pos_b
    q_ca = linear(xq.reshape(B * T, D), params["ca_wq"], params["ca_bq"]).reshape(B, T, D)
    k_ca = linear(xk.reshape(B * S, D), params["ca_wk"], params["ca_bk"]).reshape(B, S, D)
    v_ca = linear(mem_b.reshape(B * S, D), params["ca_wv"], params["ca_bv"]).reshape(B, S, D)

    kpm = None
    if memory_key_padding_mask is not None:
        kpm = jnp.where(memory_key_padding_mask, -1e9, 0.0)
        kpm = kpm.astype(jnp.float32).reshape(B, 1, S)

    ca = multi_head_attention(q_ca, k_ca, v_ca, nhead, scale, kpm=kpm)   # bf16
    # out_proj + residual + LayerNorm2 fused
    tgt_b = linear_residual_layernorm(
        ca.reshape(B * T, D), params["ca_w_out"], params["ca_b_out"],
        tgt_b.reshape(B * T, D), params["ln2_g"], params["ln2_b"],
    ).reshape(B, T, D)

    # -------------------------------- feed-forward ----------------------------
    h = linear(tgt_b.reshape(B * T, D), params["w1"], params["b1"],
               activation="relu")                                        # bf16
    # linear2 + residual + LayerNorm3 fused
    tgt_b = linear_residual_layernorm(
        h, params["w2"], params["b2"],
        tgt_b.reshape(B * T, D), params["ln3_g"], params["ln3_b"],
    ).reshape(B, T, D)

    return jnp.transpose(tgt_b, (1, 0, 2)), new_pre_kv


# ------------------------------------ main ------------------------------------


if __name__ == "__main__":
    d_model, nhead, dim_feedforward = 32, 4, 64
    Tq, Tk, B = 8, 16, 2

    key = jax.random.PRNGKey(0)
    k_params, k_tgt, k_mem, k_qpos, k_pos = jax.random.split(key, 5)

    params = prepare_params(init_params(k_params, d_model, nhead, dim_feedforward))
    tgt = jax.random.normal(k_tgt, (Tq, B, d_model), jnp.float32)
    memory = jax.random.normal(k_mem, (Tk, B, d_model), jnp.float32)
    query_pos = jax.random.normal(k_qpos, (Tq, B, d_model), jnp.float32)
    pos = jax.random.normal(k_pos, (Tk, B, d_model), jnp.float32)

    # additive causal mask for self-attention (0 on/below diag, -1e9 above)
    causal = jnp.where(jnp.triu(jnp.ones((Tq, Tq), bool), k=1), -1e9, 0.0)
    causal = causal.astype(jnp.float32)

    layer = jax.jit(lambda p, t, m, po, qp, am: transformer_decoder_layer(
        p, t, m, nhead, memory_key_padding_mask=None, pos=po,
        self_attn_mask=am, pre_kv=None, query_pos=qp))

    out, pre_kv = layer(params, tgt, memory, pos, query_pos, causal)

    jax.block_until_ready(out)
    jax.block_until_ready(pre_kv)
    assert out.shape == (Tq, B, d_model)
    assert pre_kv.shape == (2, B, nhead, Tq, d_model // nhead)
    assert bool(jnp.all(jnp.isfinite(out)))
    print("KERNEL_OK")
</pallas_src>

<mosaic_0001>
module attributes {stable_mosaic.version = 11 : i64} {
  func.func @_qkv_kernel(%arg0: i32, %arg1: i32, %arg2: i32, %arg3: memref<16x32xbf16, #tpu.memory_space<vmem>>, %arg4: memref<32x32xbf16, #tpu.memory_space<vmem>>, %arg5: memref<32x32xbf16, #tpu.memory_space<vmem>>, %arg6: memref<32x32xbf16, #tpu.memory_space<vmem>>, %arg7: memref<1x32xf32, #tpu.memory_space<vmem>>, %arg8: memref<1x32xf32, #tpu.memory_space<vmem>>, %arg9: memref<1x32xf32, #tpu.memory_space<vmem>>, %arg10: memref<16x32xbf16, #tpu.memory_space<vmem>>, %arg11: memref<16x32xbf16, #tpu.memory_space<vmem>>, %arg12: memref<16x32xbf16, #tpu.memory_space<vmem>>, %arg13: memref<16x32xf32, #tpu.memory_space<vmem>>, %arg14: memref<16x32xf32, #tpu.memory_space<vmem>>, %arg15: memref<16x32xf32, #tpu.memory_space<vmem>>) attributes {dimension_semantics = [#tpu.dimension_semantics<parallel>, #tpu.dimension_semantics<parallel>, #tpu.dimension_semantics<arbitrary>], iteration_bounds = array<i64: 1, 1, 1>, scalar_prefetch = 0 : i64, scratch_operands = 3 : i64, tpu.core_type = #tpu.core_type<tc>, window_params = [{transform_indices = @transform_0, window_bounds = array<i64: 16, 32>}, {transform_indices = @transform_1, window_bounds = array<i64: 32, 32>}, {transform_indices = @transform_2, window_bounds = array<i64: 32, 32>}, {transform_indices = @transform_3, window_bounds = array<i64: 32, 32>}, {transform_indices = @transform_4, window_bounds = array<i64: 1, 32>}, {transform_indices = @transform_5, window_bounds = array<i64: 1, 32>}, {transform_indices = @transform_6, window_bounds = array<i64: 1, 32>}, {transform_indices = @transform_7, window_bounds = array<i64: 16, 32>}, {transform_indices = @transform_8, window_bounds = array<i64: 16, 32>}, {transform_indices = @transform_9, window_bounds = array<i64: 16, 32>}]} {
    %c0_i32 = arith.constant 0 : i32
    %0 = arith.cmpi eq, %arg2, %c0_i32 : i32
    %1 = arith.extui %0 : i1 to i32
    %c0_i32_0 = arith.constant 0 : i32
    %2 = arith.cmpi ne, %1, %c0_i32_0 : i32
    scf.if %2 {
      %cst_24 = arith.constant 0.000000e+00 : f32
      %22 = vector.broadcast %cst_24 : f32 to vector<16x32xf32>
      %c0_25 = arith.constant 0 : index
      %c0_26 = arith.constant 0 : index
      %23 = vector.load %arg13[%c0_25, %c0_26] : memref<16x32xf32, #tpu.memory_space<vmem>>, vector<16x32xf32>
      tpu.vector_store %arg13[%c0_25, %c0_26], %22 {strides = array<i32>} : memref<16x32xf32, #tpu.memory_space<vmem>>, vector<16x32xf32>,
      %cst_27 = arith.constant 0.000000e+00 : f32
      %24 = vector.broadcast %cst_27 : f32 to vector<16x32xf32>
      %c0_28 = arith.constant 0 : index
      %c0_29 = arith.constant 0 : index
      %25 = vector.load %arg14[%c0_28, %c0_29] : memref<16x32xf32, #tpu.memory_space<vmem>>, vector<16x32xf32>
      tpu.vector_store %arg14[%c0_28, %c0_29], %24 {strides = array<i32>} : memref<16x32xf32, #tpu.memory_space<vmem>>, vector<16x32xf32>,
      %cst_30 = arith.constant 0.000000e+00 : f32
      %26 = vector.broadcast %cst_30 : f32 to vector<16x32xf32>
      %c0_31 = arith.constant 0 : index
      %c0_32 = arith.constant 0 : index
      %27 = vector.load %arg15[%c0_31, %c0_32] : memref<16x32xf32, #tpu.memory_space<vmem>>, vector<16x32xf32>
      tpu.vector_store %arg15[%c0_31, %c0_32], %26 {strides = array<i32>} : memref<16x32xf32, #tpu.memory_space<vmem>>, vector<16x32xf32>,
    } else {
    }
    %c0 = arith.constant 0 : index
    %c0_1 = arith.constant 0 : index
    %3 = vector.load %arg3[%c0, %c0_1] : memref<16x32xbf16, #tpu.memory_space<vmem>>, vector<16x32xbf16>
    %c0_2 = arith.constant 0 : index
    %c0_3 = arith.constant 0 : index
    %4 = vector.load %arg13[%c0_2, %c0_3] : memref<16x32xf32, #tpu.memory_space<vmem>>, vector<16x32xf32>
    %c0_4 = arith.constant 0 : index
    %c0_5 = arith.constant 0 : index
    %5 = vector.load %arg4[%c0_4, %c0_5] : memref<32x32xbf16, #tpu.memory_space<vmem>>, vector<32x32xbf16>
    %cst = arith.constant dense<0.000000e+00> : vector<16x32xf32>
    %6 = tpu.matmul %3, %5, %cst {dimension_numbers = #tpu.dot_dimension_numbers<[1], [0], [0], [1], [0, 0, 1, 1], [], []>} : vector<16x32xbf16>, vector<32x32xbf16>, vector<16x32xf32> -> vector<16x32xf32>
    %7 = arith.addf %4, %6 : vector<16x32xf32>
    %c0_6 = arith.constant 0 : index
    %c0_7 = arith.constant 0 : index
    %8 = vector.load %arg13[%c0_6, %c0_7] : memref<16x32xf32, #tpu.memory_space<vmem>>, vector<16x32xf32>
    tpu.vector_store %arg13[%c0_6, %c0_7], %7 {strides = array<i32>} : memref<16x32xf32, #tpu.memory_space<vmem>>, vector<16x32xf32>,
    %c0_8 = arith.constant 0 : index
    %c0_9 = arith.constant 0 : index
    %9 = vector.load %arg14[%c0_8, %c0_9] : memref<16x32xf32, #tpu.memory_space<vmem>>, vector<16x32xf32>
    %c0_10 = arith.constant 0 : index
    %c0_11 = arith.constant 0 : index
    %10 = vector.load %arg5[%c0_10, %c0_11] : memref<32x32xbf16, #tpu.memory_space<vmem>>, vector<32x32xbf16>
    %cst_12 = arith.constant dense<0.000000e+00> : vector<16x32xf32>
    %11 = tpu.matmul %3, %10, %cst_12 {dimension_numbers = #tpu.dot_dimension_numbers<[1], [0], [0], [1], [0, 0, 1, 1], [], []>} : vector<16x32xbf16>, vector<32x32xbf16>, vector<16x32xf32> -> vector<16x32xf32>
    %12 = arith.addf %9, %11 : vector<16x32xf32>
    %c0_13 = arith.constant 0 : index
    %c0_14 = arith.constant 0 : index
    %13 = vector.load %arg14[%c0_13, %c0_14] : memref<16x32xf32, #tpu.memory_space<vmem>>, vector<16x32xf32>
    tpu.vector_store %arg14[%c0_13, %c0_14], %12 {strides = array<i32>} : memref<16x32xf32, #tpu.memory_space<vmem>>, vector<16x32xf32>,
    %c0_15 = arith.constant 0 : index
    %c0_16 = arith.constant 0 : index
    %14 = vector.load %arg15[%c0_15, %c0_16] : memref<16x32xf32, #tpu.memory_space<vmem>>, vector<16x32xf32>
    %c0_17 = arith.constant 0 : index
    %c0_18 = arith.constant 0 : index
    %15 = vector.load %arg6[%c0_17, %c0_18] : memref<32x32xbf16, #tpu.memory_space<vmem>>, vector<32x32xbf16>
    %cst_19 = arith.constant dense<0.000000e+00> : vector<16x32xf32>
    %16 = tpu.matmul %3, %15, %cst_19 {dimension_numbers = #tpu.dot_dimension_numbers<[1], [0], [0], [1], [0, 0, 1, 1], [], []>} : vector<16x32xbf16>, vector<32x32xbf16>, vector<16x32xf32> -> vector<16x32xf32>
    %17 = arith.addf %14, %16 : vector<16x32xf32>
    %c0_20 = arith.constant 0 : index
    %c0_21 = arith.constant 0 : index
    %18 = vector.load %arg15[%c0_20, %c0_21] : memref<16x32xf32, #tpu.memory_space<vmem>>, vector<16x32xf32>
    tpu.vector_store %arg15[%c0_20, %c0_21], %17 {strides = array<i32>} : memref<16x32xf32, #tpu.memory_space<vmem>>, vector<16x32xf32>,
    %c0_i32_22 = arith.constant 0 : i32
    %19 = arith.cmpi eq, %arg2, %c0_i32_22 : i32
    %20 = arith.extui %19 : i1 to i32
    %c0_i32_23 = arith.constant 0 : i32
    %21 = arith.cmpi ne, %20, %c0_i32_23 : i32
    scf.if %21 {
      %c0_24 = arith.constant 0 : index
      %c0_25 = arith.constant 0 : index
      %22 = vector.load %arg13[%c0_24, %c0_25] : memref<16x32xf32, #tpu.memory_space<vmem>>, vector<16x32xf32>
      %c0_26 = arith.constant 0 : index
      %c0_27 = arith.constant 0 : index
      %23 = vector.load %arg7[%c0_26, %c0_27] : memref<1x32xf32, #tpu.memory_space<vmem>>, vector<1x32xf32>
      %24 = vector.broadcast %23 : vector<1x32xf32> to vector<16x32xf32>
      %25 = arith.addf %22, %24 : vector<16x32xf32>
      %26 = arith.truncf %25 : vector<16x32xf32> to vector<16x32xbf16>
      %c0_28 = arith.constant 0 : index
      %c0_29 = arith.constant 0 : index
      %27 = vector.load %arg10[%c0_28, %c0_29] : memref<16x32xbf16, #tpu.memory_space<vmem>>, vector<16x32xbf16>
      tpu.vector_store %arg10[%c0_28, %c0_29], %26 {strides = array<i32>} : memref<16x32xbf16, #tpu.memory_space<vmem>>, vector<16x32xbf16>,
      %c0_30 = arith.constant 0 : index
      %c0_31 = arith.constant 0 : index
      %28 = vector.load %arg14[%c0_30, %c0_31] : memref<16x32xf32, #tpu.memory_space<vmem>>, vector<16x32xf32>
      %c0_32 = arith.constant 0 : index
      %c0_33 = arith.constant 0 : index
      %29 = vector.load %arg8[%c0_32, %c0_33] : memref<1x32xf32, #tpu.memory_space<vmem>>, vector<1x32xf32>
      %30 = vector.broadcast %29 : vector<1x32xf32> to vector<16x32xf32>
      %31 = arith.addf %28, %30 : vector<16x32xf32>
      %32 = arith.truncf %31 : vector<16x32xf32> to vector<16x32xbf16>
      %c0_34 = arith.constant 0 : index
      %c0_35 = arith.constant 0 : index
      %33 = vector.load %arg11[%c0_34, %c0_35] : memref<16x32xbf16, #tpu.memory_space<vmem>>, vector<16x32xbf16>
      tpu.vector_store %arg11[%c0_34, %c0_35], %32 {strides = array<i32>} : memref<16x32xbf16, #tpu.memory_space<vmem>>, vector<16x32xbf16>,
      %c0_36 = arith.constant 0 : index
      %c0_37 = arith.constant 0 : index
      %34 = vector.load %arg15[%c0_36, %c0_37] : memref<16x32xf32, #tpu.memory_space<vmem>>, vector<16x32xf32>
      %c0_38 = arith.constant 0 : index
      %c0_39 = arith.constant 0 : index
      %35 = vector.load %arg9[%c0_38, %c0_39] : memref<1x32xf32, #tpu.memory_space<vmem>>, vector<1x32xf32>
      %36 = vector.broadcast %35 : vector<1x32xf32> to vector<16x32xf32>
      %37 = arith.addf %34, %36 : vector<16x32xf32>
      %38 = arith.truncf %37 : vector<16x32xf32> to vector<16x32xbf16>
      %c0_40 = arith.constant 0 : index
      %c0_41 = arith.constant 0 : index
      %39 = vector.load %arg12[%c0_40, %c0_41] : memref<16x32xbf16, #tpu.memory_space<vmem>>, vector<16x32xbf16>
      tpu.vector_store %arg12[%c0_40, %c0_41], %38 {strides = array<i32>} : memref<16x32xbf16, #tpu.memory_space<vmem>>, vector<16x32xbf16>,
    } else {
    }
    return
  }
  func.func @transform_0(%arg0: i32, %arg1: i32, %arg2: i32) -> (i32, i32) {
    %c0_i32 = arith.constant 0 : i32
    return %arg0, %arg2 : i32, i32
  }
  func.func @transform_1(%arg0: i32, %arg1: i32, %arg2: i32) -> (i32, i32) {
    %c0_i32 = arith.constant 0 : i32
    return %arg2, %arg1 : i32, i32
  }
  func.func @transform_2(%arg0: i32, %arg1: i32, %arg2: i32) -> (i32, i32) {
    %c0_i32 = arith.constant 0 : i32
    return %arg2, %arg1 : i32, i32
  }
  func.func @transform_3(%arg0: i32, %arg1: i32, %arg2: i32) -> (i32, i32) {
    %c0_i32 = arith.constant 0 : i32
    return %arg2, %arg1 : i32, i32
  }
  func.func @transform_4(%arg0: i32, %arg1: i32, %arg2: i32) -> (i32, i32) {
    %c0_i32 = arith.constant 0 : i32
    %c0_i32_0 = arith.constant 0 : i32
    return %c0_i32, %arg1 : i32, i32
  }
  func.func @transform_5(%arg0: i32, %arg1: i32, %arg2: i32) -> (i32, i32) {
    %c0_i32 = arith.constant 0 : i32
    %c0_i32_0 = arith.constant 0 : i32
    return %c0_i32, %arg1 : i32, i32
  }
  func.func @transform_6(%arg0: i32, %arg1: i32, %arg2: i32) -> (i32, i32) {
    %c0_i32 = arith.constant 0 : i32
    %c0_i32_0 = arith.constant 0 : i32
    return %c0_i32, %arg1 : i32, i32
  }
  func.func @transform_7(%arg0: i32, %arg1: i32, %arg2: i32) -> (i32, i32) {
    %c0_i32 = arith.constant 0 : i32
    return %arg0, %arg1 : i32, i32
  }
  func.func @transform_8(%arg0: i32, %arg1: i32, %arg2: i32) -> (i32, i32) {
    %c0_i32 = arith.constant 0 : i32
    return %arg0, %arg1 : i32, i32
  }
  func.func @transform_9(%arg0: i32, %arg1: i32, %arg2: i32) -> (i32, i32) {
    %c0_i32 = arith.constant 0 : i32
    return %arg0, %arg1 : i32, i32
  }
}

module attributes {stable_mosaic.version = 11 : i64} {
  func.func @_mha_kernel(%arg0: i32, %arg1: i32, %arg2: i32, %arg3: memref<1x8x32xbf16, #tpu.memory_space<vmem>>, %arg4: memref<1x8x32xbf16, #tpu.memory_space<vmem>>, %arg5: memref<1x8x32xbf16, #tpu.memory_space<vmem>>, %arg6: memref<8x8xf32, #tpu.memory_space<vmem>>, %arg7: memref<1x8x32xbf16, #tpu.memory_space<vmem>>, %arg8: memref<4x8x1xf32, #tpu.memory_space<vmem>>, %arg9: memref<4x8x1xf32, #tpu.memory_space<vmem>>, %arg10: memref<8x32xf32, #tpu.memory_space<vmem>>) attributes {dimension_semantics = [#tpu.dimension_semantics<parallel>, #tpu.dimension_semantics<parallel>, #tpu.dimension_semantics<arbitrary>], iteration_bounds = array<i64: 2, 1, 1>, scalar_prefetch = 0 : i64, scratch_operands = 3 : i64, tpu.core_type = #tpu.core_type<tc>, window_params = [{transform_indices = @transform_0, window_bounds = array<i64: 1, 8, 32>}, {transform_indices = @transform_1, window_bounds = array<i64: 1, 8, 32>}, {transform_indices = @transform_2, window_bounds = array<i64: 1, 8, 32>}, {transform_indices = @transform_3, window_bounds = array<i64: 8, 8>}, {transform_indices = @transform_4, window_bounds = array<i64: 1, 8, 32>}]} {
    %c0 = arith.constant 0 : index
    %c0_0 = arith.constant 0 : index
    %0 = vector.load %arg6[%c0, %c0_0] : memref<8x8xf32, #tpu.memory_space<vmem>>, vector<8x8xf32>
    %c0_i32 = arith.constant 0 : i32
    %1 = arith.cmpi eq, %arg2, %c0_i32 : i32
    %2 = arith.extui %1 : i1 to i32
    %c0_i32_1 = arith.constant 0 : i32
    %3 = arith.cmpi ne, %2, %c0_i32_1 : i32
    scf.if %3 {
      %cst_78 = arith.constant 0xFF800000 : f32
      %145 = vector.broadcast %cst_78 : f32 to vector<4x8x1xf32>
      %c0_79 = arith.constant 0 : index
      %c0_80 = arith.constant 0 : index
      %c0_81 = arith.constant 0 : index
      %146 = vector.load %arg8[%c0_79, %c0_80, %c0_81] : memref<4x8x1xf32, #tpu.memory_space<vmem>>, vector<4x8x1xf32>
      tpu.vector_store %arg8[%c0_79, %c0_80, %c0_81], %145 {strides = array<i32>} : memref<4x8x1xf32, #tpu.memory_space<vmem>>, vector<4x8x1xf32>,
      %cst_82 = arith.constant 0.000000e+00 : f32
      %147 = vector.broadcast %cst_82 : f32 to vector<4x8x1xf32>
      %c0_83 = arith.constant 0 : index
      %c0_84 = arith.constant 0 : index
      %c0_85 = arith.constant 0 : index
      %148 = vector.load %arg9[%c0_83, %c0_84, %c0_85] : memref<4x8x1xf32, #tpu.memory_space<vmem>>, vector<4x8x1xf32>
      tpu.vector_store %arg9[%c0_83, %c0_84, %c0_85], %147 {strides = array<i32>} : memref<4x8x1xf32, #tpu.memory_space<vmem>>, vector<4x8x1xf32>,
      %cst_86 = arith.constant 0.000000e+00 : f32
      %149 = vector.broadcast %cst_86 : f32 to vector<8x32xf32>
      %c0_87 = arith.constant 0 : index
      %c0_88 = arith.constant 0 : index
      %150 = vector.load %arg10[%c0_87, %c0_88] : memref<8x32xf32, #tpu.memory_space<vmem>>, vector<8x32xf32>
      tpu.vector_store %arg10[%c0_87, %c0_88], %149 {strides = array<i32>} : memref<8x32xf32, #tpu.memory_space<vmem>>, vector<8x32xf32>,
    } else {
    }
    %c0_2 = arith.constant 0 : index
    %c0_3 = arith.constant 0 : index
    %c0_4 = arith.constant 0 : index
    %4 = vector.load %arg3[%c0_2, %c0_3, %c0_4] : memref<1x8x32xbf16, #tpu.memory_space<vmem>>, vector<1x8x32xbf16>
    %5 = vector.shape_cast %4 : vector<1x8x32xbf16> to vector<8x32xbf16>
    %cst = arith.constant 3.535160e-01 : bf16
    %6 = vector.broadcast %cst : bf16 to vector<8x32xbf16>
    %7 = arith.mulf %5, %6 : vector<8x32xbf16>
    %c0_5 = arith.constant 0 : index
    %c0_6 = arith.constant 0 : index
    %c0_7 = arith.constant 0 : index
    %8 = vector.load %arg4[%c0_5, %c0_6, %c0_7] : memref<1x8x32xbf16, #tpu.memory_space<vmem>>, vector<1x8x32xbf16>
    %9 = vector.shape_cast %8 : vector<1x8x32xbf16> to vector<8x32xbf16>
    %c0_8 = arith.constant 0 : index
    %c0_9 = arith.constant 0 : index
    %c0_10 = arith.constant 0 : index
    %10 = vector.load %arg5[%c0_8, %c0_9, %c0_10] : memref<1x8x32xbf16, #tpu.memory_space<vmem>>, vector<1x8x32xbf16>
    %11 = vector.shape_cast %10 : vector<1x8x32xbf16> to vector<8x32xbf16>
    %c0_11 = arith.constant 0 : index
    %c0_12 = arith.constant 0 : index
    %12 = vector.load %arg10[%c0_11, %c0_12] : memref<8x32xf32, #tpu.memory_space<vmem>>, vector<8x32xf32>
    %13 = vector.extract_strided_slice %7 {offsets = [0, 0], sizes = [8, 8], strides = [1, 1]} : vector<8x32xbf16> to vector<8x8xbf16>
    %14 = vector.extract_strided_slice %9 {offsets = [0, 0], sizes = [8, 8], strides = [1, 1]} : vector<8x32xbf16> to vector<8x8xbf16>
    %cst_13 = arith.constant dense<0.000000e+00> : vector<8x8xf32>
    %15 = tpu.matmul %13, %14, %cst_13 {dimension_numbers = #tpu.dot_dimension_numbers<[1], [1], [0], [0], [0, 0, 1, 0], [], []>} : vector<8x8xbf16>, vector<8x8xbf16>, vector<8x8xf32> -> vector<8x8xf32>
    %16 = arith.addf %15, %0 : vector<8x8xf32>
    %c0_14 = arith.constant 0 : index
    %c0_15 = arith.constant 0 : index
    %c0_16 = arith.constant 0 : index
    %17 = vector.load %arg8[%c0_14, %c0_15, %c0_16] : memref<4x8x1xf32, #tpu.memory_space<vmem>>, vector<1x8x1xf32>
    %18 = vector.shape_cast %17 : vector<1x8x1xf32> to vector<8x1xf32>
    %cst_17 = arith.constant dense<0xFF800000> : vector<8xf32>
    %19 = vector.multi_reduction <maximumf>, %16, %cst_17 [1] : vector<8x8xf32> to vector<8xf32>
    %20 = vector.shape_cast %19 : vector<8xf32> to vector<8x1xf32>
    %21 = arith.maximumf %18, %20 : vector<8x1xf32>
    %22 = arith.subf %18, %21 : vector<8x1xf32>
    %23 = math.exp %22 : vector<8x1xf32>
    %24 = vector.broadcast %21 : vector<8x1xf32> to vector<8x8xf32>
    %25 = arith.subf %16, %24 : vector<8x8xf32>
    %26 = math.exp %25 : vector<8x8xf32>
    %c0_18 = arith.constant 0 : index
    %c0_19 = arith.constant 0 : index
    %c0_20 = arith.constant 0 : index
    %27 = vector.load %arg9[%c0_18, %c0_19, %c0_20] : memref<4x8x1xf32, #tpu.memory_space<vmem>>, vector<1x8x1xf32>
    %28 = vector.shape_cast %27 : vector<1x8x1xf32> to vector<8x1xf32>
    %29 = arith.mulf %23, %28 : vector<8x1xf32>
    %cst_21 = arith.constant dense<0.000000e+00> : vector<8xf32>
    %30 = vector.multi_reduction <add>, %26, %cst_21 [1] : vector<8x8xf32> to vector<8xf32>
    %31 = vector.shape_cast %30 : vector<8xf32> to vector<8x1xf32>
    %32 = arith.addf %29, %31 : vector<8x1xf32>
    %c0_22 = arith.constant 0 : index
    %c0_23 = arith.constant 0 : index
    %c0_24 = arith.constant 0 : index
    %33 = vector.load %arg8[%c0_22, %c0_23, %c0_24] : memref<4x8x1xf32, #tpu.memory_space<vmem>>, vector<1x8x1xf32>
    %34 = vector.shape_cast %33 : vector<1x8x1xf32> to vector<8x1xf32>
    %35 = vector.shape_cast %21 : vector<8x1xf32> to vector<1x8x1xf32>
    tpu.vector_store %arg8[%c0_22, %c0_23, %c0_24], %35 {strides = array<i32>} : memref<4x8x1xf32, #tpu.memory_space<vmem>>, vector<1x8x1xf32>,
    %c0_25 = arith.constant 0 : index
    %c0_26 = arith.constant 0 : index
    %c0_27 = arith.constant 0 : index
    %36 = vector.load %arg9[%c0_25, %c0_26, %c0_27] : memref<4x8x1xf32, #tpu.memory_space<vmem>>, vector<1x8x1xf32>
    %37 = vector.shape_cast %36 : vector<1x8x1xf32> to vector<8x1xf32>
    %38 = vector.shape_cast %32 : vector<8x1xf32> to vector<1x8x1xf32>
    tpu.vector_store %arg9[%c0_25, %c0_26, %c0_27], %38 {strides = array<i32>} : memref<4x8x1xf32, #tpu.memory_space<vmem>>, vector<1x8x1xf32>,
    %39 = arith.truncf %26 : vector<8x8xf32> to vector<8x8xbf16>
    %40 = vector.extract_strided_slice %11 {offsets = [0, 0], sizes = [8, 8], strides = [1, 1]} : vector<8x32xbf16> to vector<8x8xbf16>
    %cst_28 = arith.constant dense<0.000000e+00> : vector<8x8xf32>
    %41 = tpu.matmul %39, %40, %cst_28 {dimension_numbers = #tpu.dot_dimension_numbers<[1], [0], [0], [1], [0, 0, 1, 1], [], []>} : vector<8x8xbf16>, vector<8x8xbf16>, vector<8x8xf32> -> vector<8x8xf32>
    %42 = vector.shape_cast %23 : vector<8x1xf32> to vector<8x1xf32>
    %43 = vector.broadcast %42 : vector<8x1xf32> to vector<8x8xf32>
    %44 = vector.extract_strided_slice %7 {offsets = [0, 8], sizes = [8, 8], strides = [1, 1]} : vector<8x32xbf16> to vector<8x8xbf16>
    %45 = vector.extract_strided_slice %9 {offsets = [0, 8], sizes = [8, 8], strides = [1, 1]} : vector<8x32xbf16> to vector<8x8xbf16>
    %cst_29 = arith.constant dense<0.000000e+00> : vector<8x8xf32>
    %46 = tpu.matmul %44, %45, %cst_29 {dimension_numbers = #tpu.dot_dimension_numbers<[1], [1], [0], [0], [0, 0, 1, 0], [], []>} : vector<8x8xbf16>, vector<8x8xbf16>, vector<8x8xf32> -> vector<8x8xf32>
    %47 = arith.addf %46, %0 : vector<8x8xf32>
    %c1 = arith.constant 1 : index
    %c0_30 = arith.constant 0 : index
    %c0_31 = arith.constant 0 : index
    %48 = vector.load %arg8[%c1, %c0_30, %c0_31] : memref<4x8x1xf32, #tpu.memory_space<vmem>>, vector<1x8x1xf32>
    %49 = vector.shape_cast %48 : vector<1x8x1xf32> to vector<8x1xf32>
    %cst_32 = arith.constant dense<0xFF800000> : vector<8xf32>
    %50 = vector.multi_reduction <maximumf>, %47, %cst_32 [1] : vector<8x8xf32> to vector<8xf32>
    %51 = vector.shape_cast %50 : vector<8xf32> to vector<8x1xf32>
    %52 = arith.maximumf %49, %51 : vector<8x1xf32>
    %53 = arith.subf %49, %52 : vector<8x1xf32>
    %54 = math.exp %53 : vector<8x1xf32>
    %55 = vector.broadcast %52 : vector<8x1xf32> to vector<8x8xf32>
    %56 = arith.subf %47, %55 : vector<8x8xf32>
    %57 = math.exp %56 : vector<8x8xf32>
    %c1_33 = arith.constant 1 : index
    %c0_34 = arith.constant 0 : index
    %c0_35 = arith.constant 0 : index
    %58 = vector.load %arg9[%c1_33, %c0_34, %c0_35] : memref<4x8x1xf32, #tpu.memory_space<vmem>>, vector<1x8x1xf32>
    %59 = vector.shape_cast %58 : vector<1x8x1xf32> to vector<8x1xf32>
    %60 = arith.mulf %54, %59 : vector<8x1xf32>
    %cst_36 = arith.constant dense<0.000000e+00> : vector<8xf32>
    %61 = vector.multi_reduction <add>, %57, %cst_36 [1] : vector<8x8xf32> to vector<8xf32>
    %62 = vector.shape_cast %61 : vector<8xf32> to vector<8x1xf32>
    %63 = arith.addf %60, %62 : vector<8x1xf32>
    %c1_37 = arith.constant 1 : index
    %c0_38 = arith.constant 0 : index
    %c0_39 = arith.constant 0 : index
    %64 = vector.load %arg8[%c1_37, %c0_38, %c0_39] : memref<4x8x1xf32, #tpu.memory_space<vmem>>, vector<1x8x1xf32>
    %65 = vector.shape_cast %64 : vector<1x8x1xf32> to vector<8x1xf32>
    %66 = vector.shape_cast %52 : vector<8x1xf32> to vector<1x8x1xf32>
    tpu.vector_store %arg8[%c1_37, %c0_38, %c0_39], %66 {strides = array<i32>} : memref<4x8x1xf32, #tpu.memory_space<vmem>>, vector<1x8x1xf32>,
    %c1_40 = arith.constant 1 : index
    %c0_41 = arith.constant 0 : index
    %c0_42 = arith.constant 0 : index
    %67 = vector.load %arg9[%c1_40, %c0_41, %c0_42] : memref<4x8x1xf32, #tpu.memory_space<vmem>>, vector<1x8x1xf32>
    %68 = vector.shape_cast %67 : vector<1x8x1xf32> to vector<8x1xf32>
    %69 = vector.shape_cast %63 : vector<8x1xf32> to vector<1x8x1xf32>
    tpu.vector_store %arg9[%c1_40, %c0_41, %c0_42], %69 {strides = array<i32>} : memref<4x8x1xf32, #tpu.memory_space<vmem>>, vector<1x8x1xf32>,
    %70 = arith.truncf %57 : vector<8x8xf32> to vector<8x8xbf16>
    %71 = vector.extract_strided_slice %11 {offsets = [0, 8], sizes = [8, 8], strides = [1, 1]} : vector<8x32xbf16> to vector<8x8xbf16>
    %cst_43 = arith.constant dense<0.000000e+00> : vector<8x8xf32>
    %72 = tpu.matmul %70, %71, %cst_43 {dimension_numbers = #tpu.dot_dimension_numbers<[1], [0], [0], [1], [0, 0, 1, 1], [], []>} : vector<8x8xbf16>, vector<8x8xbf16>, vector<8x8xf32> -> vector<8x8xf32>
    %73 = vector.shape_cast %54 : vector<8x1xf32> to vector<8x1xf32>
    %74 = vector.broadcast %73 : vector<8x1xf32> to vector<8x8xf32>
    %75 = vector.extract_strided_slice %7 {offsets = [0, 16], sizes = [8, 8], strides = [1, 1]} : vector<8x32xbf16> to vector<8x8xbf16>
    %76 = vector.extract_strided_slice %9 {offsets = [0, 16], sizes = [8, 8], strides = [1, 1]} : vector<8x32xbf16> to vector<8x8xbf16>
    %cst_44 = arith.constant dense<0.000000e+00> : vector<8x8xf32>
    %77 = tpu.matmul %75, %76, %cst_44 {dimension_numbers = #tpu.dot_dimension_numbers<[1], [1], [0], [0], [0, 0, 1, 0], [], []>} : vector<8x8xbf16>, vector<8x8xbf16>, vector<8x8xf32> -> vector<8x8xf32>
    %78 = arith.addf %77, %0 : vector<8x8xf32>
    %c2 = arith.constant 2 : index
    %c0_45 = arith.constant 0 : index
    %c0_46 = arith.constant 0 : index
    %79 = vector.load %arg8[%c2, %c0_45, %c0_46] : memref<4x8x1xf32, #tpu.memory_space<vmem>>, vector<1x8x1xf32>
    %80 = vector.shape_cast %79 : vector<1x8x1xf32> to vector<8x1xf32>
    %cst_47 = arith.constant dense<0xFF800000> : vector<8xf32>
    %81 = vector.multi_reduction <maximumf>, %78, %cst_47 [1] : vector<8x8xf32> to vector<8xf32>
    %82 = vector.shape_cast %81 : vector<8xf32> to vector<8x1xf32>
    %83 = arith.maximumf %80, %82 : vector<8x1xf32>
    %84 = arith.subf %80, %83 : vector<8x1xf32>
    %85 = math.exp %84 : vector<8x1xf32>
    %86 = vector.broadcast %83 : vector<8x1xf32> to vector<8x8xf32>
    %87 = arith.subf %78, %86 : vector<8x8xf32>
    %88 = math.exp %87 : vector<8x8xf32>
    %c2_48 = arith.constant 2 : index
    %c0_49 = arith.constant 0 : index
    %c0_50 = arith.constant 0 : index
    %89 = vector.load %arg9[%c2_48, %c0_49, %c0_50] : memref<4x8x1xf32, #tpu.memory_space<vmem>>, vector<1x8x1xf32>
    %90 = vector.shape_cast %89 : vector<1x8x1xf32> to vector<8x1xf32>
    %91 = arith.mulf %85, %90 : vector<8x1xf32>
    %cst_51 = arith.constant dense<0.000000e+00> : vector<8xf32>
    %92 = vector.multi_reduction <add>, %88, %cst_51 [1] : vector<8x8xf32> to vector<8xf32>
    %93 = vector.shape_cast %92 : vector<8xf32> to vector<8x1xf32>
    %94 = arith.addf %91, %93 : vector<8x1xf32>
    %c2_52 = arith.constant 2 : index
    %c0_53 = arith.constant 0 : index
    %c0_54 = arith.constant 0 : index
    %95 = vector.load %arg8[%c2_52, %c0_53, %c0_54] : memref<4x8x1xf32, #tpu.memory_space<vmem>>, vector<1x8x1xf32>
    %96 = vector.shape_cast %95 : vector<1x8x1xf32> to vector<8x1xf32>
    %97 = vector.shape_cast %83 : vector<8x1xf32> to vector<1x8x1xf32>
    tpu.vector_store %arg8[%c2_52, %c0_53, %c0_54], %97 {strides = array<i32>} : memref<4x8x1xf32, #tpu.memory_space<vmem>>, vector<1x8x1xf32>,
    %c2_55 = arith.constant 2 : index
    %c0_56 = arith.constant 0 : index
    %c0_57 = arith.constant 0 : index
    %98 = vector.load %arg9[%c2_55, %c0_56, %c0_57] : memref<4x8x1xf32, #tpu.memory_space<vmem>>, vector<1x8x1xf32>
    %99 = vector.shape_cast %98 : vector<1x8x1xf32> to vector<8x1xf32>
    %100 = vector.shape_cast %94 : vector<8x1xf32> to vector<1x8x1xf32>
    tpu.vector_store %arg9[%c2_55, %c0_56, %c0_57], %100 {strides = array<i32>} : memref<4x8x1xf32, #tpu.memory_space<vmem>>, vector<1x8x1xf32>,
    %101 = arith.truncf %88 : vector<8x8xf32> to vector<8x8xbf16>
    %102 = vector.extract_strided_slice %11 {offsets = [0, 16], sizes = [8, 8], strides = [1, 1]} : vector<8x32xbf16> to vector<8x8xbf16>
    %cst_58 = arith.constant dense<0.000000e+00> : vector<8x8xf32>
    %103 = tpu.matmul %101, %102, %cst_58 {dimension_numbers = #tpu.dot_dimension_numbers<[1], [0], [0], [1], [0, 0, 1, 1], [], []>} : vector<8x8xbf16>, vector<8x8xbf16>, vector<8x8xf32> -> vector<8x8xf32>
    %104 = vector.shape_cast %85 : vector<8x1xf32> to vector<8x1xf32>
    %105 = vector.broadcast %104 : vector<8x1xf32> to vector<8x8xf32>
    %106 = vector.extract_strided_slice %7 {offsets = [0, 24], sizes = [8, 8], strides = [1, 1]} : vector<8x32xbf16> to vector<8x8xbf16>
    %107 = vector.extract_strided_slice %9 {offsets = [0, 24], sizes = [8, 8], strides = [1, 1]} : vector<8x32xbf16> to vector<8x8xbf16>
    %cst_59 = arith.constant dense<0.000000e+00> : vector<8x8xf32>
    %108 = tpu.matmul %106, %107, %cst_59 {dimension_numbers = #tpu.dot_dimension_numbers<[1], [1], [0], [0], [0, 0, 1, 0], [], []>} : vector<8x8xbf16>, vector<8x8xbf16>, vector<8x8xf32> -> vector<8x8xf32>
    %109 = arith.addf %108, %0 : vector<8x8xf32>
    %c3 = arith.constant 3 : index
    %c0_60 = arith.constant 0 : index
    %c0_61 = arith.constant 0 : index
    %110 = vector.load %arg8[%c3, %c0_60, %c0_61] : memref<4x8x1xf32, #tpu.memory_space<vmem>>, vector<1x8x1xf32>
    %111 = vector.shape_cast %110 : vector<1x8x1xf32> to vector<8x1xf32>
    %cst_62 = arith.constant dense<0xFF800000> : vector<8xf32>
    %112 = vector.multi_reduction <maximumf>, %109, %cst_62 [1] : vector<8x8xf32> to vector<8xf32>
    %113 = vector.shape_cast %112 : vector<8xf32> to vector<8x1xf32>
    %114 = arith.maximumf %111, %113 : vector<8x1xf32>
    %115 = arith.subf %111, %114 : vector<8x1xf32>
    %116 = math.exp %115 : vector<8x1xf32>
    %117 = vector.broadcast %114 : vector<8x1xf32> to vector<8x8xf32>
    %118 = arith.subf %109, %117 : vector<8x8xf32>
    %119 = math.exp %118 : vector<8x8xf32>
    %c3_63 = arith.constant 3 : index
    %c0_64 = arith.constant 0 : index
    %c0_65 = arith.constant 0 : index
    %120 = vector.load %arg9[%c3_63, %c0_64, %c0_65] : memref<4x8x1xf32, #tpu.memory_space<vmem>>, vector<1x8x1xf32>
    %121 = vector.shape_cast %120 : vector<1x8x1xf32> to vector<8x1xf32>
    %122 = arith.mulf %116, %121 : vector<8x1xf32>
    %cst_66 = arith.constant dense<0.000000e+00> : vector<8xf32>
    %123 = vector.multi_reduction <add>, %119, %cst_66 [1] : vector<8x8xf32> to vector<8xf32>
    %124 = vector.shape_cast %123 : vector<8xf32> to vector<8x1xf32>
    %125 = arith.addf %122, %124 : vector<8x1xf32>
    %c3_67 = arith.constant 3 : index
    %c0_68 = arith.constant 0 : index
    %c0_69 = arith.constant 0 : index
    %126 = vector.load %arg8[%c3_67, %c0_68, %c0_69] : memref<4x8x1xf32, #tpu.memory_space<vmem>>, vector<1x8x1xf32>
    %127 = vector.shape_cast %126 : vector<1x8x1xf32> to vector<8x1xf32>
    %128 = vector.shape_cast %114 : vector<8x1xf32> to vector<1x8x1xf32>
    tpu.vector_store %arg8[%c3_67, %c0_68, %c0_69], %128 {strides = array<i32>} : memref<4x8x1xf32, #tpu.memory_space<vmem>>, vector<1x8x1xf32>,
    %c3_70 = arith.constant 3 : index
    %c0_71 = arith.constant 0 : index
    %c0_72 = arith.constant 0 : index
    %129 = vector.load %arg9[%c3_70, %c0_71, %c0_72] : memref<4x8x1xf32, #tpu.memory_space<vmem>>, vector<1x8x1xf32>
    %130 = vector.shape_cast %129 : vector<1x8x1xf32> to vector<8x1xf32>
    %131 = vector.shape_cast %125 : vector<8x1xf32> to vector<1x8x1xf32>
    tpu.vector_store %arg9[%c3_70, %c0_71, %c0_72], %131 {strides = array<i32>} : memref<4x8x1xf32, #tpu.memory_space<vmem>>, vector<1x8x1xf32>,
    %132 = arith.truncf %119 : vector<8x8xf32> to vector<8x8xbf16>
    %133 = vector.extract_strided_slice %11 {offsets = [0, 24], sizes = [8, 8], strides = [1, 1]} : vector<8x32xbf16> to vector<8x8xbf16>
    %cst_73 = arith.constant dense<0.000000e+00> : vector<8x8xf32>
    %134 = tpu.matmul %132, %133, %cst_73 {dimension_numbers = #tpu.dot_dimension_numbers<[1], [0], [0], [1], [0, 0, 1, 1], [], []>} : vector<8x8xbf16>, vector<8x8xbf16>, vector<8x8xf32> -> vector<8x8xf32>
    %135 = vector.shape_cast %116 : vector<8x1xf32> to vector<8x1xf32>
    %136 = vector.broadcast %135 : vector<8x1xf32> to vector<8x8xf32>
    %137 = tpu.concatenate %43, %74, %105, %136 in 1 : vector<8x8xf32>, vector<8x8xf32>, vector<8x8xf32>, vector<8x8xf32> -> vector<8x32xf32>
    %138 = arith.mulf %12, %137 : vector<8x32xf32>
    %139 = tpu.concatenate %41, %72, %103, %134 in 1 : vector<8x8xf32>, vector<8x8xf32>, vector<8x8xf32>, vector<8x8xf32> -> vector<8x32xf32>
    %140 = arith.addf %138, %139 : vector<8x32xf32>
    %c0_74 = arith.constant 0 : index
    %c0_75 = arith.constant 0 : index
    %141 = vector.load %arg10[%c0_74, %c0_75] : memref<8x32xf32, #tpu.memory_space<vmem>>, vector<8x32xf32>
    tpu.vector_store %arg10[%c0_74, %c0_75], %140 {strides = array<i32>} : memref<8x32xf32, #tpu.memory_space<vmem>>, vector<8x32xf32>,
    %c0_i32_76 = arith.constant 0 : i32
    %142 = arith.cmpi eq, %arg2, %c0_i32_76 : i32
    %143 = arith.extui %142 : i1 to i32
    %c0_i32_77 = arith.constant 0 : i32
    %144 = arith.cmpi ne, %143, %c0_i32_77 : i32
    scf.if %144 {
      %145 = tpu.reciprocal %32 {approx = true} : vector<8x1xf32> -> vector<8x1xf32>
      %146 = vector.shape_cast %145 : vector<8x1xf32> to vector<8x1xf32>
      %147 = vector.broadcast %146 : vector<8x1xf32> to vector<8x8xf32>
      %148 = tpu.reciprocal %63 {approx = true} : vector<8x1xf32> -> vector<8x1xf32>
      %149 = vector.shape_cast %148 : vector<8x1xf32> to vector<8x1xf32>
      %150 = vector.broadcast %149 : vector<8x1xf32> to vector<8x8xf32>
      %151 = tpu.reciprocal %94 {approx = true} : vector<8x1xf32> -> vector<8x1xf32>
      %152 = vector.shape_cast %151 : vector<8x1xf32> to vector<8x1xf32>
      %153 = vector.broadcast %152 : vector<8x1xf32> to vector<8x8xf32>
      %154 = tpu.reciprocal %125 {approx = true} : vector<8x1xf32> -> vector<8x1xf32>
      %155 = vector.shape_cast %154 : vector<8x1xf32> to vector<8x1xf32>
      %156 = vector.broadcast %155 : vector<8x1xf32> to vector<8x8xf32>
      %157 = tpu.concatenate %147, %150, %153, %156 in 1 : vector<8x8xf32>, vector<8x8xf32>, vector<8x8xf32>, vector<8x8xf32> -> vector<8x32xf32>
      %158 = arith.mulf %140, %157 : vector<8x32xf32>
      %159 = arith.truncf %158 : vector<8x32xf32> to vector<8x32xbf16>
      %c0_78 = arith.constant 0 : index
      %c0_79 = arith.constant 0 : index
      %c0_80 = arith.constant 0 : index
      %160 = vector.load %arg7[%c0_78, %c0_79, %c0_80] : memref<1x8x32xbf16, #tpu.memory_space<vmem>>, vector<1x8x32xbf16>
      %161 = vector.shape_cast %160 : vector<1x8x32xbf16> to vector<8x32xbf16>
      %162 = vector.shape_cast %159 : vector<8x32xbf16> to vector<1x8x32xbf16>
      tpu.vector_store %arg7[%c0_78, %c0_79, %c0_80], %162 {strides = array<i32>} : memref<1x8x32xbf16, #tpu.memory_space<vmem>>, vector<1x8x32xbf16>,
    } else {
    }
    return
  }
  func.func @transform_0(%arg0: i32, %arg1: i32, %arg2: i32) -> (i32, i32, i32) {
    %c0_i32 = arith.constant 0 : i32
    %c0_i32_0 = arith.constant 0 : i32
    return %arg0, %arg1, %c0_i32 : i32, i32, i32
  }
  func.func @transform_1(%arg0: i32, %arg1: i32, %arg2: i32) -> (i32, i32, i32) {
    %c0_i32 = arith.constant 0 : i32
    %c0_i32_0 = arith.constant 0 : i32
    return %arg0, %arg2, %c0_i32 : i32, i32, i32
  }
  func.func @transform_2(%arg0: i32, %arg1: i32, %arg2: i32) -> (i32, i32, i32) {
    %c0_i32 = arith.constant 0 : i32
    %c0_i32_0 = arith.constant 0 : i32
    return %arg0, %arg2, %c0_i32 : i32, i32, i32
  }
  func.func @transform_3(%arg0: i32, %arg1: i32, %arg2: i32) -> (i32, i32) {
    %c0_i32 = arith.constant 0 : i32
    return %arg1, %arg2 : i32, i32
  }
  func.func @transform_4(%arg0: i32, %arg1: i32, %arg2: i32) -> (i32, i32, i32) {
    %c0_i32 = arith.constant 0 : i32
    %c0_i32_0 = arith.constant 0 : i32
    return %arg0, %arg1, %c0_i32 : i32, i32, i32
  }
}

module attributes {stable_mosaic.version = 11 : i64} {
  func.func @_linear_kernel(%arg0: i32, %arg1: i32, %arg2: i32, %arg3: memref<16x32xbf16, #tpu.memory_space<vmem>>, %arg4: memref<32x32xbf16, #tpu.memory_space<vmem>>, %arg5: memref<1x32xf32, #tpu.memory_space<vmem>>, %arg6: memref<16x32xbf16, #tpu.memory_space<vmem>>, %arg7: memref<16x32xf32, #tpu.memory_space<vmem>>) attributes {dimension_semantics = [#tpu.dimension_semantics<parallel>, #tpu.dimension_semantics<parallel>, #tpu.dimension_semantics<arbitrary>], iteration_bounds = array<i64: 1, 1, 1>, scalar_prefetch = 0 : i64, scratch_operands = 1 : i64, tpu.core_type = #tpu.core_type<tc>, window_params = [{transform_indices = @transform_0, window_bounds = array<i64: 16, 32>}, {transform_indices = @transform_1, window_bounds = array<i64: 32, 32>}, {transform_indices = @transform_2, window_bounds = array<i64: 1, 32>}, {transform_indices = @transform_3, window_bounds = array<i64: 16, 32>}]} {
    %c0_i32 = arith.constant 0 : i32
    %0 = arith.cmpi eq, %arg2, %c0_i32 : i32
    %1 = arith.extui %0 : i1 to i32
    %c0_i32_0 = arith.constant 0 : i32
    %2 = arith.cmpi ne, %1, %c0_i32_0 : i32
    scf.if %2 {
      %cst_10 = arith.constant 0.000000e+00 : f32
      %12 = vector.broadcast %cst_10 : f32 to vector<16x32xf32>
      %c0_11 = arith.constant 0 : index
      %c0_12 = arith.constant 0 : index
      %13 = vector.load %arg7[%c0_11, %c0_12] : memref<16x32xf32, #tpu.memory_space<vmem>>, vector<16x32xf32>
      tpu.vector_store %arg7[%c0_11, %c0_12], %12 {strides = array<i32>} : memref<16x32xf32, #tpu.memory_space<vmem>>, vector<16x32xf32>,
    } else {
    }
    %c0 = arith.constant 0 : index
    %c0_1 = arith.constant 0 : index
    %3 = vector.load %arg7[%c0, %c0_1] : memref<16x32xf32, #tpu.memory_space<vmem>>, vector<16x32xf32>
    %c0_2 = arith.constant 0 : index
    %c0_3 = arith.constant 0 : index
    %4 = vector.load %arg3[%c0_2, %c0_3] : memref<16x32xbf16, #tpu.memory_space<vmem>>, vector<16x32xbf16>
    %c0_4 = arith.constant 0 : index
    %c0_5 = arith.constant 0 : index
    %5 = vector.load %arg4[%c0_4, %c0_5] : memref<32x32xbf16, #tpu.memory_space<vmem>>, vector<32x32xbf16>
    %cst = arith.constant dense<0.000000e+00> : vector<16x32xf32>
    %6 = tpu.matmul %4, %5, %cst {dimension_numbers = #tpu.dot_dimension_numbers<[1], [0], [0], [1], [0, 0, 1, 1], [], []>} : vector<16x32xbf16>, vector<32x32xbf16>, vector<16x32xf32> -> vector<16x32xf32>
    %7 = arith.addf %3, %6 : vector<16x32xf32>
    %c0_6 = arith.constant 0 : index
    %c0_7 = arith.constant 0 : index
    %8 = vector.load %arg7[%c0_6, %c0_7] : memref<16x32xf32, #tpu.memory_space<vmem>>, vector<16x32xf32>
    tpu.vector_store %arg7[%c0_6, %c0_7], %7 {strides = array<i32>} : memref<16x32xf32, #tpu.memory_space<vmem>>, vector<16x32xf32>,
    %c0_i32_8 = arith.constant 0 : i32
    %9 = arith.cmpi eq, %arg2, %c0_i32_8 : i32
    %10 = arith.extui %9 : i1 to i32
    %c0_i32_9 = arith.constant 0 : i32
    %11 = arith.cmpi ne, %10, %c0_i32_9 : i32
    scf.if %11 {
      %c0_10 = arith.constant 0 : index
      %c0_11 = arith.constant 0 : index
      %12 = vector.load %arg7[%c0_10, %c0_11] : memref<16x32xf32, #tpu.memory_space<vmem>>, vector<16x32xf32>
      %c0_12 = arith.constant 0 : index
      %c0_13 = arith.constant 0 : index
      %13 = vector.load %arg5[%c0_12, %c0_13] : memref<1x32xf32, #tpu.memory_space<vmem>>, vector<1x32xf32>
      %14 = vector.broadcast %13 : vector<1x32xf32> to vector<16x32xf32>
      %15 = arith.addf %12, %14 : vector<16x32xf32>
      %16 = arith.truncf %15 : vector<16x32xf32> to vector<16x32xbf16>
      %c0_14 = arith.constant 0 : index
      %c0_15 = arith.constant 0 : index
      %17 = vector.load %arg6[%c0_14, %c0_15] : memref<16x32xbf16, #tpu.memory_space<vmem>>, vector<16x32xbf16>
      tpu.vector_store %arg6[%c0_14, %c0_15], %16 {strides = array<i32>} : memref<16x32xbf16, #tpu.memory_space<vmem>>, vector<16x32xbf16>,
    } else {
    }
    return
  }
  func.func @transform_0(%arg0: i32, %arg1: i32, %arg2: i32) -> (i32, i32) {
    %c0_i32 = arith.constant 0 : i32
    return %arg0, %arg2 : i32, i32
  }
  func.func @transform_1(%arg0: i32, %arg1: i32, %arg2: i32) -> (i32, i32) {
    %c0_i32 = arith.constant 0 : i32
    return %arg2, %arg1 : i32, i32
  }
  func.func @transform_2(%arg0: i32, %arg1: i32, %arg2: i32) -> (i32, i32) {
    %c0_i32 = arith.constant 0 : i32
    %c0_i32_0 = arith.constant 0 : i32
    return %c0_i32, %arg1 : i32, i32
  }
  func.func @transform_3(%arg0: i32, %arg1: i32, %arg2: i32) -> (i32, i32) {
    %c0_i32 = arith.constant 0 : i32
    return %arg0, %arg1 : i32, i32
  }
}

module attributes {stable_mosaic.version = 11 : i64} {
  func.func @_linear_res_ln_kernel(%arg0: i32, %arg1: i32, %arg2: memref<16x32xbf16, #tpu.memory_space<vmem>>, %arg3: memref<32x32xbf16, #tpu.memory_space<vmem>>, %arg4: memref<1x32xf32, #tpu.memory_space<vmem>>, %arg5: memref<16x32xf32, #tpu.memory_space<vmem>>, %arg6: memref<1x32xf32, #tpu.memory_space<vmem>>, %arg7: memref<1x32xf32, #tpu.memory_space<vmem>>, %arg8: memref<16x32xf32, #tpu.memory_space<vmem>>, %arg9: memref<16x32xf32, #tpu.memory_space<vmem>>) attributes {dimension_semantics = [#tpu.dimension_semantics<parallel>, #tpu.dimension_semantics<arbitrary>], iteration_bounds = array<i64: 1, 1>, scalar_prefetch = 0 : i64, scratch_operands = 1 : i64, tpu.core_type = #tpu.core_type<tc>, window_params = [{transform_indices = @transform_0, window_bounds = array<i64: 16, 32>}, {transform_indices = @transform_1, window_bounds = array<i64: 32, 32>}, {pipeline_mode = #tpu.pipeline_mode<synchronous>, transform_indices = @transform_2, window_bounds = array<i64: 1, 32>}, {transform_indices = @transform_3, window_bounds = array<i64: 16, 32>}, {pipeline_mode = #tpu.pipeline_mode<synchronous>, transform_indices = @transform_4, window_bounds = array<i64: 1, 32>}, {pipeline_mode = #tpu.pipeline_mode<synchronous>, transform_indices = @transform_5, window_bounds = array<i64: 1, 32>}, {transform_indices = @transform_6, window_bounds = array<i64: 16, 32>}]} {
    %c0_i32 = arith.constant 0 : i32
    %0 = arith.cmpi eq, %arg1, %c0_i32 : i32
    %1 = arith.extui %0 : i1 to i32
    %c0_i32_0 = arith.constant 0 : i32
    %2 = arith.cmpi ne, %1, %c0_i32_0 : i32
    scf.if %2 {
      %cst_10 = arith.constant 0.000000e+00 : f32
      %12 = vector.broadcast %cst_10 : f32 to vector<16x32xf32>
      %c0_11 = arith.constant 0 : index
      %c0_12 = arith.constant 0 : index
      %13 = vector.load %arg9[%c0_11, %c0_12] : memref<16x32xf32, #tpu.memory_space<vmem>>, vector<16x32xf32>
      tpu.vector_store %arg9[%c0_11, %c0_12], %12 {strides = array<i32>} : memref<16x32xf32, #tpu.memory_space<vmem>>, vector<16x32xf32>,
    } else {
    }
    %c0 = arith.constant 0 : index
    %c0_1 = arith.constant 0 : index
    %3 = vector.load %arg9[%c0, %c0_1] : memref<16x32xf32, #tpu.memory_space<vmem>>, vector<16x32xf32>
    %c0_2 = arith.constant 0 : index
    %c0_3 = arith.constant 0 : index
    %4 = vector.load %arg2[%c0_2, %c0_3] : memref<16x32xbf16, #tpu.memory_space<vmem>>, vector<16x32xbf16>
    %c0_4 = arith.constant 0 : index
    %c0_5 = arith.constant 0 : index
    %5 = vector.load %arg3[%c0_4, %c0_5] : memref<32x32xbf16, #tpu.memory_space<vmem>>, vector<32x32xbf16>
    %cst = arith.constant dense<0.000000e+00> : vector<16x32xf32>
    %6 = tpu.matmul %4, %5, %cst {dimension_numbers = #tpu.dot_dimension_numbers<[1], [0], [0], [1], [0, 0, 1, 1], [], []>} : vector<16x32xbf16>, vector<32x32xbf16>, vector<16x32xf32> -> vector<16x32xf32>
    %7 = arith.addf %3, %6 : vector<16x32xf32>
    %c0_6 = arith.constant 0 : index
    %c0_7 = arith.constant 0 : index
    %8 = vector.load %arg9[%c0_6, %c0_7] : memref<16x32xf32, #tpu.memory_space<vmem>>, vector<16x32xf32>
    tpu.vector_store %arg9[%c0_6, %c0_7], %7 {strides = array<i32>} : memref<16x32xf32, #tpu.memory_space<vmem>>, vector<16x32xf32>,
    %c0_i32_8 = arith.constant 0 : i32
    %9 = arith.cmpi eq, %arg1, %c0_i32_8 : i32
    %10 = arith.extui %9 : i1 to i32
    %c0_i32_9 = arith.constant 0 : i32
    %11 = arith.cmpi ne, %10, %c0_i32_9 : i32
    scf.if %11 {
      %c0_10 = arith.constant 0 : index
      %c0_11 = arith.constant 0 : index
      %12 = vector.load %arg9[%c0_10, %c0_11] : memref<16x32xf32, #tpu.memory_space<vmem>>, vector<16x32xf32>
      %c0_12 = arith.constant 0 : index
      %c0_13 = arith.constant 0 : index
      %13 = vector.load %arg4[%c0_12, %c0_13] : memref<1x32xf32, #tpu.memory_space<vmem>>, vector<1x32xf32>
      %14 = vector.broadcast %13 : vector<1x32xf32> to vector<16x32xf32>
      %15 = arith.addf %12, %14 : vector<16x32xf32>
      %c0_14 = arith.constant 0 : index
      %c0_15 = arith.constant 0 : index
      %16 = vector.load %arg5[%c0_14, %c0_15] : memref<16x32xf32, #tpu.memory_space<vmem>>, vector<16x32xf32>
      %17 = arith.addf %15, %16 : vector<16x32xf32>
      %cst_16 = arith.constant dense<0.000000e+00> : vector<16xf32>
      %18 = vector.multi_reduction <add>, %17, %cst_16 [1] : vector<16x32xf32> to vector<16xf32>
      %19 = vector.shape_cast %18 : vector<16xf32> to vector<16x1xf32>
      %cst_17 = arith.constant 3.200000e+01 : f32
      %20 = vector.broadcast %cst_17 : f32 to vector<16x1xf32>
      %21 = arith.divf %19, %20 : vector<16x1xf32>
      %22 = vector.broadcast %21 : vector<16x1xf32> to vector<16x32xf32>
      %23 = arith.subf %17, %22 : vector<16x32xf32>
      %24 = arith.mulf %23, %23 : vector<16x32xf32>
      %cst_18 = arith.constant dense<0.000000e+00> : vector<16xf32>
      %25 = vector.multi_reduction <add>, %24, %cst_18 [1] : vector<16x32xf32> to vector<16xf32>
      %26 = vector.shape_cast %25 : vector<16xf32> to vector<16x1xf32>
      %cst_19 = arith.constant 3.200000e+01 : f32
      %27 = vector.broadcast %cst_19 : f32 to vector<16x1xf32>
      %28 = arith.divf %26, %27 : vector<16x1xf32>
      %29 = vector.broadcast %21 : vector<16x1xf32> to vector<16x32xf32>
      %30 = arith.subf %17, %29 : vector<16x32xf32>
      %cst_20 = arith.constant 9.99999997E-7 : f32
      %31 = vector.broadcast %cst_20 : f32 to vector<16x1xf32>
      %32 = arith.addf %28, %31 : vector<16x1xf32>
      %33 = math.rsqrt %32 : vector<16x1xf32>
      %34 = vector.broadcast %33 : vector<16x1xf32> to vector<16x32xf32>
      %35 = arith.mulf %30, %34 : vector<16x32xf32>
      %c0_21 = arith.constant 0 : index
      %c0_22 = arith.constant 0 : index
      %36 = vector.load %arg6[%c0_21, %c0_22] : memref<1x32xf32, #tpu.memory_space<vmem>>, vector<1x32xf32>
      %37 = vector.broadcast %36 : vector<1x32xf32> to vector<16x32xf32>
      %38 = arith.mulf %35, %37 : vector<16x32xf32>
      %c0_23 = arith.constant 0 : index
      %c0_24 = arith.constant 0 : index
      %39 = vector.load %arg7[%c0_23, %c0_24] : memref<1x32xf32, #tpu.memory_space<vmem>>, vector<1x32xf32>
      %40 = vector.broadcast %39 : vector<1x32xf32> to vector<16x32xf32>
      %41 = arith.addf %38, %40 : vector<16x32xf32>
      %c0_25 = arith.constant 0 : index
      %c0_26 = arith.constant 0 : index
      %42 = vector.load %arg8[%c0_25, %c0_26] : memref<16x32xf32, #tpu.memory_space<vmem>>, vector<16x32xf32>
      tpu.vector_store %arg8[%c0_25, %c0_26], %41 {strides = array<i32>} : memref<16x32xf32, #tpu.memory_space<vmem>>, vector<16x32xf32>,
    } else {
    }
    return
  }
  func.func @transform_0(%arg0: i32, %arg1: i32) -> (i32, i32) {
    %c0_i32 = arith.constant 0 : i32
    return %arg0, %arg1 : i32, i32
  }
  func.func @transform_1(%arg0: i32, %arg1: i32) -> (i32, i32) {
    %c0_i32 = arith.constant 0 : i32
    %c0_i32_0 = arith.constant 0 : i32
    return %arg1, %c0_i32 : i32, i32
  }
  func.func @transform_2(%arg0: i32, %arg1: i32) -> (i32, i32) {
    %c0_i32 = arith.constant 0 : i32
    %c0_i32_0 = arith.constant 0 : i32
    %c0_i32_1 = arith.constant 0 : i32
    return %c0_i32, %c0_i32_0 : i32, i32
  }
  func.func @transform_3(%arg0: i32, %arg1: i32) -> (i32, i32) {
    %c0_i32 = arith.constant 0 : i32
    %c0_i32_0 = arith.constant 0 : i32
    return %arg0, %c0_i32 : i32, i32
  }
  func.func @transform_4(%arg0: i32, %arg1: i32) -> (i32, i32) {
    %c0_i32 = arith.constant 0 : i32
    %c0_i32_0 = arith.constant 0 : i32
    %c0_i32_1 = arith.constant 0 : i32
    return %c0_i32, %c0_i32_0 : i32, i32
  }
  func.func @transform_5(%arg0: i32, %arg1: i32) -> (i32, i32) {
    %c0_i32 = arith.constant 0 : i32
    %c0_i32_0 = arith.constant 0 : i32
    %c0_i32_1 = arith.constant 0 : i32
    return %c0_i32, %c0_i32_0 : i32, i32
  }
  func.func @transform_6(%arg0: i32, %arg1: i32) -> (i32, i32) {
    %c0_i32 = arith.constant 0 : i32
    %c0_i32_0 = arith.constant 0 : i32
    return %arg0, %c0_i32 : i32, i32
  }
}

module attributes {stable_mosaic.version = 11 : i64} {
  func.func @_linear_kernel(%arg0: i32, %arg1: i32, %arg2: i32, %arg3: memref<32x32xbf16, #tpu.memory_space<vmem>>, %arg4: memref<32x32xbf16, #tpu.memory_space<vmem>>, %arg5: memref<1x32xf32, #tpu.memory_space<vmem>>, %arg6: memref<32x32xbf16, #tpu.memory_space<vmem>>, %arg7: memref<32x32xf32, #tpu.memory_space<vmem>>) attributes {dimension_semantics = [#tpu.dimension_semantics<parallel>, #tpu.dimension_semantics<parallel>, #tpu.dimension_semantics<arbitrary>], iteration_bounds = array<i64: 1, 1, 1>, scalar_prefetch = 0 : i64, scratch_operands = 1 : i64, tpu.core_type = #tpu.core_type<tc>, window_params = [{transform_indices = @transform_0, window_bounds = array<i64: 32, 32>}, {transform_indices = @transform_1, window_bounds = array<i64: 32, 32>}, {transform_indices = @transform_2, window_bounds = array<i64: 1, 32>}, {transform_indices = @transform_3, window_bounds = array<i64: 32, 32>}]} {
    %c0_i32 = arith.constant 0 : i32
    %0 = arith.cmpi eq, %arg2, %c0_i32 : i32
    %1 = arith.extui %0 : i1 to i32
    %c0_i32_0 = arith.constant 0 : i32
    %2 = arith.cmpi ne, %1, %c0_i32_0 : i32
    scf.if %2 {
      %cst_10 = arith.constant 0.000000e+00 : f32
      %12 = vector.broadcast %cst_10 : f32 to vector<32x32xf32>
      %c0_11 = arith.constant 0 : index
      %c0_12 = arith.constant 0 : index
      %13 = vector.load %arg7[%c0_11, %c0_12] : memref<32x32xf32, #tpu.memory_space<vmem>>, vector<32x32xf32>
      tpu.vector_store %arg7[%c0_11, %c0_12], %12 {strides = array<i32>} : memref<32x32xf32, #tpu.memory_space<vmem>>, vector<32x32xf32>,
    } else {
    }
    %c0 = arith.constant 0 : index
    %c0_1 = arith.constant 0 : index
    %3 = vector.load %arg7[%c0, %c0_1] : memref<32x32xf32, #tpu.memory_space<vmem>>, vector<32x32xf32>
    %c0_2 = arith.constant 0 : index
    %c0_3 = arith.constant 0 : index
    %4 = vector.load %arg3[%c0_2, %c0_3] : memref<32x32xbf16, #tpu.memory_space<vmem>>, vector<32x32xbf16>
    %c0_4 = arith.constant 0 : index
    %c0_5 = arith.constant 0 : index
    %5 = vector.load %arg4[%c0_4, %c0_5] : memref<32x32xbf16, #tpu.memory_space<vmem>>, vector<32x32xbf16>
    %cst = arith.constant dense<0.000000e+00> : vector<32x32xf32>
    %6 = tpu.matmul %4, %5, %cst {dimension_numbers = #tpu.dot_dimension_numbers<[1], [0], [0], [1], [0, 0, 1, 1], [], []>} : vector<32x32xbf16>, vector<32x32xbf16>, vector<32x32xf32> -> vector<32x32xf32>
    %7 = arith.addf %3, %6 : vector<32x32xf32>
    %c0_6 = arith.constant 0 : index
    %c0_7 = arith.constant 0 : index
    %8 = vector.load %arg7[%c0_6, %c0_7] : memref<32x32xf32, #tpu.memory_space<vmem>>, vector<32x32xf32>
    tpu.vector_store %arg7[%c0_6, %c0_7], %7 {strides = array<i32>} : memref<32x32xf32, #tpu.memory_space<vmem>>, vector<32x32xf32>,
    %c0_i32_8 = arith.constant 0 : i32
    %9 = arith.cmpi eq, %arg2, %c0_i32_8 : i32
    %10 = arith.extui %9 : i1 to i32
    %c0_i32_9 = arith.constant 0 : i32
    %11 = arith.cmpi ne, %10, %c0_i32_9 : i32
    scf.if %11 {
      %c0_10 = arith.constant 0 : index
      %c0_11 = arith.constant 0 : index
      %12 = vector.load %arg7[%c0_10, %c0_11] : memref<32x32xf32, #tpu.memory_space<vmem>>, vector<32x32xf32>
      %c0_12 = arith.constant 0 : index
      %c0_13 = arith.constant 0 : index
      %13 = vector.load %arg5[%c0_12, %c0_13] : memref<1x32xf32, #tpu.memory_space<vmem>>, vector<1x32xf32>
      %14 = vector.broadcast %13 : vector<1x32xf32> to vector<32x32xf32>
      %15 = arith.addf %12, %14 : vector<32x32xf32>
      %16 = arith.truncf %15 : vector<32x32xf32> to vector<32x32xbf16>
      %c0_14 = arith.constant 0 : index
      %c0_15 = arith.constant 0 : index
      %17 = vector.load %arg6[%c0_14, %c0_15] : memref<32x32xbf16, #tpu.memory_space<vmem>>, vector<32x32xbf16>
      tpu.vector_store %arg6[%c0_14, %c0_15], %16 {strides = array<i32>} : memref<32x32xbf16, #tpu.memory_space<vmem>>, vector<32x32xbf16>,
    } else {
    }
    return
  }
  func.func @transform_0(%arg0: i32, %arg1: i32, %arg2: i32) -> (i32, i32) {
    %c0_i32 = arith.constant 0 : i32
    return %arg0, %arg2 : i32, i32
  }
  func.func @transform_1(%arg0: i32, %arg1: i32, %arg2: i32) -> (i32, i32) {
    %c0_i32 = arith.constant 0 : i32
    return %arg2, %arg1 : i32, i32
  }
  func.func @transform_2(%arg0: i32, %arg1: i32, %arg2: i32) -> (i32, i32) {
    %c0_i32 = arith.constant 0 : i32
    %c0_i32_0 = arith.constant 0 : i32
    return %c0_i32, %arg1 : i32, i32
  }
  func.func @transform_3(%arg0: i32, %arg1: i32, %arg2: i32) -> (i32, i32) {
    %c0_i32 = arith.constant 0 : i32
    return %arg0, %arg1 : i32, i32
  }
}

module attributes {stable_mosaic.version = 11 : i64} {
  func.func @_linear_kernel(%arg0: i32, %arg1: i32, %arg2: i32, %arg3: memref<16x32xbf16, #tpu.memory_space<vmem>>, %arg4: memref<32x64xbf16, #tpu.memory_space<vmem>>, %arg5: memref<1x64xf32, #tpu.memory_space<vmem>>, %arg6: memref<16x64xbf16, #tpu.memory_space<vmem>>, %arg7: memref<16x64xf32, #tpu.memory_space<vmem>>) attributes {dimension_semantics = [#tpu.dimension_semantics<parallel>, #tpu.dimension_semantics<parallel>, #tpu.dimension_semantics<arbitrary>], iteration_bounds = array<i64: 1, 1, 1>, scalar_prefetch = 0 : i64, scratch_operands = 1 : i64, tpu.core_type = #tpu.core_type<tc>, window_params = [{transform_indices = @transform_0, window_bounds = array<i64: 16, 32>}, {transform_indices = @transform_1, window_bounds = array<i64: 32, 64>}, {transform_indices = @transform_2, window_bounds = array<i64: 1, 64>}, {transform_indices = @transform_3, window_bounds = array<i64: 16, 64>}]} {
    %c0_i32 = arith.constant 0 : i32
    %0 = arith.cmpi eq, %arg2, %c0_i32 : i32
    %1 = arith.extui %0 : i1 to i32
    %c0_i32_0 = arith.constant 0 : i32
    %2 = arith.cmpi ne, %1, %c0_i32_0 : i32
    scf.if %2 {
      %cst_10 = arith.constant 0.000000e+00 : f32
      %12 = vector.broadcast %cst_10 : f32 to vector<16x64xf32>
      %c0_11 = arith.constant 0 : index
      %c0_12 = arith.constant 0 : index
      %13 = vector.load %arg7[%c0_11, %c0_12] : memref<16x64xf32, #tpu.memory_space<vmem>>, vector<16x64xf32>
      tpu.vector_store %arg7[%c0_11, %c0_12], %12 {strides = array<i32>} : memref<16x64xf32, #tpu.memory_space<vmem>>, vector<16x64xf32>,
    } else {
    }
    %c0 = arith.constant 0 : index
    %c0_1 = arith.constant 0 : index
    %3 = vector.load %arg7[%c0, %c0_1] : memref<16x64xf32, #tpu.memory_space<vmem>>, vector<16x64xf32>
    %c0_2 = arith.constant 0 : index
    %c0_3 = arith.constant 0 : index
    %4 = vector.load %arg3[%c0_2, %c0_3] : memref<16x32xbf16, #tpu.memory_space<vmem>>, vector<16x32xbf16>
    %c0_4 = arith.constant 0 : index
    %c0_5 = arith.constant 0 : index
    %5 = vector.load %arg4[%c0_4, %c0_5] : memref<32x64xbf16, #tpu.memory_space<vmem>>, vector<32x64xbf16>
    %cst = arith.constant dense<0.000000e+00> : vector<16x64xf32>
    %6 = tpu.matmul %4, %5, %cst {dimension_numbers = #tpu.dot_dimension_numbers<[1], [0], [0], [1], [0, 0, 1, 1], [], []>} : vector<16x32xbf16>, vector<32x64xbf16>, vector<16x64xf32> -> vector<16x64xf32>
    %7 = arith.addf %3, %6 : vector<16x64xf32>
    %c0_6 = arith.constant 0 : index
    %c0_7 = arith.constant 0 : index
    %8 = vector.load %arg7[%c0_6, %c0_7] : memref<16x64xf32, #tpu.memory_space<vmem>>, vector<16x64xf32>
    tpu.vector_store %arg7[%c0_6, %c0_7], %7 {strides = array<i32>} : memref<16x64xf32, #tpu.memory_space<vmem>>, vector<16x64xf32>,
    %c0_i32_8 = arith.constant 0 : i32
    %9 = arith.cmpi eq, %arg2, %c0_i32_8 : i32
    %10 = arith.extui %9 : i1 to i32
    %c0_i32_9 = arith.constant 0 : i32
    %11 = arith.cmpi ne, %10, %c0_i32_9 : i32
    scf.if %11 {
      %c0_10 = arith.constant 0 : index
      %c0_11 = arith.constant 0 : index
      %12 = vector.load %arg7[%c0_10, %c0_11] : memref<16x64xf32, #tpu.memory_space<vmem>>, vector<16x64xf32>
      %c0_12 = arith.constant 0 : index
      %c0_13 = arith.constant 0 : index
      %13 = vector.load %arg5[%c0_12, %c0_13] : memref<1x64xf32, #tpu.memory_space<vmem>>, vector<1x64xf32>
      %14 = vector.broadcast %13 : vector<1x64xf32> to vector<16x64xf32>
      %15 = arith.addf %12, %14 : vector<16x64xf32>
      %cst_14 = arith.constant 0.000000e+00 : f32
      %16 = vector.broadcast %cst_14 : f32 to vector<16x64xf32>
      %17 = arith.maximumf %15, %16 : vector<16x64xf32>
      %18 = arith.truncf %17 : vector<16x64xf32> to vector<16x64xbf16>
      %c0_15 = arith.constant 0 : index
      %c0_16 = arith.constant 0 : index
      %19 = vector.load %arg6[%c0_15, %c0_16] : memref<16x64xbf16, #tpu.memory_space<vmem>>, vector<16x64xbf16>
      tpu.vector_store %arg6[%c0_15, %c0_16], %18 {strides = array<i32>} : memref<16x64xbf16, #tpu.memory_space<vmem>>, vector<16x64xbf16>,
    } else {
    }
    return
  }
  func.func @transform_0(%arg0: i32, %arg1: i32, %arg2: i32) -> (i32, i32) {
    %c0_i32 = arith.constant 0 : i32
    return %arg0, %arg2 : i32, i32
  }
  func.func @transform_1(%arg0: i32, %arg1: i32, %arg2: i32) -> (i32, i32) {
    %c0_i32 = arith.constant 0 : i32
    return %arg2, %arg1 : i32, i32
  }
  func.func @transform_2(%arg0: i32, %arg1: i32, %arg2: i32) -> (i32, i32) {
    %c0_i32 = arith.constant 0 : i32
    %c0_i32_0 = arith.constant 0 : i32
    return %c0_i32, %arg1 : i32, i32
  }
  func.func @transform_3(%arg0: i32, %arg1: i32, %arg2: i32) -> (i32, i32) {
    %c0_i32 = arith.constant 0 : i32
    return %arg0, %arg1 : i32, i32
  }
}

module attributes {stable_mosaic.version = 11 : i64} {
  func.func @_mha_kernel(%arg0: i32, %arg1: i32, %arg2: i32, %arg3: memref<1x8x32xbf16, #tpu.memory_space<vmem>>, %arg4: memref<1x16x32xbf16, #tpu.memory_space<vmem>>, %arg5: memref<1x16x32xbf16, #tpu.memory_space<vmem>>, %arg6: memref<1x8x32xbf16, #tpu.memory_space<vmem>>, %arg7: memref<4x8x1xf32, #tpu.memory_space<vmem>>, %arg8: memref<4x8x1xf32, #tpu.memory_space<vmem>>, %arg9: memref<8x32xf32, #tpu.memory_space<vmem>>) attributes {dimension_semantics = [#tpu.dimension_semantics<parallel>, #tpu.dimension_semantics<parallel>, #tpu.dimension_semantics<arbitrary>], iteration_bounds = array<i64: 2, 1, 1>, scalar_prefetch = 0 : i64, scratch_operands = 3 : i64, tpu.core_type = #tpu.core_type<tc>, window_params = [{transform_indices = @transform_0, window_bounds = array<i64: 1, 8, 32>}, {transform_indices = @transform_1, window_bounds = array<i64: 1, 16, 32>}, {transform_indices = @transform_2, window_bounds = array<i64: 1, 16, 32>}, {transform_indices = @transform_3, window_bounds = array<i64: 1, 8, 32>}]} {
    %c0_i32 = arith.constant 0 : i32
    %0 = arith.cmpi eq, %arg2, %c0_i32 : i32
    %1 = arith.extui %0 : i1 to i32
    %c0_i32_0 = arith.constant 0 : i32
    %2 = arith.cmpi ne, %1, %c0_i32_0 : i32
    scf.if %2 {
      %cst_76 = arith.constant 0xFF800000 : f32
      %140 = vector.broadcast %cst_76 : f32 to vector<4x8x1xf32>
      %c0_77 = arith.constant 0 : index
      %c0_78 = arith.constant 0 : index
      %c0_79 = arith.constant 0 : index
      %141 = vector.load %arg7[%c0_77, %c0_78, %c0_79] : memref<4x8x1xf32, #tpu.memory_space<vmem>>, vector<4x8x1xf32>
      tpu.vector_store %arg7[%c0_77, %c0_78, %c0_79], %140 {strides = array<i32>} : memref<4x8x1xf32, #tpu.memory_space<vmem>>, vector<4x8x1xf32>,
      %cst_80 = arith.constant 0.000000e+00 : f32
      %142 = vector.broadcast %cst_80 : f32 to vector<4x8x1xf32>
      %c0_81 = arith.constant 0 : index
      %c0_82 = arith.constant 0 : index
      %c0_83 = arith.constant 0 : index
      %143 = vector.load %arg8[%c0_81, %c0_82, %c0_83] : memref<4x8x1xf32, #tpu.memory_space<vmem>>, vector<4x8x1xf32>
      tpu.vector_store %arg8[%c0_81, %c0_82, %c0_83], %142 {strides = array<i32>} : memref<4x8x1xf32, #tpu.memory_space<vmem>>, vector<4x8x1xf32>,
      %cst_84 = arith.constant 0.000000e+00 : f32
      %144 = vector.broadcast %cst_84 : f32 to vector<8x32xf32>
      %c0_85 = arith.constant 0 : index
      %c0_86 = arith.constant 0 : index
      %145 = vector.load %arg9[%c0_85, %c0_86] : memref<8x32xf32, #tpu.memory_space<vmem>>, vector<8x32xf32>
      tpu.vector_store %arg9[%c0_85, %c0_86], %144 {strides = array<i32>} : memref<8x32xf32, #tpu.memory_space<vmem>>, vector<8x32xf32>,
    } else {
    }
    %c0 = arith.constant 0 : index
    %c0_1 = arith.constant 0 : index
    %c0_2 = arith.constant 0 : index
    %3 = vector.load %arg3[%c0, %c0_1, %c0_2] : memref<1x8x32xbf16, #tpu.memory_space<vmem>>, vector<1x8x32xbf16>
    %4 = vector.shape_cast %3 : vector<1x8x32xbf16> to vector<8x32xbf16>
    %cst = arith.constant 3.535160e-01 : bf16
    %5 = vector.broadcast %cst : bf16 to vector<8x32xbf16>
    %6 = arith.mulf %4, %5 : vector<8x32xbf16>
    %c0_3 = arith.constant 0 : index
    %c0_4 = arith.constant 0 : index
    %c0_5 = arith.constant 0 : index
    %7 = vector.load %arg4[%c0_3, %c0_4, %c0_5] : memref<1x16x32xbf16, #tpu.memory_space<vmem>>, vector<1x16x32xbf16>
    %8 = vector.shape_cast %7 : vector<1x16x32xbf16> to vector<16x32xbf16>
    %c0_6 = arith.constant 0 : index
    %c0_7 = arith.constant 0 : index
    %c0_8 = arith.constant 0 : index
    %9 = vector.load %arg5[%c0_6, %c0_7, %c0_8] : memref<1x16x32xbf16, #tpu.memory_space<vmem>>, vector<1x16x32xbf16>
    %10 = vector.shape_cast %9 : vector<1x16x32xbf16> to vector<16x32xbf16>
    %c0_9 = arith.constant 0 : index
    %c0_10 = arith.constant 0 : index
    %11 = vector.load %arg9[%c0_9, %c0_10] : memref<8x32xf32, #tpu.memory_space<vmem>>, vector<8x32xf32>
    %12 = vector.extract_strided_slice %6 {offsets = [0, 0], sizes = [8, 8], strides = [1, 1]} : vector<8x32xbf16> to vector<8x8xbf16>
    %13 = vector.extract_strided_slice %8 {offsets = [0, 0], sizes = [16, 8], strides = [1, 1]} : vector<16x32xbf16> to vector<16x8xbf16>
    %cst_11 = arith.constant dense<0.000000e+00> : vector<8x16xf32>
    %14 = tpu.matmul %12, %13, %cst_11 {dimension_numbers = #tpu.dot_dimension_numbers<[1], [1], [0], [0], [0, 0, 1, 0], [], []>} : vector<8x8xbf16>, vector<16x8xbf16>, vector<8x16xf32> -> vector<8x16xf32>
    %c0_12 = arith.constant 0 : index
    %c0_13 = arith.constant 0 : index
    %c0_14 = arith.constant 0 : index
    %15 = vector.load %arg7[%c0_12, %c0_13, %c0_14] : memref<4x8x1xf32, #tpu.memory_space<vmem>>, vector<1x8x1xf32>
    %16 = vector.shape_cast %15 : vector<1x8x1xf32> to vector<8x1xf32>
    %cst_15 = arith.constant dense<0xFF800000> : vector<8xf32>
    %17 = vector.multi_reduction <maximumf>, %14, %cst_15 [1] : vector<8x16xf32> to vector<8xf32>
    %18 = vector.shape_cast %17 : vector<8xf32> to vector<8x1xf32>
    %19 = arith.maximumf %16, %18 : vector<8x1xf32>
    %20 = arith.subf %16, %19 : vector<8x1xf32>
    %21 = math.exp %20 : vector<8x1xf32>
    %22 = vector.broadcast %19 : vector<8x1xf32> to vector<8x16xf32>
    %23 = arith.subf %14, %22 : vector<8x16xf32>
    %24 = math.exp %23 : vector<8x16xf32>
    %c0_16 = arith.constant 0 : index
    %c0_17 = arith.constant 0 : index
    %c0_18 = arith.constant 0 : index
    %25 = vector.load %arg8[%c0_16, %c0_17, %c0_18] : memref<4x8x1xf32, #tpu.memory_space<vmem>>, vector<1x8x1xf32>
    %26 = vector.shape_cast %25 : vector<1x8x1xf32> to vector<8x1xf32>
    %27 = arith.mulf %21, %26 : vector<8x1xf32>
    %cst_19 = arith.constant dense<0.000000e+00> : vector<8xf32>
    %28 = vector.multi_reduction <add>, %24, %cst_19 [1] : vector<8x16xf32> to vector<8xf32>
    %29 = vector.shape_cast %28 : vector<8xf32> to vector<8x1xf32>
    %30 = arith.addf %27, %29 : vector<8x1xf32>
    %c0_20 = arith.constant 0 : index
    %c0_21 = arith.constant 0 : index
    %c0_22 = arith.constant 0 : index
    %31 = vector.load %arg7[%c0_20, %c0_21, %c0_22] : memref<4x8x1xf32, #tpu.memory_space<vmem>>, vector<1x8x1xf32>
    %32 = vector.shape_cast %31 : vector<1x8x1xf32> to vector<8x1xf32>
    %33 = vector.shape_cast %19 : vector<8x1xf32> to vector<1x8x1xf32>
    tpu.vector_store %arg7[%c0_20, %c0_21, %c0_22], %33 {strides = array<i32>} : memref<4x8x1xf32, #tpu.memory_space<vmem>>, vector<1x8x1xf32>,
    %c0_23 = arith.constant 0 : index
    %c0_24 = arith.constant 0 : index
    %c0_25 = arith.constant 0 : index
    %34 = vector.load %arg8[%c0_23, %c0_24, %c0_25] : memref<4x8x1xf32, #tpu.memory_space<vmem>>, vector<1x8x1xf32>
    %35 = vector.shape_cast %34 : vector<1x8x1xf32> to vector<8x1xf32>
    %36 = vector.shape_cast %30 : vector<8x1xf32> to vector<1x8x1xf32>
    tpu.vector_store %arg8[%c0_23, %c0_24, %c0_25], %36 {strides = array<i32>} : memref<4x8x1xf32, #tpu.memory_space<vmem>>, vector<1x8x1xf32>,
    %37 = arith.truncf %24 : vector<8x16xf32> to vector<8x16xbf16>
    %38 = vector.extract_strided_slice %10 {offsets = [0, 0], sizes = [16, 8], strides = [1, 1]} : vector<16x32xbf16> to vector<16x8xbf16>
    %cst_26 = arith.constant dense<0.000000e+00> : vector<8x8xf32>
    %39 = tpu.matmul %37, %38, %cst_26 {dimension_numbers = #tpu.dot_dimension_numbers<[1], [0], [0], [1], [0, 0, 1, 1], [], []>} : vector<8x16xbf16>, vector<16x8xbf16>, vector<8x8xf32> -> vector<8x8xf32>
    %40 = vector.shape_cast %21 : vector<8x1xf32> to vector<8x1xf32>
    %41 = vector.broadcast %40 : vector<8x1xf32> to vector<8x8xf32>
    %42 = vector.extract_strided_slice %6 {offsets = [0, 8], sizes = [8, 8], strides = [1, 1]} : vector<8x32xbf16> to vector<8x8xbf16>
    %43 = vector.extract_strided_slice %8 {offsets = [0, 8], sizes = [16, 8], strides = [1, 1]} : vector<16x32xbf16> to vector<16x8xbf16>
    %cst_27 = arith.constant dense<0.000000e+00> : vector<8x16xf32>
    %44 = tpu.matmul %42, %43, %cst_27 {dimension_numbers = #tpu.dot_dimension_numbers<[1], [1], [0], [0], [0, 0, 1, 0], [], []>} : vector<8x8xbf16>, vector<16x8xbf16>, vector<8x16xf32> -> vector<8x16xf32>
    %c1 = arith.constant 1 : index
    %c0_28 = arith.constant 0 : index
    %c0_29 = arith.constant 0 : index
    %45 = vector.load %arg7[%c1, %c0_28, %c0_29] : memref<4x8x1xf32, #tpu.memory_space<vmem>>, vector<1x8x1xf32>
    %46 = vector.shape_cast %45 : vector<1x8x1xf32> to vector<8x1xf32>
    %cst_30 = arith.constant dense<0xFF800000> : vector<8xf32>
    %47 = vector.multi_reduction <maximumf>, %44, %cst_30 [1] : vector<8x16xf32> to vector<8xf32>
    %48 = vector.shape_cast %47 : vector<8xf32> to vector<8x1xf32>
    %49 = arith.maximumf %46, %48 : vector<8x1xf32>
    %50 = arith.subf %46, %49 : vector<8x1xf32>
    %51 = math.exp %50 : vector<8x1xf32>
    %52 = vector.broadcast %49 : vector<8x1xf32> to vector<8x16xf32>
    %53 = arith.subf %44, %52 : vector<8x16xf32>
    %54 = math.exp %53 : vector<8x16xf32>
    %c1_31 = arith.constant 1 : index
    %c0_32 = arith.constant 0 : index
    %c0_33 = arith.constant 0 : index
    %55 = vector.load %arg8[%c1_31, %c0_32, %c0_33] : memref<4x8x1xf32, #tpu.memory_space<vmem>>, vector<1x8x1xf32>
    %56 = vector.shape_cast %55 : vector<1x8x1xf32> to vector<8x1xf32>
    %57 = arith.mulf %51, %56 : vector<8x1xf32>
    %cst_34 = arith.constant dense<0.000000e+00> : vector<8xf32>
    %58 = vector.multi_reduction <add>, %54, %cst_34 [1] : vector<8x16xf32> to vector<8xf32>
    %59 = vector.shape_cast %58 : vector<8xf32> to vector<8x1xf32>
    %60 = arith.addf %57, %59 : vector<8x1xf32>
    %c1_35 = arith.constant 1 : index
    %c0_36 = arith.constant 0 : index
    %c0_37 = arith.constant 0 : index
    %61 = vector.load %arg7[%c1_35, %c0_36, %c0_37] : memref<4x8x1xf32, #tpu.memory_space<vmem>>, vector<1x8x1xf32>
    %62 = vector.shape_cast %61 : vector<1x8x1xf32> to vector<8x1xf32>
    %63 = vector.shape_cast %49 : vector<8x1xf32> to vector<1x8x1xf32>
    tpu.vector_store %arg7[%c1_35, %c0_36, %c0_37], %63 {strides = array<i32>} : memref<4x8x1xf32, #tpu.memory_space<vmem>>, vector<1x8x1xf32>,
    %c1_38 = arith.constant 1 : index
    %c0_39 = arith.constant 0 : index
    %c0_40 = arith.constant 0 : index
    %64 = vector.load %arg8[%c1_38, %c0_39, %c0_40] : memref<4x8x1xf32, #tpu.memory_space<vmem>>, vector<1x8x1xf32>
    %65 = vector.shape_cast %64 : vector<1x8x1xf32> to vector<8x1xf32>
    %66 = vector.shape_cast %60 : vector<8x1xf32> to vector<1x8x1xf32>
    tpu.vector_store %arg8[%c1_38, %c0_39, %c0_40], %66 {strides = array<i32>} : memref<4x8x1xf32, #tpu.memory_space<vmem>>, vector<1x8x1xf32>,
    %67 = arith.truncf %54 : vector<8x16xf32> to vector<8x16xbf16>
    %68 = vector.extract_strided_slice %10 {offsets = [0, 8], sizes = [16, 8], strides = [1, 1]} : vector<16x32xbf16> to vector<16x8xbf16>
    %cst_41 = arith.constant dense<0.000000e+00> : vector<8x8xf32>
    %69 = tpu.matmul %67, %68, %cst_41 {dimension_numbers = #tpu.dot_dimension_numbers<[1], [0], [0], [1], [0, 0, 1, 1], [], []>} : vector<8x16xbf16>, vector<16x8xbf16>, vector<8x8xf32> -> vector<8x8xf32>
    %70 = vector.shape_cast %51 : vector<8x1xf32> to vector<8x1xf32>
    %71 = vector.broadcast %70 : vector<8x1xf32> to vector<8x8xf32>
    %72 = vector.extract_strided_slice %6 {offsets = [0, 16], sizes = [8, 8], strides = [1, 1]} : vector<8x32xbf16> to vector<8x8xbf16>
    %73 = vector.extract_strided_slice %8 {offsets = [0, 16], sizes = [16, 8], strides = [1, 1]} : vector<16x32xbf16> to vector<16x8xbf16>
    %cst_42 = arith.constant dense<0.000000e+00> : vector<8x16xf32>
    %74 = tpu.matmul %72, %73, %cst_42 {dimension_numbers = #tpu.dot_dimension_numbers<[1], [1], [0], [0], [0, 0, 1, 0], [], []>} : vector<8x8xbf16>, vector<16x8xbf16>, vector<8x16xf32> -> vector<8x16xf32>
    %c2 = arith.constant 2 : index
    %c0_43 = arith.constant 0 : index
    %c0_44 = arith.constant 0 : index
    %75 = vector.load %arg7[%c2, %c0_43, %c0_44] : memref<4x8x1xf32, #tpu.memory_space<vmem>>, vector<1x8x1xf32>
    %76 = vector.shape_cast %75 : vector<1x8x1xf32> to vector<8x1xf32>
    %cst_45 = arith.constant dense<0xFF800000> : vector<8xf32>
    %77 = vector.multi_reduction <maximumf>, %74, %cst_45 [1] : vector<8x16xf32> to vector<8xf32>
    %78 = vector.shape_cast %77 : vector<8xf32> to vector<8x1xf32>
    %79 = arith.maximumf %76, %78 : vector<8x1xf32>
    %80 = arith.subf %76, %79 : vector<8x1xf32>
    %81 = math.exp %80 : vector<8x1xf32>
    %82 = vector.broadcast %79 : vector<8x1xf32> to vector<8x16xf32>
    %83 = arith.subf %74, %82 : vector<8x16xf32>
    %84 = math.exp %83 : vector<8x16xf32>
    %c2_46 = arith.constant 2 : index
    %c0_47 = arith.constant 0 : index
    %c0_48 = arith.constant 0 : index
    %85 = vector.load %arg8[%c2_46, %c0_47, %c0_48] : memref<4x8x1xf32, #tpu.memory_space<vmem>>, vector<1x8x1xf32>
    %86 = vector.shape_cast %85 : vector<1x8x1xf32> to vector<8x1xf32>
    %87 = arith.mulf %81, %86 : vector<8x1xf32>
    %cst_49 = arith.constant dense<0.000000e+00> : vector<8xf32>
    %88 = vector.multi_reduction <add>, %84, %cst_49 [1] : vector<8x16xf32> to vector<8xf32>
    %89 = vector.shape_cast %88 : vector<8xf32> to vector<8x1xf32>
    %90 = arith.addf %87, %89 : vector<8x1xf32>
    %c2_50 = arith.constant 2 : index
    %c0_51 = arith.constant 0 : index
    %c0_52 = arith.constant 0 : index
    %91 = vector.load %arg7[%c2_50, %c0_51, %c0_52] : memref<4x8x1xf32, #tpu.memory_space<vmem>>, vector<1x8x1xf32>
    %92 = vector.shape_cast %91 : vector<1x8x1xf32> to vector<8x1xf32>
    %93 = vector.shape_cast %79 : vector<8x1xf32> to vector<1x8x1xf32>
    tpu.vector_store %arg7[%c2_50, %c0_51, %c0_52], %93 {strides = array<i32>} : memref<4x8x1xf32, #tpu.memory_space<vmem>>, vector<1x8x1xf32>,
    %c2_53 = arith.constant 2 : index
    %c0_54 = arith.constant 0 : index
    %c0_55 = arith.constant 0 : index
    %94 = vector.load %arg8[%c2_53, %c0_54, %c0_55] : memref<4x8x1xf32, #tpu.memory_space<vmem>>, vector<1x8x1xf32>
    %95 = vector.shape_cast %94 : vector<1x8x1xf32> to vector<8x1xf32>
    %96 = vector.shape_cast %90 : vector<8x1xf32> to vector<1x8x1xf32>
    tpu.vector_store %arg8[%c2_53, %c0_54, %c0_55], %96 {strides = array<i32>} : memref<4x8x1xf32, #tpu.memory_space<vmem>>, vector<1x8x1xf32>,
    %97 = arith.truncf %84 : vector<8x16xf32> to vector<8x16xbf16>
    %98 = vector.extract_strided_slice %10 {offsets = [0, 16], sizes = [16, 8], strides = [1, 1]} : vector<16x32xbf16> to vector<16x8xbf16>
    %cst_56 = arith.constant dense<0.000000e+00> : vector<8x8xf32>
    %99 = tpu.matmul %97, %98, %cst_56 {dimension_numbers = #tpu.dot_dimension_numbers<[1], [0], [0], [1], [0, 0, 1, 1], [], []>} : vector<8x16xbf16>, vector<16x8xbf16>, vector<8x8xf32> -> vector<8x8xf32>
    %100 = vector.shape_cast %81 : vector<8x1xf32> to vector<8x1xf32>
    %101 = vector.broadcast %100 : vector<8x1xf32> to vector<8x8xf32>
    %102 = vector.extract_strided_slice %6 {offsets = [0, 24], sizes = [8, 8], strides = [1, 1]} : vector<8x32xbf16> to vector<8x8xbf16>
    %103 = vector.extract_strided_slice %8 {offsets = [0, 24], sizes = [16, 8], strides = [1, 1]} : vector<16x32xbf16> to vector<16x8xbf16>
    %cst_57 = arith.constant dense<0.000000e+00> : vector<8x16xf32>
    %104 = tpu.matmul %102, %103, %cst_57 {dimension_numbers = #tpu.dot_dimension_numbers<[1], [1], [0], [0], [0, 0, 1, 0], [], []>} : vector<8x8xbf16>, vector<16x8xbf16>, vector<8x16xf32> -> vector<8x16xf32>
    %c3 = arith.constant 3 : index
    %c0_58 = arith.constant 0 : index
    %c0_59 = arith.constant 0 : index
    %105 = vector.load %arg7[%c3, %c0_58, %c0_59] : memref<4x8x1xf32, #tpu.memory_space<vmem>>, vector<1x8x1xf32>
    %106 = vector.shape_cast %105 : vector<1x8x1xf32> to vector<8x1xf32>
    %cst_60 = arith.constant dense<0xFF800000> : vector<8xf32>
    %107 = vector.multi_reduction <maximumf>, %104, %cst_60 [1] : vector<8x16xf32> to vector<8xf32>
    %108 = vector.shape_cast %107 : vector<8xf32> to vector<8x1xf32>
    %109 = arith.maximumf %106, %108 : vector<8x1xf32>
    %110 = arith.subf %106, %109 : vector<8x1xf32>
    %111 = math.exp %110 : vector<8x1xf32>
    %112 = vector.broadcast %109 : vector<8x1xf32> to vector<8x16xf32>
    %113 = arith.subf %104, %112 : vector<8x16xf32>
    %114 = math.exp %113 : vector<8x16xf32>
    %c3_61 = arith.constant 3 : index
    %c0_62 = arith.constant 0 : index
    %c0_63 = arith.constant 0 : index
    %115 = vector.load %arg8[%c3_61, %c0_62, %c0_63] : memref<4x8x1xf32, #tpu.memory_space<vmem>>, vector<1x8x1xf32>
    %116 = vector.shape_cast %115 : vector<1x8x1xf32> to vector<8x1xf32>
    %117 = arith.mulf %111, %116 : vector<8x1xf32>
    %cst_64 = arith.constant dense<0.000000e+00> : vector<8xf32>
    %118 = vector.multi_reduction <add>, %114, %cst_64 [1] : vector<8x16xf32> to vector<8xf32>
    %119 = vector.shape_cast %118 : vector<8xf32> to vector<8x1xf32>
    %120 = arith.addf %117, %119 : vector<8x1xf32>
    %c3_65 = arith.constant 3 : index
    %c0_66 = arith.constant 0 : index
    %c0_67 = arith.constant 0 : index
    %121 = vector.load %arg7[%c3_65, %c0_66, %c0_67] : memref<4x8x1xf32, #tpu.memory_space<vmem>>, vector<1x8x1xf32>
    %122 = vector.shape_cast %121 : vector<1x8x1xf32> to vector<8x1xf32>
    %123 = vector.shape_cast %109 : vector<8x1xf32> to vector<1x8x1xf32>
    tpu.vector_store %arg7[%c3_65, %c0_66, %c0_67], %123 {strides = array<i32>} : memref<4x8x1xf32, #tpu.memory_space<vmem>>, vector<1x8x1xf32>,
    %c3_68 = arith.constant 3 : index
    %c0_69 = arith.constant 0 : index
    %c0_70 = arith.constant 0 : index
    %124 = vector.load %arg8[%c3_68, %c0_69, %c0_70] : memref<4x8x1xf32, #tpu.memory_space<vmem>>, vector<1x8x1xf32>
    %125 = vector.shape_cast %124 : vector<1x8x1xf32> to vector<8x1xf32>
    %126 = vector.shape_cast %120 : vector<8x1xf32> to vector<1x8x1xf32>
    tpu.vector_store %arg8[%c3_68, %c0_69, %c0_70], %126 {strides = array<i32>} : memref<4x8x1xf32, #tpu.memory_space<vmem>>, vector<1x8x1xf32>,
    %127 = arith.truncf %114 : vector<8x16xf32> to vector<8x16xbf16>
    %128 = vector.extract_strided_slice %10 {offsets = [0, 24], sizes = [16, 8], strides = [1, 1]} : vector<16x32xbf16> to vector<16x8xbf16>
    %cst_71 = arith.constant dense<0.000000e+00> : vector<8x8xf32>
    %129 = tpu.matmul %127, %128, %cst_71 {dimension_numbers = #tpu.dot_dimension_numbers<[1], [0], [0], [1], [0, 0, 1, 1], [], []>} : vector<8x16xbf16>, vector<16x8xbf16>, vector<8x8xf32> -> vector<8x8xf32>
    %130 = vector.shape_cast %111 : vector<8x1xf32> to vector<8x1xf32>
    %131 = vector.broadcast %130 : vector<8x1xf32> to vector<8x8xf32>
    %132 = tpu.concatenate %41, %71, %101, %131 in 1 : vector<8x8xf32>, vector<8x8xf32>, vector<8x8xf32>, vector<8x8xf32> -> vector<8x32xf32>
    %133 = arith.mulf %11, %132 : vector<8x32xf32>
    %134 = tpu.concatenate %39, %69, %99, %129 in 1 : vector<8x8xf32>, vector<8x8xf32>, vector<8x8xf32>, vector<8x8xf32> -> vector<8x32xf32>
    %135 = arith.addf %133, %134 : vector<8x32xf32>
    %c0_72 = arith.constant 0 : index
    %c0_73 = arith.constant 0 : index
    %136 = vector.load %arg9[%c0_72, %c0_73] : memref<8x32xf32, #tpu.memory_space<vmem>>, vector<8x32xf32>
    tpu.vector_store %arg9[%c0_72, %c0_73], %135 {strides = array<i32>} : memref<8x32xf32, #tpu.memory_space<vmem>>, vector<8x32xf32>,
    %c0_i32_74 = arith.constant 0 : i32
    %137 = arith.cmpi eq, %arg2, %c0_i32_74 : i32
    %138 = arith.extui %137 : i1 to i32
    %c0_i32_75 = arith.constant 0 : i32
    %139 = arith.cmpi ne, %138, %c0_i32_75 : i32
    scf.if %139 {
      %140 = tpu.reciprocal %30 {approx = true} : vector<8x1xf32> -> vector<8x1xf32>
      %141 = vector.shape_cast %140 : vector<8x1xf32> to vector<8x1xf32>
      %142 = vector.broadcast %141 : vector<8x1xf32> to vector<8x8xf32>
      %143 = tpu.reciprocal %60 {approx = true} : vector<8x1xf32> -> vector<8x1xf32>
      %144 = vector.shape_cast %143 : vector<8x1xf32> to vector<8x1xf32>
      %145 = vector.broadcast %144 : vector<8x1xf32> to vector<8x8xf32>
      %146 = tpu.reciprocal %90 {approx = true} : vector<8x1xf32> -> vector<8x1xf32>
      %147 = vector.shape_cast %146 : vector<8x1xf32> to vector<8x1xf32>
      %148 = vector.broadcast %147 : vector<8x1xf32> to vector<8x8xf32>
      %149 = tpu.reciprocal %120 {approx = true} : vector<8x1xf32> -> vector<8x1xf32>
      %150 = vector.shape_cast %149 : vector<8x1xf32> to vector<8x1xf32>
      %151 = vector.broadcast %150 : vector<8x1xf32> to vector<8x8xf32>
      %152 = tpu.concatenate %142, %145, %148, %151 in 1 : vector<8x8xf32>, vector<8x8xf32>, vector<8x8xf32>, vector<8x8xf32> -> vector<8x32xf32>
      %153 = arith.mulf %135, %152 : vector<8x32xf32>
      %154 = arith.truncf %153 : vector<8x32xf32> to vector<8x32xbf16>
      %c0_76 = arith.constant 0 : index
      %c0_77 = arith.constant 0 : index
      %c0_78 = arith.constant 0 : index
      %155 = vector.load %arg6[%c0_76, %c0_77, %c0_78] : memref<1x8x32xbf16, #tpu.memory_space<vmem>>, vector<1x8x32xbf16>
      %156 = vector.shape_cast %155 : vector<1x8x32xbf16> to vector<8x32xbf16>
      %157 = vector.shape_cast %154 : vector<8x32xbf16> to vector<1x8x32xbf16>
      tpu.vector_store %arg6[%c0_76, %c0_77, %c0_78], %157 {strides = array<i32>} : memref<1x8x32xbf16, #tpu.memory_space<vmem>>, vector<1x8x32xbf16>,
    } else {
    }
    return
  }
  func.func @transform_0(%arg0: i32, %arg1: i32, %arg2: i32) -> (i32, i32, i32) {
    %c0_i32 = arith.constant 0 : i32
    %c0_i32_0 = arith.constant 0 : i32
    return %arg0, %arg1, %c0_i32 : i32, i32, i32
  }
  func.func @transform_1(%arg0: i32, %arg1: i32, %arg2: i32) -> (i32, i32, i32) {
    %c0_i32 = arith.constant 0 : i32
    %c0_i32_0 = arith.constant 0 : i32
    return %arg0, %arg2, %c0_i32 : i32, i32, i32
  }
  func.func @transform_2(%arg0: i32, %arg1: i32, %arg2: i32) -> (i32, i32, i32) {
    %c0_i32 = arith.constant 0 : i32
    %c0_i32_0 = arith.constant 0 : i32
    return %arg0, %arg2, %c0_i32 : i32, i32, i32
  }
  func.func @transform_3(%arg0: i32, %arg1: i32, %arg2: i32) -> (i32, i32, i32) {
    %c0_i32 = arith.constant 0 : i32
    %c0_i32_0 = arith.constant 0 : i32
    return %arg0, %arg1, %c0_i32 : i32, i32, i32
  }
}

module attributes {stable_mosaic.version = 11 : i64} {
  func.func @_linear_res_ln_kernel(%arg0: i32, %arg1: i32, %arg2: memref<16x64xbf16, #tpu.memory_space<vmem>>, %arg3: memref<64x32xbf16, #tpu.memory_space<vmem>>, %arg4: memref<1x32xf32, #tpu.memory_space<vmem>>, %arg5: memref<16x32xf32, #tpu.memory_space<vmem>>, %arg6: memref<1x32xf32, #tpu.memory_space<vmem>>, %arg7: memref<1x32xf32, #tpu.memory_space<vmem>>, %arg8: memref<16x32xf32, #tpu.memory_space<vmem>>, %arg9: memref<16x32xf32, #tpu.memory_space<vmem>>) attributes {dimension_semantics = [#tpu.dimension_semantics<parallel>, #tpu.dimension_semantics<arbitrary>], iteration_bounds = array<i64: 1, 1>, scalar_prefetch = 0 : i64, scratch_operands = 1 : i64, tpu.core_type = #tpu.core_type<tc>, window_params = [{transform_indices = @transform_0, window_bounds = array<i64: 16, 64>}, {transform_indices = @transform_1, window_bounds = array<i64: 64, 32>}, {pipeline_mode = #tpu.pipeline_mode<synchronous>, transform_indices = @transform_2, window_bounds = array<i64: 1, 32>}, {transform_indices = @transform_3, window_bounds = array<i64: 16, 32>}, {pipeline_mode = #tpu.pipeline_mode<synchronous>, transform_indices = @transform_4, window_bounds = array<i64: 1, 32>}, {pipeline_mode = #tpu.pipeline_mode<synchronous>, transform_indices = @transform_5, window_bounds = array<i64: 1, 32>}, {transform_indices = @transform_6, window_bounds = array<i64: 16, 32>}]} {
    %c0_i32 = arith.constant 0 : i32
    %0 = arith.cmpi eq, %arg1, %c0_i32 : i32
    %1 = arith.extui %0 : i1 to i32
    %c0_i32_0 = arith.constant 0 : i32
    %2 = arith.cmpi ne, %1, %c0_i32_0 : i32
    scf.if %2 {
      %cst_10 = arith.constant 0.000000e+00 : f32
      %12 = vector.broadcast %cst_10 : f32 to vector<16x32xf32>
      %c0_11 = arith.constant 0 : index
      %c0_12 = arith.constant 0 : index
      %13 = vector.load %arg9[%c0_11, %c0_12] : memref<16x32xf32, #tpu.memory_space<vmem>>, vector<16x32xf32>
      tpu.vector_store %arg9[%c0_11, %c0_12], %12 {strides = array<i32>} : memref<16x32xf32, #tpu.memory_space<vmem>>, vector<16x32xf32>,
    } else {
    }
    %c0 = arith.constant 0 : index
    %c0_1 = arith.constant 0 : index
    %3 = vector.load %arg9[%c0, %c0_1] : memref<16x32xf32, #tpu.memory_space<vmem>>, vector<16x32xf32>
    %c0_2 = arith.constant 0 : index
    %c0_3 = arith.constant 0 : index
    %4 = vector.load %arg2[%c0_2, %c0_3] : memref<16x64xbf16, #tpu.memory_space<vmem>>, vector<16x64xbf16>
    %c0_4 = arith.constant 0 : index
    %c0_5 = arith.constant 0 : index
    %5 = vector.load %arg3[%c0_4, %c0_5] : memref<64x32xbf16, #tpu.memory_space<vmem>>, vector<64x32xbf16>
    %cst = arith.constant dense<0.000000e+00> : vector<16x32xf32>
    %6 = tpu.matmul %4, %5, %cst {dimension_numbers = #tpu.dot_dimension_numbers<[1], [0], [0], [1], [0, 0, 1, 1], [], []>} : vector<16x64xbf16>, vector<64x32xbf16>, vector<16x32xf32> -> vector<16x32xf32>
    %7 = arith.addf %3, %6 : vector<16x32xf32>
    %c0_6 = arith.constant 0 : index
    %c0_7 = arith.constant 0 : index
    %8 = vector.load %arg9[%c0_6, %c0_7] : memref<16x32xf32, #tpu.memory_space<vmem>>, vector<16x32xf32>
    tpu.vector_store %arg9[%c0_6, %c0_7], %7 {strides = array<i32>} : memref<16x32xf32, #tpu.memory_space<vmem>>, vector<16x32xf32>,
    %c0_i32_8 = arith.constant 0 : i32
    %9 = arith.cmpi eq, %arg1, %c0_i32_8 : i32
    %10 = arith.extui %9 : i1 to i32
    %c0_i32_9 = arith.constant 0 : i32
    %11 = arith.cmpi ne, %10, %c0_i32_9 : i32
    scf.if %11 {
      %c0_10 = arith.constant 0 : index
      %c0_11 = arith.constant 0 : index
      %12 = vector.load %arg9[%c0_10, %c0_11] : memref<16x32xf32, #tpu.memory_space<vmem>>, vector<16x32xf32>
      %c0_12 = arith.constant 0 : index
      %c0_13 = arith.constant 0 : index
      %13 = vector.load %arg4[%c0_12, %c0_13] : memref<1x32xf32, #tpu.memory_space<vmem>>, vector<1x32xf32>
      %14 = vector.broadcast %13 : vector<1x32xf32> to vector<16x32xf32>
      %15 = arith.addf %12, %14 : vector<16x32xf32>
      %c0_14 = arith.constant 0 : index
      %c0_15 = arith.constant 0 : index
      %16 = vector.load %arg5[%c0_14, %c0_15] : memref<16x32xf32, #tpu.memory_space<vmem>>, vector<16x32xf32>
      %17 = arith.addf %15, %16 : vector<16x32xf32>
      %cst_16 = arith.constant dense<0.000000e+00> : vector<16xf32>
      %18 = vector.multi_reduction <add>, %17, %cst_16 [1] : vector<16x32xf32> to vector<16xf32>
      %19 = vector.shape_cast %18 : vector<16xf32> to vector<16x1xf32>
      %cst_17 = arith.constant 3.200000e+01 : f32
      %20 = vector.broadcast %cst_17 : f32 to vector<16x1xf32>
      %21 = arith.divf %19, %20 : vector<16x1xf32>
      %22 = vector.broadcast %21 : vector<16x1xf32> to vector<16x32xf32>
      %23 = arith.subf %17, %22 : vector<16x32xf32>
      %24 = arith.mulf %23, %23 : vector<16x32xf32>
      %cst_18 = arith.constant dense<0.000000e+00> : vector<16xf32>
      %25 = vector.multi_reduction <add>, %24, %cst_18 [1] : vector<16x32xf32> to vector<16xf32>
      %26 = vector.shape_cast %25 : vector<16xf32> to vector<16x1xf32>
      %cst_19 = arith.constant 3.200000e+01 : f32
      %27 = vector.broadcast %cst_19 : f32 to vector<16x1xf32>
      %28 = arith.divf %26, %27 : vector<16x1xf32>
      %29 = vector.broadcast %21 : vector<16x1xf32> to vector<16x32xf32>
      %30 = arith.subf %17, %29 : vector<16x32xf32>
      %cst_20 = arith.constant 9.99999997E-7 : f32
      %31 = vector.broadcast %cst_20 : f32 to vector<16x1xf32>
      %32 = arith.addf %28, %31 : vector<16x1xf32>
      %33 = math.rsqrt %32 : vector<16x1xf32>
      %34 = vector.broadcast %33 : vector<16x1xf32> to vector<16x32xf32>
      %35 = arith.mulf %30, %34 : vector<16x32xf32>
      %c0_21 = arith.constant 0 : index
      %c0_22 = arith.constant 0 : index
      %36 = vector.load %arg6[%c0_21, %c0_22] : memref<1x32xf32, #tpu.memory_space<vmem>>, vector<1x32xf32>
      %37 = vector.broadcast %36 : vector<1x32xf32> to vector<16x32xf32>
      %38 = arith.mulf %35, %37 : vector<16x32xf32>
      %c0_23 = arith.constant 0 : index
      %c0_24 = arith.constant 0 : index
      %39 = vector.load %arg7[%c0_23, %c0_24] : memref<1x32xf32, #tpu.memory_space<vmem>>, vector<1x32xf32>
      %40 = vector.broadcast %39 : vector<1x32xf32> to vector<16x32xf32>
      %41 = arith.addf %38, %40 : vector<16x32xf32>
      %c0_25 = arith.constant 0 : index
      %c0_26 = arith.constant 0 : index
      %42 = vector.load %arg8[%c0_25, %c0_26] : memref<16x32xf32, #tpu.memory_space<vmem>>, vector<16x32xf32>
      tpu.vector_store %arg8[%c0_25, %c0_26], %41 {strides = array<i32>} : memref<16x32xf32, #tpu.memory_space<vmem>>, vector<16x32xf32>,
    } else {
    }
    return
  }
  func.func @transform_0(%arg0: i32, %arg1: i32) -> (i32, i32) {
    %c0_i32 = arith.constant 0 : i32
    return %arg0, %arg1 : i32, i32
  }
  func.func @transform_1(%arg0: i32, %arg1: i32) -> (i32, i32) {
    %c0_i32 = arith.constant 0 : i32
    %c0_i32_0 = arith.constant 0 : i32
    return %arg1, %c0_i32 : i32, i32
  }
  func.func @transform_2(%arg0: i32, %arg1: i32) -> (i32, i32) {
    %c0_i32 = arith.constant 0 : i32
    %c0_i32_0 = arith.constant 0 : i32
    %c0_i32_1 = arith.constant 0 : i32
    return %c0_i32, %c0_i32_0 : i32, i32
  }
  func.func @transform_3(%arg0: i32, %arg1: i32) -> (i32, i32) {
    %c0_i32 = arith.constant 0 : i32
    %c0_i32_0 = arith.constant 0 : i32
    return %arg0, %c0_i32 : i32, i32
  }
  func.func @transform_4(%arg0: i32, %arg1: i32) -> (i32, i32) {
    %c0_i32 = arith.constant 0 : i32
    %c0_i32_0 = arith.constant 0 : i32
    %c0_i32_1 = arith.constant 0 : i32
    return %c0_i32, %c0_i32_0 : i32, i32
  }
  func.func @transform_5(%arg0: i32, %arg1: i32) -> (i32, i32) {
    %c0_i32 = arith.constant 0 : i32
    %c0_i32_0 = arith.constant 0 : i32
    %c0_i32_1 = arith.constant 0 : i32
    return %c0_i32, %c0_i32_0 : i32, i32
  }
  func.func @transform_6(%arg0: i32, %arg1: i32) -> (i32, i32) {
    %c0_i32 = arith.constant 0 : i32
    %c0_i32_0 = arith.constant 0 : i32
    return %arg0, %c0_i32 : i32, i32
  }
}

</mosaic_0001>

<bundles_post_ra>
// kernel: _lambda_.13
= control target key start
LH: loop header
LB: loop body
LE: loop exit
PB: predicated region body
PF: predicated region fallthrough
CT: control target
= control target key end

     0   :  { %vm19_vm0 = vcmask 261120   ;;  %v150_v0 = vmov 0.0   ;;  %vm151_vm1 = vmmov 0   ;;  %vm118_vm2 = vcmask 257024   ;;  %s195_s1 = inlined_call_operand.vmem [shape: bf16[32,32], index: 1, kind: input, shape index: {}]   ;;  %s196_s0 = inlined_call_operand.vmem [shape: bf16[16,32], index: 0, kind: input, shape index: {}]   ;;  %s197_s2 = inlined_call_operand.vmem [shape: f32[1,32], index: 2, kind: input, shape index: {}]   ;;  %s198_s3 = inlined_call_operand.vmem [shape: bf16[16,32], index: 3, kind: output, shape index: {}]  }
   0x1   :  { %137 = vmatprep.subr.bf16.mxu0 %v150_v0  ;;  %v147_v1 = vld [vmem:[%s195_s1] sm:$0xff]   ;;  %141 = vmatprep.mubr.msk.bf16.mxu0 %vm151_vm1, %v150_v0  ;;  %20 = vst.msk [vmem:[#allocation2] sm:$0xff] %vm19_vm0, %v150_v0  ;;  %21 = vst.msk [vmem:[#allocation2 + $0x8] sm:$0xff] %vm19_vm0, %v150_v0  ;;  %v148_v2 = vld [vmem:[%s195_s1 + $0x8] sm:$0xff]  }
   0x2   :  { %138 = vmatpush3.bf16.msra.mxu0 %v147_v1  ;;  %v149_v3 = vld [vmem:[%s196_s0] sm:$0xff]  }
   0x3   :  { %139 = vmatprep.subr.bf16.mxu0 %v150_v0  ;;  %v129_v12 = vld [vmem:[%s197_s2] ss:$0 sm:$0xff] }
   0x6   :  { %140 = vmatpush3.bf16.msra.mxu0 %v148_v2 }
   0x8   :  { %v22_v4 = vld [vmem:[#allocation2] sm:$0xff]  ;;  %v23_v6 = vld [vmem:[#allocation2 + $0x8] sm:$0xff] }
   0x9   :  { %142 = vmatmul.mubr.msk.bf16.vlgmr.msra.gmra.mrb[0].mxu0 %vm19_vm0, %v149_v3 }
  0xdc   :  { %v85_v5 = vpop.f32.mrb[0].mxu0 }
  0xdd   :  { %v92_v7 = vadd.f32 %v85_v5, %v22_v4  ;;  %v143_v8 = vpop.f32.mrb[1].mxu0 }
  0xde   :  { %v88_v9 = vpop.f32.mrb[2].mxu0 }
  0xdf   :  { %94 = vst.msk [vmem:[#allocation2] sm:$0xff] %vm19_vm0, %v92_v7  ;;  %v93_v10 = vadd.f32 %v88_v9, %v23_v6  ;;  %v144_v11 = vpop.f32.mrb[3].mxu0 }
  0xe1   :  { %95 = vst.msk [vmem:[#allocation2 + $0x8] sm:$0xff] %vm19_vm0, %v93_v10 }
  0xe6   :  { %v99_v13 = vld [vmem:[#allocation2] sm:$0xff] }
  0xe7   :  { %v108_v14 = vadd.f32 %v129_v12, %v99_v13 }
  0xe8   :  { %v100_v15 = vld [vmem:[#allocation2 + $0x8] sm:$0xff] }
  0xe9   :  { %v132_v16 = vpack.c.bf16 %v108_v14, %v108_v14  ;;  %v109_v17 = vadd.f32 %v129_v12, %v100_v15 }
  0xeb   :  { %119 = vst.msk [vmem:[%s198_s3] sm:$0xf] %vm118_vm2, %v132_v16  ;;  %v133_v18 = vpack.c.bf16 %v109_v17, %v109_v17 }
  0xed   :  { %120 = vst.msk [vmem:[%s198_s3 + $0x4] sm:$0xf] %vm118_vm2, %v133_v18 }

// kernel: _lambda_.12
= control target key start
LH: loop header
LB: loop body
LE: loop exit
PB: predicated region body
PF: predicated region fallthrough
CT: control target
= control target key end

     0   :  { %vm28_vm0 = vcmask 261120   ;;  %v201_v0 = vmov 0.0   ;;  %vm202_vm1 = vmmov 0   ;;  %s279_s1 = inlined_call_operand.vmem [shape: bf16[32,32], index: 1, kind: input, shape index: {}]   ;;  %s280_s0 = inlined_call_operand.vmem [shape: bf16[16,32], index: 0, kind: input, shape index: {}]   ;;  %s281_s2 = inlined_call_operand.vmem [shape: f32[1,32], index: 2, kind: input, shape index: {}]   ;;  %s282_s3 = inlined_call_operand.vmem [shape: f32[16,32], index: 3, kind: input, shape index: {}]   ;;  %s283_s4 = inlined_call_operand.vmem [shape: f32[1,32], index: 4, kind: input, shape index: {}]   ;;  %s284_s5 = inlined_call_operand.vmem [shape: f32[1,32], index: 5, kind: input, shape index: {}]   ;;  %s285_s6 = inlined_call_operand.vmem [shape: f32[16,32], index: 6, kind: output, shape index: {}]  }
   0x1   :  { %184 = vmatprep.subr.bf16.mxu0 %v201_v0  ;;  %v194_v1 = vld [vmem:[%s279_s1] sm:$0xff]   ;;  %188 = vmatprep.mubr.msk.bf16.mxu0 %vm202_vm1, %v201_v0  ;;  %29 = vst.msk [vmem:[#allocation2] sm:$0xff] %vm28_vm0, %v201_v0  ;;  %30 = vst.msk [vmem:[#allocation2 + $0x8] sm:$0xff] %vm28_vm0, %v201_v0  ;;  %v195_v2 = vld [vmem:[%s279_s1 + $0x8] sm:$0xff]  }
   0x2   :  { %185 = vmatpush3.bf16.msra.mxu0 %v194_v1  ;;  %v196_v3 = vld [vmem:[%s280_s0] sm:$0xff]   ;;  %v120_v17 = vld [vmem:[%s282_s3 + $0x8] sm:$0xff] }
   0x3   :  { %186 = vmatprep.subr.bf16.mxu0 %v201_v0  ;;  %v178_v12 = vld [vmem:[%s281_s2] ss:$0 sm:$0xff] }
   0x4   :  { %v119_v14 = vld [vmem:[%s282_s3] sm:$0xff] }
   0x5   :  { %v179_v40 = vld [vmem:[%s283_s4] ss:$0 sm:$0xff] }
   0x6   :  { %187 = vmatpush3.bf16.msra.mxu0 %v195_v2  ;;  %v180_v42 = vld [vmem:[%s284_s5] ss:$0 sm:$0xff] }
   0x8   :  { %v31_v4 = vld [vmem:[#allocation2] sm:$0xff]  ;;  %v32_v6 = vld [vmem:[#allocation2 + $0x8] sm:$0xff] }
   0x9   :  { %189 = vmatmul.mubr.msk.bf16.vlgmr.msra.gmra.mrb[0].mxu0 %vm28_vm0, %v196_v3 }
  0xdc   :  { %v94_v5 = vpop.f32.mrb[0].mxu0 }
  0xdd   :  { %v101_v7 = vadd.f32 %v94_v5, %v31_v4  ;;  %v190_v8 = vpop.f32.mrb[1].mxu0 }
  0xde   :  { %v97_v9 = vpop.f32.mrb[2].mxu0 }
  0xdf   :  { %103 = vst.msk [vmem:[#allocation2] sm:$0xff] %vm28_vm0, %v101_v7  ;;  %v102_v10 = vadd.f32 %v97_v9, %v32_v6  ;;  %v191_v11 = vpop.f32.mrb[3].mxu0 }
  0xe1   :  { %104 = vst.msk [vmem:[#allocation2 + $0x8] sm:$0xff] %vm28_vm0, %v102_v10 }
  0xe6   :  { %v108_v13 = vld [vmem:[#allocation2] sm:$0xff] }
  0xe7   :  { %v117_v15 = vadd.f32 %v178_v12, %v108_v13 }
  0xe8   :  { %v109_v16 = vld [vmem:[#allocation2 + $0x8] sm:$0xff] }
  0xe9   :  { %v121_v18 = vadd.f32 %v119_v14, %v117_v15  ;;  %v118_v19 = vadd.f32 %v178_v12, %v109_v16 }
  0xeb   :  { %v123_v20 = vsel %vm28_vm0, %v121_v18, 0.0  ;;  %v122_v21 = vadd.f32 %v120_v17, %v118_v19 }
  0xec   :  { %124 = vadd.xlane.f32.xlu0 %v123_v20 }
  0xed   :  { %v126_v22 = vsel %vm28_vm0, %v122_v21, 0.0 }
  0xf0   :  { %127 = vadd.xlane.f32.xlu0 %v126_v22 }
 0x179   :  { %v125_v23 = vpop.xlane.xlu0 %124 }
 0x17a   :  { %v130_v24 = vmul.f32 0.03125, %v125_v23 }
 0x17c   :  { %v132_v25 = vsub.f32 %v121_v18, %v130_v24 }
 0x17d   :  { %v128_v26 = vpop.xlane.xlu0 %127 }
 0x17e   :  { %v131_v27 = vmul.f32 0.03125, %v128_v26  ;;  %v134_v28 = vmul.f32 %v132_v25, %v132_v25 }
 0x180   :  { %v133_v29 = vsub.f32 %v122_v21, %v131_v27  ;;  %v136_v30 = vsel %vm28_vm0, %v134_v28, 0.0 }
 0x181   :  { %137 = vadd.xlane.f32.xlu1 %v136_v30 }
 0x182   :  { %v135_v31 = vmul.f32 %v133_v29, %v133_v29 }
 0x184   :  { %v139_v32 = vsel %vm28_vm0, %v135_v31, 0.0 }
 0x185   :  { %140 = vadd.xlane.f32.xlu1 %v139_v32 }
 0x20e   :  { %v138_v33 = vpop.xlane.xlu1 %137 }
 0x20f   :  { %v142_v34 = vmul.f32 0.03125, %v138_v33 }
 0x211   :  { %v144_v35 = vadd.f32 1e-06, %v142_v34 }
 0x212   :  { %v141_v36 = vpop.xlane.xlu1 %140 }
 0x213   :  { %197 = vrsqrt.f32 %v144_v35  ;;  %v143_v37 = vmul.f32 0.03125, %v141_v36 }
 0x215   :  { %v145_v38 = vadd.f32 1e-06, %v143_v37 }
 0x217   :  { %199 = vrsqrt.f32 %v145_v38 }
 0x21d   :  { %v198_v39 = vpop.eup %197 }
 0x21e   :  { %v148_v41 = vmul.f32 %v198_v39, %v132_v25 }
 0x220   :  { %v157_v43 = vmul.f32 %v179_v40, %v148_v41 }
 0x221   :  { %v200_v44 = vpop.eup %199 }
 0x222   :  { %v166_v45 = vadd.f32 %v180_v42, %v157_v43  ;;  %v149_v46 = vmul.f32 %v200_v44, %v133_v29 }
 0x224   :  { %168 = vst.msk [vmem:[%s285_s6] sm:$0xff] %vm28_vm0, %v166_v45  ;;  %v158_v47 = vmul.f32 %v179_v40, %v149_v46 }
 0x226   :  { %v167_v48 = vadd.f32 %v180_v42, %v158_v47 }
 0x228   :  { %169 = vst.msk [vmem:[%s285_s6 + $0x8] sm:$0xff] %vm28_vm0, %v167_v48 }

// kernel: _lambda_.10
= control target key start
LH: loop header
LB: loop body
LE: loop exit
PB: predicated region body
PF: predicated region fallthrough
CT: control target
= control target key end

     0   :  { %vm34_vm0 = vcmask 261120   ;;  %v387_v0 = vmov 0.0   ;;  %vm388_vm1 = vmmov 0   ;;  %vm263_vm2 = vcmask 257024   ;;  %s511_s1 = inlined_call_operand.vmem [shape: bf16[32,32], index: 1, kind: input, shape index: {}]   ;;  %s512_s2 = inlined_call_operand.vmem [shape: bf16[32,32], index: 2, kind: input, shape index: {}]   ;;  %s513_s0 = inlined_call_operand.vmem [shape: bf16[16,32], index: 0, kind: input, shape index: {}]   ;;  %s514_s3 = inlined_call_operand.vmem [shape: bf16[32,32], index: 3, kind: input, shape index: {}]   ;;  %s515_s4 = inlined_call_operand.vmem [shape: f32[1,32], index: 4, kind: input, shape index: {}]   ;;  %s516_s5 = inlined_call_operand.vmem [shape: f32[1,32], index: 5, kind: input, shape index: {}]   ;;  %s517_s7 = inlined_call_operand.vmem [shape: bf16[16,32], index: 7, kind: output, shape index: {0}]   ;;  %s518_s6 = inlined_call_operand.vmem [shape: f32[1,32], index: 6, kind: input, shape index: {}]   ;;  %s519_s8 = inlined_call_operand.vmem [shape: bf16[16,32], index: 8, kind: output, shape index: {1}]   ;;  %s520_s9 = inlined_call_operand.vmem [shape: bf16[16,32], index: 9, kind: output, shape index: {2}]  }
   0x1   :  { %354 = vmatprep.subr.bf16.mxu0 %v387_v0  ;;  %v380_v1 = vld [vmem:[%s511_s1] sm:$0xff]   ;;  %362 = vmatprep.subr.bf16.mxu1 %v387_v0  ;;  %35 = vst.msk [vmem:[#allocation2] sm:$0xff] %vm34_vm0, %v387_v0  ;;  %36 = vst.msk [vmem:[#allocation2 + $0x8] sm:$0xff] %vm34_vm0, %v387_v0  ;;  %v381_v2 = vld [vmem:[%s511_s1 + $0x8] sm:$0xff]  }
   0x2   :  { %37 = vst.msk [vmem:[#allocation3] sm:$0xff] %vm34_vm0, %v387_v0  ;;  %38 = vst.msk [vmem:[#allocation3 + $0x8] sm:$0xff] %vm34_vm0, %v387_v0  ;;  %358 = vmatprep.mubr.msk.bf16.mxu0 %vm388_vm1, %v387_v0  ;;  %366 = vmatprep.mubr.msk.bf16.mxu1 %vm388_vm1, %v387_v0  ;;  %v382_v3 = vld [vmem:[%s512_s2] sm:$0xff]   ;;  %v385_v5 = vld [vmem:[%s512_s2 + $0x8] sm:$0xff]  }
   0x3   :  { %39 = vst.msk [vmem:[#allocation4] sm:$0xff] %vm34_vm0, %v387_v0  ;;  %40 = vst.msk [vmem:[#allocation4 + $0x8] sm:$0xff] %vm34_vm0, %v387_v0  ;;  %355 = vmatpush3.bf16.msra.mxu0 %v380_v1  ;;  %363 = vmatpush3.bf16.msra.mxu1 %v382_v3  ;;  %v383_v4 = vld [vmem:[%s513_s0] sm:$0xff]   ;;  %v386_v7 = vld [vmem:[%s514_s3 + $0x8] sm:$0xff]  }
   0x4   :  { %356 = vmatprep.subr.bf16.mxu0 %v387_v0  ;;  %364 = vmatprep.subr.bf16.mxu1 %v387_v0  ;;  %v384_v6 = vld [vmem:[%s514_s3] sm:$0xff]  }
   0x5   :  { %v330_v25 = vld [vmem:[%s515_s4] ss:$0 sm:$0xff] }
   0x6   :  { %v333_v31 = vld [vmem:[%s516_s5] ss:$0 sm:$0xff] }
   0x7   :  { %357 = vmatpush3.bf16.msra.mxu0 %v381_v2  ;;  %365 = vmatpush3.bf16.msra.mxu1 %v385_v5  ;;  %v336_v45 = vld [vmem:[%s518_s6] ss:$0 sm:$0xff] }
   0x8   :  { %370 = vmatprep.subr.bf16.mxu0 %v387_v0  ;;  %v43_v8 = vld [vmem:[#allocation2] sm:$0xff]  ;;  %v44_v10 = vld [vmem:[#allocation2 + $0x8] sm:$0xff] }
   0x9   :  { %v115_v11 = vld [vmem:[#allocation3] sm:$0xff]  ;;  %v116_v16 = vld [vmem:[#allocation3 + $0x8] sm:$0xff] }
   0xa   :  { %359 = vmatmul.mubr.msk.bf16.vlgmr.msra.gmra.mrb[0].mxu0 %vm34_vm0, %v383_v4  ;;  %367 = vmatmul.mubr.msk.bf16.vlgmr.msra.gmra.mrb[0].mxu1 %vm34_vm0, %v383_v4  ;;  %v178_v24 = vld [vmem:[#allocation4] sm:$0xff]  ;;  %v179_v27 = vld [vmem:[#allocation4 + $0x8] sm:$0xff] }
   0xb   :  { %371 = vmatpush3.bf16.msra.mxu0 %v384_v6  ;;  %374 = vmatprep.mubr.msk.bf16.mxu0 %vm388_vm1, %v387_v0 }
   0xc   :  { %372 = vmatprep.subr.bf16.mxu0 %v387_v0 }
   0xf   :  { %373 = vmatpush3.bf16.msra.mxu0 %v386_v7 }
  0x12   :  { %375 = vmatmul.mubr.msk.bf16.vlgmr.msra.gmra.mrb[4].mxu0 %vm34_vm0, %v383_v4 }
  0xdd   :  { %v104_v9 = vpop.f32.mrb[0].mxu0  ;;  %v167_v15 = vpop.f32.mrb[0].mxu1 }
  0xde   :  { %v111_v12 = vadd.f32 %v104_v9, %v43_v8  ;;  %v360_v13 = vpop.f32.mrb[1].mxu0  ;;  %v174_v19 = vadd.f32 %v167_v15, %v115_v11  ;;  %v368_v20 = vpop.f32.mrb[1].mxu1 }
  0xdf   :  { %v107_v14 = vpop.f32.mrb[2].mxu0  ;;  %v170_v21 = vpop.f32.mrb[2].mxu1 }
  0xe0   :  { %113 = vst.msk [vmem:[#allocation2] sm:$0xff] %vm34_vm0, %v111_v12  ;;  %v112_v17 = vadd.f32 %v107_v14, %v44_v10  ;;  %v361_v18 = vpop.f32.mrb[3].mxu0  ;;  %176 = vst.msk [vmem:[#allocation3] sm:$0xff] %vm34_vm0, %v174_v19  ;;  %v175_v22 = vadd.f32 %v170_v21, %v116_v16  ;;  %v369_v23 = vpop.f32.mrb[3].mxu1 }
  0xe2   :  { %114 = vst.msk [vmem:[#allocation2 + $0x8] sm:$0xff] %vm34_vm0, %v112_v17  ;;  %177 = vst.msk [vmem:[#allocation3 + $0x8] sm:$0xff] %vm34_vm0, %v175_v22 }
  0xe5   :  { %v230_v26 = vpop.f32.mrb[4].mxu0 }
  0xe6   :  { %v237_v28 = vadd.f32 %v230_v26, %v178_v24  ;;  %v376_v29 = vpop.f32.mrb[5].mxu0 }
  0xe7   :  { %v244_v30 = vld [vmem:[#allocation2] sm:$0xff]  ;;  %v233_v32 = vpop.f32.mrb[6].mxu0  ;;  %v266_v37 = vld [vmem:[#allocation3] sm:$0xff] }
  0xe8   :  { %v253_v33 = vadd.f32 %v330_v25, %v244_v30  ;;  %239 = vst.msk [vmem:[#allocation4] sm:$0xff] %vm34_vm0, %v237_v28  ;;  %v238_v34 = vadd.f32 %v233_v32, %v179_v27  ;;  %v377_v35 = vpop.f32.mrb[7].mxu0  ;;  %v275_v40 = vadd.f32 %v333_v31, %v266_v37 }
  0xe9   :  { %v245_v36 = vld [vmem:[#allocation2 + $0x8] sm:$0xff]  ;;  %v267_v41 = vld [vmem:[#allocation3 + $0x8] sm:$0xff] }
  0xea   :  { %v339_v38 = vpack.c.bf16 %v253_v33, %v253_v33  ;;  %v254_v39 = vadd.f32 %v330_v25, %v245_v36  ;;  %240 = vst.msk [vmem:[#allocation4 + $0x8] sm:$0xff] %vm34_vm0, %v238_v34  ;;  %v341_v43 = vpack.c.bf16 %v275_v40, %v275_v40  ;;  %v276_v44 = vadd.f32 %v333_v31, %v267_v41 }
  0xec   :  { %264 = vst.msk [vmem:[%s517_s7] sm:$0xf] %vm263_vm2, %v339_v38  ;;  %v340_v42 = vpack.c.bf16 %v254_v39, %v254_v39  ;;  %285 = vst.msk [vmem:[%s519_s8] sm:$0xf] %vm263_vm2, %v341_v43  ;;  %v342_v46 = vpack.c.bf16 %v276_v44, %v276_v44 }
  0xee   :  { %265 = vst.msk [vmem:[%s517_s7 + $0x4] sm:$0xf] %vm263_vm2, %v340_v42  ;;  %286 = vst.msk [vmem:[%s519_s8 + $0x4] sm:$0xf] %vm263_vm2, %v342_v46 }
  0xef   :  { %v287_v47 = vld [vmem:[#allocation4] sm:$0xff] }
  0xf0   :  { %v296_v48 = vadd.f32 %v336_v45, %v287_v47 }
  0xf1   :  { %v288_v49 = vld [vmem:[#allocation4 + $0x8] sm:$0xff] }
  0xf2   :  { %v343_v50 = vpack.c.bf16 %v296_v48, %v296_v48  ;;  %v297_v51 = vadd.f32 %v336_v45, %v288_v49 }
  0xf4   :  { %306 = vst.msk [vmem:[%s520_s9] sm:$0xf] %vm263_vm2, %v343_v50  ;;  %v344_v52 = vpack.c.bf16 %v297_v51, %v297_v51 }
  0xf6   :  { %307 = vst.msk [vmem:[%s520_s9 + $0x4] sm:$0xf] %vm263_vm2, %v344_v52 }

// kernel: _lambda_.11
= control target key start
LH: loop header
LB: loop body
LE: loop exit
PB: predicated region body
PF: predicated region fallthrough
CT: control target
= control target key end

     0   :  { %s1254_s15 = smov 0   ;;  %s1256_s16 = smov 0   ;;  %s1442_s0 = inlined_call_operand.vmem [shape: bf16[2,8,32], index: 0, kind: input, shape index: {}]   ;;  %s1443_s1 = inlined_call_operand.vmem [shape: bf16[2,8,32], index: 1, kind: input, shape index: {}]   ;;  %s1444_s2 = inlined_call_operand.vmem [shape: bf16[2,8,32], index: 2, kind: input, shape index: {}]   ;;  %s1445_s3 = inlined_call_operand.vmem [shape: f32[8,8], index: 3, kind: input, shape index: {}]   ;;  %s1446_s4 = inlined_call_operand.vmem [shape: bf16[2,8,32], index: 4, kind: output, shape index: {}]  }
   0x1   :  { %s1258_s17 = smov 0  }
   0x2 LB: > { %s33_s18 = sadd.s32 1, %s1213_s16  ;;  %p1051_p0 = scmp.ge.s32.totalorder %s1217_s17, 1  ;;  %s1217_s17 = sphi %s1258_s17, %s14_s17   ;;  %s1213_s16 = sphi %s1256_s16, %s1448_s16   ;;  %s1209_s15 = sphi %s1254_s15, %s1447_s15  }
   0x3   : > { %p35_p1 = scmp.ge.s32.totalorder %s33_s18, 2  ;;  %p229_p2 = scmp.lt.s32.totalorder %s1217_s17, 3 }
   0x5   : > { %s1450_s18 = smov (%p35_p1, %s33_s18), 0  ;;  %p230_p3 = pnand %p1051_p0, %p229_p2 }
   0x6   : > { %p280_p4 = scmp.lt.s32.totalorder (!%p230_p3), %s1209_s15, 1  ;;  %v1219_v0 = vmov (!%p230_p3), 0.0   ;;  %vm1220_vm0 = vmmov (!%p230_p3), 0   ;;  %vm338_vm1 = vcmask (!%p230_p3), 64512   ;;  %vm322_vm2 = vcmask (!%p230_p3), 7168   ;;  %v1308_v6 = vld [vmem:[%s1445_s3] sm:$0xff] (!%p230_p3) }
   0x7   : > { %233 = sbr.rel (%p230_p3) target bundleno = 1415 (0x587), region = 36  ;;  %1085 = vmatprep.subr.bf16.mxu0 (!%p230_p3), %v1219_v0  ;;  %1087 = vmatprep.mubr.msk.bf16.mxu0 (!%p230_p3), %vm1220_vm0, %v1219_v0  ;;  %v1221_v5 = vmov (!%p230_p3), -inf   ;;  %327 = vst.msk [vmem:[#allocation3] sm:$0xff] (!%p230_p3), %vm322_vm2, %v1219_v0  ;;  %328 = vst.msk [vmem:[#allocation3 + $0x8] sm:$0xff] (!%p230_p3), %vm322_vm2, %v1219_v0  ;;  %v1222_v13 = vmov (!%p230_p3), 0   ;;  %s1223_s28 = smov (!%p230_p3), 120  }
   0x8   : > { %1091 = vmatprep.subr.bf16.mxu1 (!%p230_p3), %v1219_v0  ;;  %1093 = vmatprep.mubr.msk.bf16.mxu1 (!%p230_p3), %vm1220_vm0, %v1219_v0  ;;  %323 = vst.msk [vmem:[#allocation2] sm:$0xff] (!%p230_p3), %vm322_vm2, %v1221_v5  ;;  %324 = vst.msk [vmem:[#allocation2 + $0x8] sm:$0xff] (!%p230_p3), %vm322_vm2, %v1221_v5  ;;  %s1224_s29 = smov (!%p230_p3), 112   ;;  %s1225_s30 = smov (!%p230_p3), 104   ;;  %vm414_vm3 = vcmask (!%p230_p3), 1043456   ;;  %vm331_vm4 = vcmask (!%p230_p3), 261120  }
   0x9   : > { %325 = vst.msk [vmem:[#allocation2 + $0x10] sm:$0xff] (!%p230_p3), %vm322_vm2, %v1221_v5  ;;  %326 = vst.msk [vmem:[#allocation2 + $0x18] sm:$0xff] (!%p230_p3), %vm322_vm2, %v1221_v5  ;;  %1167 = vset.pattern.permute.xlu0 (!%p230_p3), %v1222_v13  ;;  %1168 = vset.pattern.permute.xlu1 (!%p230_p3), %v1222_v13  ;;  %s1226_s8 = smov (!%p230_p3), 8   ;;  %s1227_s9 = smov (!%p230_p3), 16   ;;  %vm863_vm5 = vcmask (!%p230_p3), 130048   ;;  %vm865_vm6 = vcmask (!%p230_p3), 195584  }
   0xa   : > { %329 = vst.msk [vmem:[#allocation3 + $0x10] sm:$0xff] (!%p230_p3), %vm322_vm2, %v1219_v0  ;;  %330 = vst.msk [vmem:[#allocation3 + $0x18] sm:$0xff] (!%p230_p3), %vm322_vm2, %v1219_v0  ;;  %s1228_s10 = smov (!%p230_p3), 24   ;;  %vm918_vm7 = vcmask (!%p230_p3), 257024  }
   0xb   : > { %332 = vst.msk [vmem:[#allocation4] sm:$0xff] (!%p230_p3), %vm331_vm4, %v1219_v0 }
   0xe   : > { %s1452_s15 = smov (!%p280_p4, %s1209_s15), 1 }
   0xf   : > { %s1278_s19 = sshll.u32 %s1452_s15, 2  ;;  %v1318_v16 = vld [vmem:[#allocation2] sm:$0xff]  ;;  %v520_v58 = vld [vmem:[#allocation2 + $0x8] sm:$0xff] }
  0x10   : > { %s293_s22 = scalar_lea.vmem %s1443_s1, %s1278_s19  ;;  %s286_s25 = scalar_lea.vmem %s1442_s0, %s1278_s19  ;;  %v1365_v62 = vld [vmem:[#allocation2 + $0x10] sm:$0xff] }
  0x11   : > { %v335_v1 = vld [vmem:[%s293_s22] sm:$0xf]  ;;  %s300_s7 = scalar_lea.vmem %s1444_s2, %s1278_s19  ;;  %s314_s13 = scalar_lea.vmem %s1446_s4, %s1278_s19 }
  0x12   : > { %v343_v2 = vsel %vm338_vm1, %v335_v1, 0  ;;  %v333_v3 = vld [vmem:[%s286_s25] sm:$0xf]  ;;  %v1059_v14 = vcombine.low %v335_v1, %v335_v1 }
  0x13   : > { %1086 = vmatpush3.bf16.xpose.msra.mxu0 %v343_v2  ;;  %v334_v4 = vmul.bf16 1052065461, %v333_v3  ;;  %v1332_v20 = vld [vmem:[%s300_s7] sm:$0xf]  ;;  %v783_v3 = vld [vmem:[#allocation2 + $0x18] sm:$0xff] }
  0x14   : > { %1103 = vmatprep.subr.bf16.mxu0 %v1219_v0  ;;  %471 = vrot.lane.b32.xlu1 %v1059_v14, %s1223_s28  ;;  %v416_v21 = vsel %vm414_vm3, %v1332_v20, 0 }
  0x15   : > { %v1058_v15 = vcombine.low %v334_v4, %v334_v4  ;;  %1092 = vmatpush3.bf16.msra.mxu1 %v416_v21 }
  0x16   : > { %1097 = vmatprep.subr.bf16.mxu1 %v1219_v0 }
  0x18   : > { %466 = vrot.lane.b32.xlu1 %v1058_v15, %s1223_s28 }
  0x1a   : > { %1088 = vmatmul.mubr.msk.bf16.vlgmr.msra.gmra.mrb[0].mxu0 %vm338_vm1, %v334_v4 }
  0x1b   : > { %1105 = vmatprep.mubr.msk.bf16.mxu0 %vm1220_vm0, %v1219_v0 }
  0x1c   : > { %604 = vrot.lane.b32.xlu1 %v1059_v14, %s1224_s29 }
  0x20   : > { %602 = vrot.lane.b32.xlu1 %v1058_v15, %s1224_s29 }
  0x24   : > { %734 = vrot.lane.b32.xlu1 %v1059_v14, %s1225_s30 }
  0x28   : > { %732 = vrot.lane.b32.xlu1 %v1058_v15, %s1225_s30 }
  0x86   : > { %v472_v25 = vpop.permute.xlu1 %471 }
  0x87   : > { %v477_v28 = vsel %vm338_vm1, %v472_v25, 0 }
  0x8a   : > { %v467_v26 = vpop.permute.xlu1 %466 }
  0x8e   : > { %v605_v30 = vpop.permute.xlu1 %604 }
  0x8f   : > { %v610_v32 = vsel %vm338_vm1, %v605_v30, 0 }
  0x92   : > { %v603_v31 = vpop.permute.xlu1 %602 }
  0x96   : > { %v735_v33 = vpop.permute.xlu1 %734 }
  0x97   : > { %v740_v34 = vsel %vm338_vm1, %v735_v33, 0 }
  0x9a   : > { %v733_v35 = vpop.permute.xlu1 %732 }
  0xed   : > { %v379_v7 = vpop.f32.mrb[0].mxu0 }
  0xee   : > { %v380_v8 = vadd.f32 %v379_v7, %v1308_v6  ;;  %v1089_v9 = vpop.f32.mrb[1].mxu0 }
  0xef   : > { %v382_v10 = vpop.f32.mrb[2].mxu0 }
  0xf0   : > { %v1090_v11 = vpop.f32.mrb[3].mxu0  ;;  %v386_v12 = vsel %vm338_vm1, %v380_v8, -inf }
  0xf1   : > { %387 = vmax.xlane.f32.xlu0 %v386_v12 }
 0x17e   : > { %v388_v17 = vpop.xlane.xlu0 %387 }
 0x17f   : > { %v1321_v18 = vmax.f32 %v1318_v16, %v388_v17 }
 0x181   : > { %v390_v19 = vsub.f32 %v1318_v16, %v1321_v18  ;;  %408 = vst.msk [vmem:[#allocation2] sm:$0xff] %vm322_vm2, %v1321_v18  ;;  %395 = vperm.xlu0 %1167, %v1321_v18  }
 0x200   : > { %v396_v22 = vpop.permute.xlu0 %395 }
 0x201   : > { %v398_v23 = vsub.f32 %v380_v8, %v396_v22 }
 0x203   : > { %v399_v24 = vmul.f32 1.442695, %v398_v23 }
 0x205   : > { %1171 = vpow2.f32 %v399_v24 }
 0x20f   : > { %v1337_v27 = vpop.eup %1171 }
 0x210   : > { %v410_v29 = vpack.c.bf16 %v1337_v27, %v1337_v27  ;;  %v403_v7 = vsel %vm338_vm1, %v1337_v27, 0.0 }
 0x212   : > { %1094 = vmatmul.mubr.msk.bf16.vlgmr.msra.gmra.mrb[0].mxu1 %vm338_vm1, %v410_v29 }
 0x213   : > { %1098 = vmatpush3.bf16.xpose.msra.mxu1 %v477_v28  ;;  %1099 = vmatprep.mubr.msk.bf16.mxu1 %vm1220_vm0, %v1219_v0 }
 0x214   : > { %1109 = vmatprep.subr.bf16.mxu1 %v1219_v0 }
 0x21a   : > { %1100 = vmatmul.mubr.msk.bf16.vlgmr.msra.gmra.mrb[4].mxu1 %vm338_vm1, %v467_v26 }
 0x21b   : > { %1110 = vmatpush3.bf16.xpose.msra.mxu1 %v610_v32  ;;  %1111 = vmatprep.mubr.msk.bf16.mxu1 %vm1220_vm0, %v1219_v0 }
 0x21c   : > { %1121 = vmatprep.subr.bf16.mxu1 %v1219_v0 }
 0x222   : > { %1112 = vmatmul.mubr.msk.bf16.vlgmr.msra.gmra.mrb[8].mxu1 %vm338_vm1, %v603_v31 }
 0x223   : > { %1122 = vmatpush3.bf16.xpose.msra.mxu1 %v740_v34  ;;  %1123 = vmatprep.mubr.msk.bf16.mxu1 %vm1220_vm0, %v1219_v0 }
 0x22a   : > { %1124 = vmatmul.mubr.msk.bf16.vlgmr.msra.gmra.mrb[12].mxu1 %vm338_vm1, %v733_v35 }
 0x2e5   : > { %v1356_v36 = vpop.f32.mrb[0].mxu1 }
 0x2e6   : > { %v1095_v37 = vpop.f32.mrb[1].mxu1 }
 0x2e7   : > { %v455_v38 = vpop.f32.mrb[2].mxu1 }
 0x2e8   : > { %v1096_v39 = vpop.f32.mrb[3].mxu1 }
 0x2ed   : > { %v513_v40 = vpop.f32.mrb[4].mxu1 }
 0x2ee   : > { %v514_v41 = vadd.f32 %v513_v40, %v1308_v6  ;;  %v1101_v42 = vpop.f32.mrb[5].mxu1 }
 0x2ef   : > { %v516_v43 = vpop.f32.mrb[6].mxu1 }
 0x2f0   : > { %v1102_v44 = vpop.f32.mrb[7].mxu1  ;;  %v521_v45 = vsel %vm338_vm1, %v514_v41, -inf }
 0x2f1   : > { %522 = vmax.xlane.f32.xlu1 %v521_v45  ;;  %v401_v45 = vld [vmem:[#allocation3] sm:$0xff] }
 0x2f5   : > { %v646_v46 = vpop.f32.mrb[8].mxu1 }
 0x2f6   : > { %v647_v47 = vadd.f32 %v646_v46, %v1308_v6  ;;  %v1113_v48 = vpop.f32.mrb[9].mxu1 }
 0x2f7   : > { %v649_v49 = vpop.f32.mrb[10].mxu1 }
 0x2f8   : > { %v1114_v50 = vpop.f32.mrb[11].mxu1  ;;  %v654_v51 = vsel %vm338_vm1, %v647_v47, -inf }
 0x2f9   : > { %655 = vmax.xlane.f32.xlu0 %v654_v51 }
 0x2fd   : > { %v776_v52 = vpop.f32.mrb[12].mxu1 }
 0x2fe   : > { %v777_v53 = vadd.f32 %v776_v52, %v1308_v6  ;;  %v1125_v54 = vpop.f32.mrb[13].mxu1  ;;  %v1061_v6 = vcombine.low %v1332_v20, %v1332_v20 }
 0x2ff   : > { %v779_v55 = vpop.f32.mrb[14].mxu1  ;;  %v800_v54 = vld [vmem:[#allocation3 + $0x18] sm:$0xff] }
 0x300   : > { %v1126_v56 = vpop.f32.mrb[15].mxu1  ;;  %v784_v57 = vsel %vm338_vm1, %v777_v53, -inf }
 0x301   : > { %785 = vmax.xlane.f32.xlu1 %v784_v57 }
 0x37e   : > { %v523_v59 = vpop.xlane.xlu1 %522 }
 0x37f   : > { %v524_v60 = vmax.f32 %v520_v58, %v523_v59 }
 0x381   : > { %v525_v61 = vsub.f32 %v520_v58, %v524_v60  ;;  %543 = vst.msk [vmem:[#allocation2 + $0x8] sm:$0xff] %vm322_vm2, %v524_v60  ;;  %530 = vperm.xlu1 %1168, %v524_v60  }
 0x383   : > { %v526_v8 = vmul.f32 1.442695, %v525_v61 }
 0x385   : > { %1173 = vpow2.f32 %v526_v8 }
 0x386   : > { %v656_v63 = vpop.xlane.xlu0 %655 }
 0x387   : > { %v1368_v1 = vmax.f32 %v1365_v62, %v656_v63 }
 0x389   : > { %v658_v2 = vsub.f32 %v1365_v62, %v1368_v1  ;;  %676 = vst.msk [vmem:[#allocation2 + $0x10] sm:$0xff] %vm322_vm2, %v1368_v1  ;;  %663 = vperm.xlu0 %1167, %v1368_v1  }
 0x38b   : > { %v659_v42 = vmul.f32 1.442695, %v658_v2 }
 0x38e   : > { %v786_v4 = vpop.xlane.xlu1 %785 }
 0x38f   : > { %v787_v5 = vmax.f32 %v783_v3, %v786_v4  ;;  %v1383_v11 = vpop.eup %1173 }
 0x391   : > { %806 = vst.msk [vmem:[#allocation2 + $0x18] sm:$0xff] %vm322_vm2, %v787_v5  ;;  %793 = vperm.xlu1 %1168, %v787_v5   ;;  %v788_v9 = vsub.f32 %v783_v3, %v787_v5 }
 0x393   : > { %v789_v10 = vmul.f32 1.442695, %v788_v9 }
 0x395   : > { %549 = vrot.lane.b32.xlu1 %v1061_v6, %s1223_s28  ;;  %1175 = vpow2.f32 %v789_v10 }
 0x399   : > { %679 = vrot.lane.b32.xlu1 %v1061_v6, %s1224_s29 }
 0x39d   : > { %809 = vrot.lane.b32.xlu1 %v1061_v6, %s1225_s30 }
 0x39f   : > { %v1386_v12 = vpop.eup %1175 }
 0x3a0   : > { %v801_v56 = vmul.f32 %v1386_v12, %v800_v54 }
 0x3c1   : > { %404 = vadd.xlane.f32.xlu1 %v403_v7 }
 0x3d2   : > { %599 = vperm.xlu1 %1168, %v1383_v11  }
 0x3d6   : > { %859 = vperm.xlu1 %1168, %v1386_v12  }
 0x400   : > { %v531_v13 = vpop.permute.xlu1 %530 }
 0x401   : > { %v533_v14 = vsub.f32 %v514_v41, %v531_v13  ;;  %v391_v41 = vmul.f32 1.442695, %v390_v19 }
 0x403   : > { %v534_v15 = vmul.f32 1.442695, %v533_v14 }
 0x405   : > { %1177 = vpow2.f32 %v534_v15 }
 0x408   : > { %v664_v17 = vpop.permute.xlu0 %663 }
 0x409   : > { %v666_v20 = vsub.f32 %v647_v47, %v664_v17  ;;  %v537_v47 = vld [vmem:[#allocation3 + $0x8] sm:$0xff] }
 0x40a   : > { %v538_v48 = vmul.f32 %v1383_v11, %v537_v47 }
 0x40b   : > { %v667_v21 = vmul.f32 1.442695, %v666_v20 }
 0x40d   : > { %1179 = vpow2.f32 %v667_v21 }
 0x40f   : > { %v1178_v22 = vpop.eup %1177 }
 0x410   : > { %v794_v23 = vpop.permute.xlu1 %793  ;;  %v539_v24 = vsel %vm338_vm1, %v1178_v22, 0.0  ;;  %v545_v30 = vpack.c.bf16 %v1178_v22, %v1178_v22 }
 0x411   : > { %v796_v25 = vsub.f32 %v777_v53, %v794_v23  ;;  %540 = vadd.xlane.f32.xlu0 %v539_v24  ;;  %v337_v23 = vld [vmem:[#allocation4] sm:$0xff] }
 0x413   : > { %v797_v26 = vmul.f32 1.442695, %v796_v25 }
 0x414   : > { %v550_v27 = vpop.permute.xlu1 %549 }
 0x415   : > { %1181 = vpow2.f32 %v797_v26  ;;  %v555_v28 = vsel %vm414_vm3, %v550_v27, 0 }
 0x416   : > { %1104 = vmatpush3.bf16.msra.mxu0 %v555_v28  ;;  %1183 = vpow2.f32 %v391_v41 }
 0x417   : > { %v1180_v29 = vpop.eup %1179  ;;  %1115 = vmatprep.subr.bf16.mxu0 %v1219_v0  ;;  %1185 = vpow2.f32 %v659_v42 }
 0x418   : > { %v672_v31 = vsel %vm338_vm1, %v1180_v29, 0.0  ;;  %v680_v32 = vpop.permute.xlu1 %679  ;;  %v678_v37 = vpack.c.bf16 %v1180_v29, %v1180_v29 }
 0x419   : > { %673 = vadd.xlane.f32.xlu0 %v672_v31  ;;  %1106 = vmatmul.mubr.msk.bf16.vlgmr.msra.gmra.mrb[4].mxu0 %vm338_vm1, %v545_v30  ;;  %v685_v33 = vsel %vm414_vm3, %v680_v32, 0 }
 0x41a   : > { %1116 = vmatpush3.bf16.msra.mxu0 %v685_v33  ;;  %1117 = vmatprep.mubr.msk.bf16.mxu0 %vm1220_vm0, %v1219_v0 }
 0x41b   : > { %1127 = vmatprep.subr.bf16.mxu0 %v1219_v0 }
 0x41c   : > { %v810_v34 = vpop.permute.xlu1 %809 }
 0x41d   : > { %v815_v38 = vsel %vm414_vm3, %v810_v34, 0 }
 0x41f   : > { %v1182_v35 = vpop.eup %1181 }
 0x420   : > { %v802_v39 = vsel %vm338_vm1, %v1182_v35, 0.0  ;;  %v808_v40 = vpack.c.bf16 %v1182_v35, %v1182_v35  ;;  %v1184_v43 = vpop.eup %1183 }
 0x421   : > { %803 = vadd.xlane.f32.xlu0 %v802_v39  ;;  %1118 = vmatmul.mubr.msk.bf16.vlgmr.msra.gmra.mrb[8].mxu0 %vm338_vm1, %v678_v37  ;;  %v1186_v44 = vpop.eup %1185  ;;  %v402_v46 = vmul.f32 %v1184_v43, %v401_v45 }
 0x422   : > { %1128 = vmatpush3.bf16.msra.mxu0 %v815_v38  ;;  %1129 = vmatprep.mubr.msk.bf16.mxu0 %vm1220_vm0, %v1219_v0  ;;  %v670_v0 = vld [vmem:[#allocation3 + $0x10] sm:$0xff] }
 0x423   : > { %v671_v51 = vmul.f32 %v1186_v44, %v670_v0 }
 0x429   : > { %1130 = vmatmul.mubr.msk.bf16.vlgmr.msra.gmra.mrb[12].mxu0 %vm338_vm1, %v808_v40 }
 0x437   : > { %460 = vperm.xlu0 %1167, %v1184_v43  }
 0x43b   : > { %729 = vperm.xlu0 %1167, %v1186_v44  }
 0x44e   : > { %v405_v16 = vpop.xlane.xlu1 %404 }
 0x44f   : > { %v406_v18 = vadd.f32 %v405_v16, %v402_v46 }
 0x451   : > { %409 = vst.msk [vmem:[#allocation3] sm:$0xff] %vm322_vm2, %v406_v18  ;;  %1187 = vrcp.f32 %v406_v18 }
 0x452   : > { %v600_v10 = vpop.permute.xlu1 %599 }
 0x456   : > { %v860_v11 = vpop.permute.xlu1 %859 }
 0x45b   : > { %v1188_v19 = vpop.eup %1187 }
 0x45c   : > { %892 = vperm.xlu0 %1167, %v1188_v19  }
 0x49e   : > { %v541_v49 = vpop.xlane.xlu0 %540 }
 0x49f   : > { %v542_v50 = vadd.f32 %v541_v49, %v538_v48 }
 0x4a1   : > { %544 = vst.msk [vmem:[#allocation3 + $0x8] sm:$0xff] %vm322_vm2, %v542_v50  ;;  %1189 = vrcp.f32 %v542_v50 }
 0x4a6   : > { %v674_v52 = vpop.xlane.xlu0 %673 }
 0x4a7   : > { %v675_v53 = vadd.f32 %v674_v52, %v671_v51 }
 0x4a9   : > { %677 = vst.msk [vmem:[#allocation3 + $0x10] sm:$0xff] %vm322_vm2, %v675_v53  ;;  %1191 = vrcp.f32 %v675_v53 }
 0x4ab   : > { %v1190_v55 = vpop.eup %1189 }
 0x4ac   : > { %898 = vperm.xlu1 %1168, %v1190_v55  }
 0x4ae   : > { %v804_v57 = vpop.xlane.xlu0 %803 }
 0x4af   : > { %v805_v58 = vadd.f32 %v804_v57, %v801_v56 }
 0x4b1   : > { %807 = vst.msk [vmem:[#allocation3 + $0x18] sm:$0xff] %vm322_vm2, %v805_v58  ;;  %1193 = vrcp.f32 %v805_v58 }
 0x4b3   : > { %v1192_v59 = vpop.eup %1191 }
 0x4b4   : > { %904 = vperm.xlu0 %1167, %v1192_v59  }
 0x4b6   : > { %v461_v12 = vpop.permute.xlu0 %460 }
 0x4b7   : > { %v862_v17 = vsel %vm338_vm1, %v461_v12, %v600_v10 }
 0x4ba   : > { %v730_v14 = vpop.permute.xlu0 %729 }
 0x4bb   : > { %v1194_v9 = vpop.eup %1193  ;;  %v864_v20 = vsel %vm863_vm5, %v862_v17, %v730_v14 }
 0x4bc   : > { %v866_v22 = vsel %vm865_vm6, %v864_v20, %v860_v11 }
 0x4bd   : > { %v867_v26 = vmul.f32 %v866_v22, %v337_v23 }
 0x4db   : > { %v893_v30 = vpop.permute.xlu0 %892 }
 0x4ec   : > { %v591_v60 = vpop.f32.mrb[4].mxu0 }
 0x4ed   : > { %869 = vrot.lane.b32.xlu1 %v591_v60, %s1226_s8  ;;  %v1107_v61 = vpop.f32.mrb[5].mxu0 }
 0x4ee   : > { %v594_v62 = vpop.f32.mrb[6].mxu0 }
 0x4ef   : > { %v1108_v63 = vpop.f32.mrb[7].mxu0 }
 0x4f4   : > { %v721_v1 = vpop.f32.mrb[8].mxu0 }
 0x4f5   : > { %873 = vrot.lane.b32.xlu1 %v721_v1, %s1227_s9  ;;  %v1119_v2 = vpop.f32.mrb[9].mxu0 }
 0x4f6   : > { %v724_v3 = vpop.f32.mrb[10].mxu0 }
 0x4f7   : > { %v1120_v4 = vpop.f32.mrb[11].mxu0 }
 0x4fc   : > { %v851_v5 = vpop.f32.mrb[12].mxu0 }
 0x4fd   : > { %877 = vrot.lane.b32.xlu1 %v851_v5, %s1228_s10  ;;  %v1131_v6 = vpop.f32.mrb[13].mxu0 }
 0x4fe   : > { %v854_v7 = vpop.f32.mrb[14].mxu0 }
 0x4ff   : > { %v1132_v8 = vpop.f32.mrb[15].mxu0 }
 0x501   : > { %910 = vperm.xlu1 %1168, %v1194_v9  }
 0x52b   : > { %v899_v13 = vpop.permute.xlu1 %898 }
 0x52c   : > { %v913_v32 = vsel %vm338_vm1, %v893_v30, %v899_v13 }
 0x533   : > { %v905_v31 = vpop.permute.xlu0 %904 }
 0x534   : > { %v914_v33 = vsel %vm863_vm5, %v913_v32, %v905_v31 }
 0x55f   : > { %v870_v15 = vpop.permute.xlu1 %869 }
 0x560   : > { %v880_v24 = vsel %vm338_vm1, %v1356_v36, %v870_v15 }
 0x567   : > { %v874_v21 = vpop.permute.xlu1 %873 }
 0x568   : > { %v881_v25 = vsel %vm863_vm5, %v880_v24, %v874_v21 }
 0x56f   : > { %v878_v27 = vpop.permute.xlu1 %877 }
 0x570   : > { %v882_v28 = vsel %vm865_vm6, %v881_v25, %v878_v27 }
 0x571   : > { %v883_v29 = vadd.f32 %v882_v28, %v867_v26 }
 0x573   : > { %885 = vst.msk [vmem:[#allocation4] sm:$0xff] %vm331_vm4, %v883_v29 }
 0x580   : > { %v911_v34 = vpop.permute.xlu1 %910 }
 0x581   : > { %v915_v35 = vsel %vm865_vm6, %v914_v33, %v911_v34 }
 0x582   : > { %v916_v37 = vmul.f32 %v915_v35, %v883_v29 }
 0x584   : > { %v917_v36 = vpack.c.bf16 %v916_v37, %v916_v37 }
 0x586   : > { %919 = vst.msk [vmem:[%s314_s13] sm:$0xf] %vm918_vm7, %v917_v36 }
 0x587 PF: > { %s14_s17 = sadd.s32 1, %s1217_s17   ;;  %s1447_s15 = smov %s1213_s16 }
 0x588   : > { %p11_p5 = scmp.ge.s32.totalorder %s14_s17, 4   ;;  %s1448_s16 = smov %s1450_s18 }
 0x58a   :  { %13 = sbr.rel (!%p11_p5) target bundleno = 2 (0x2), region = 89 }

// kernel: _lambda_.14
= control target key start
LH: loop header
LB: loop body
LE: loop exit
PB: predicated region body
PF: predicated region fallthrough
CT: control target
= control target key end

     0   :  { %vm19_vm0 = vcmask 261120   ;;  %v197_v1 = vmov 0.0   ;;  %vm156_vm1 = vcmask 257024   ;;  %s255_s1 = inlined_call_operand.vmem [shape: bf16[32,32], index: 1, kind: input, shape index: {}]   ;;  %s256_s0 = inlined_call_operand.vmem [shape: bf16[32,32], index: 0, kind: input, shape index: {}]   ;;  %s257_s2 = inlined_call_operand.vmem [shape: f32[1,32], index: 2, kind: input, shape index: {}]   ;;  %s258_s3 = inlined_call_operand.vmem [shape: bf16[32,32], index: 3, kind: output, shape index: {}]  }
   0x1   :  { %v193_v0 = vld [vmem:[%s255_s1] sm:$0xff]   ;;  %22 = vst.msk [vmem:[#allocation2 + $0x10] sm:$0xff] %vm19_vm0, %v197_v1  ;;  %20 = vst.msk [vmem:[#allocation2] sm:$0xff] %vm19_vm0, %v197_v1  ;;  %v194_v2 = vld [vmem:[%s255_s1 + $0x8] sm:$0xff]  }
   0x2   :  { %21 = vst.msk [vmem:[#allocation2 + $0x8] sm:$0xff] %vm19_vm0, %v197_v1  ;;  %23 = vst.msk [vmem:[#allocation2 + $0x18] sm:$0xff] %vm19_vm0, %v197_v1  ;;  %184 = vmatprep.subr.bf16.mxu0 %v193_v0  ;;  %v195_v3 = vld [vmem:[%s256_s0] sm:$0xff]   ;;  %v196_v4 = vld [vmem:[%s256_s0 + $0x8] sm:$0xff]  }
   0x3   :  { %185 = vmatpush3.bf16.msra.mxu0 %v193_v0  ;;  %188 = vmatprep.mubr.msk.bf16.mxu0 %vm19_vm0, %v195_v3  ;;  %v171_v17 = vld [vmem:[%s257_s2] ss:$0 sm:$0xff] }
   0x4   :  { %186 = vmatprep.subr.bf16.mxu0 %v194_v2 }
   0x7   :  { %187 = vmatpush3.bf16.msra.mxu0 %v194_v2 }
   0x8   :  { %v26_v5 = vld [vmem:[#allocation2 + $0x10] sm:$0xff]  ;;  %v24_v6 = vld [vmem:[#allocation2] sm:$0xff] }
   0x9   :  { %v27_v8 = vld [vmem:[#allocation2 + $0x18] sm:$0xff]  ;;  %v25_v11 = vld [vmem:[#allocation2 + $0x8] sm:$0xff] }
   0xa   :  { %189 = vmatmul.mubr.msk.bf16.vlgmr.msra.gmra.mrb[0].mxu0 %vm19_vm0, %v196_v4 }
  0xdd   :  { %v190_v7 = vpop.f32.mrb[0].mxu0 }
  0xde   :  { %v116_v9 = vadd.f32 %v190_v7, %v26_v5  ;;  %v99_v10 = vpop.f32.mrb[1].mxu0 }
  0xdf   :  { %v114_v12 = vadd.f32 %v99_v10, %v24_v6  ;;  %v191_v13 = vpop.f32.mrb[2].mxu0 }
  0xe0   :  { %120 = vst.msk [vmem:[#allocation2 + $0x10] sm:$0xff] %vm19_vm0, %v116_v9  ;;  %v117_v14 = vadd.f32 %v191_v13, %v27_v8  ;;  %v102_v15 = vpop.f32.mrb[3].mxu0 }
  0xe1   :  { %118 = vst.msk [vmem:[#allocation2] sm:$0xff] %vm19_vm0, %v114_v12  ;;  %v115_v16 = vadd.f32 %v102_v15, %v25_v11 }
  0xe2   :  { %121 = vst.msk [vmem:[#allocation2 + $0x18] sm:$0xff] %vm19_vm0, %v117_v14 }
  0xe3   :  { %119 = vst.msk [vmem:[#allocation2 + $0x8] sm:$0xff] %vm19_vm0, %v115_v16 }
  0xe7   :  { %v127_v18 = vld [vmem:[#allocation2 + $0x10] sm:$0xff] }
  0xe8   :  { %v138_v19 = vadd.f32 %v171_v17, %v127_v18  ;;  %v125_v20 = vld [vmem:[#allocation2] sm:$0xff] }
  0xe9   :  { %v136_v21 = vadd.f32 %v171_v17, %v125_v20  ;;  %v128_v22 = vld [vmem:[#allocation2 + $0x18] sm:$0xff] }
  0xea   :  { %v178_v23 = vpack.c.bf16 %v138_v19, %v138_v19  ;;  %v139_v24 = vadd.f32 %v171_v17, %v128_v22  ;;  %v126_v25 = vld [vmem:[#allocation2 + $0x8] sm:$0xff] }
  0xeb   :  { %v176_v26 = vpack.c.bf16 %v136_v21, %v136_v21  ;;  %v137_v27 = vadd.f32 %v171_v17, %v126_v25 }
  0xec   :  { %159 = vst.msk [vmem:[%s258_s3 + $0x8] sm:$0xf] %vm156_vm1, %v178_v23  ;;  %v179_v28 = vpack.c.bf16 %v139_v24, %v139_v24 }
  0xed   :  { %157 = vst.msk [vmem:[%s258_s3] sm:$0xf] %vm156_vm1, %v176_v26  ;;  %v177_v29 = vpack.c.bf16 %v137_v27, %v137_v27 }
  0xee   :  { %160 = vst.msk [vmem:[%s258_s3 + $0xc] sm:$0xf] %vm156_vm1, %v179_v28 }
  0xef   :  { %158 = vst.msk [vmem:[%s258_s3 + $0x4] sm:$0xf] %vm156_vm1, %v177_v29 }

// kernel: _lambda_.18
= control target key start
LH: loop header
LB: loop body
LE: loop exit
PB: predicated region body
PF: predicated region fallthrough
CT: control target
= control target key end

     0   :  { %vm19_vm0 = vcmask 523264   ;;  %v153_v0 = vmov 0.0   ;;  %vm154_vm1 = vmmov 0   ;;  %vm47_vm2 = vcmask 261120   ;;  %s197_s1 = inlined_call_operand.vmem [shape: bf16[32,64], index: 1, kind: input, shape index: {}]   ;;  %s198_s0 = inlined_call_operand.vmem [shape: bf16[16,32], index: 0, kind: input, shape index: {}]   ;;  %s199_s2 = inlined_call_operand.vmem [shape: f32[1,64], index: 2, kind: input, shape index: {}]   ;;  %s200_s3 = inlined_call_operand.vmem [shape: bf16[16,64], index: 3, kind: output, shape index: {}]  }
   0x1   :  { %140 = vmatprep.subr.bf16.mxu0 %v153_v0  ;;  %v150_v1 = vld [vmem:[%s197_s1] sm:$0xff]   ;;  %144 = vmatprep.mubr.msk.bf16.mxu0 %vm154_vm1, %v153_v0  ;;  %20 = vst.msk [vmem:[#allocation2] sm:$0xff] %vm19_vm0, %v153_v0  ;;  %21 = vst.msk [vmem:[#allocation2 + $0x8] sm:$0xff] %vm19_vm0, %v153_v0  ;;  %v151_v2 = vld [vmem:[%s197_s1 + $0x8] sm:$0xff]   ;;  %vm121_vm3 = vcmask 519168  }
   0x2   :  { %141 = vmatpush3.bf16.msra.mxu0 %v150_v1  ;;  %v152_v3 = vld [vmem:[%s198_s0] sm:$0xff]  }
   0x3   :  { %142 = vmatprep.subr.bf16.mxu0 %v153_v0  ;;  %v132_v12 = vld [vmem:[%s199_s2] ss:$0 sm:$0xff] }
   0x6   :  { %143 = vmatpush3.bf16.msra.mxu0 %v151_v2 }
   0x8   :  { %v22_v4 = vld [vmem:[#allocation2] sm:$0xff]  ;;  %v23_v6 = vld [vmem:[#allocation2 + $0x8] sm:$0xff] }
   0x9   :  { %145 = vmatmul.mubr.msk.bf16.vlgmr.msra.gmra.mrb[0].mxu0 %vm47_vm2, %v152_v3 }
  0xdc   :  { %v85_v5 = vpop.f32.mrb[0].mxu0 }
  0xdd   :  { %v92_v7 = vadd.f32 %v85_v5, %v22_v4  ;;  %v146_v8 = vpop.f32.mrb[1].mxu0 }
  0xde   :  { %v88_v9 = vpop.f32.mrb[2].mxu0 }
  0xdf   :  { %95 = vst.msk [vmem:[#allocation2] sm:$0xff] %vm19_vm0, %v92_v7  ;;  %v93_v10 = vadd.f32 %v88_v9, %v23_v6  ;;  %v147_v11 = vpop.f32.mrb[3].mxu0 }
  0xe1   :  { %96 = vst.msk [vmem:[#allocation2 + $0x8] sm:$0xff] %vm19_vm0, %v93_v10 }
  0xe6   :  { %v100_v13 = vld [vmem:[#allocation2] sm:$0xff] }
  0xe7   :  { %v109_v14 = vadd.f32 %v132_v12, %v100_v13 }
  0xe8   :  { %v101_v15 = vld [vmem:[#allocation2 + $0x8] sm:$0xff] }
  0xe9   :  { %v111_v16 = vmax.f32 %v109_v14, 0.0  ;;  %v110_v17 = vadd.f32 %v132_v12, %v101_v15 }
  0xeb   :  { %v135_v18 = vpack.c.bf16 %v111_v16, %v111_v16  ;;  %v112_v19 = vmax.f32 %v110_v17, 0.0 }
  0xed   :  { %122 = vst.msk [vmem:[%s200_s3] sm:$0xf] %vm121_vm3, %v135_v18  ;;  %v136_v20 = vpack.c.bf16 %v112_v19, %v112_v19 }
  0xef   :  { %123 = vst.msk [vmem:[%s200_s3 + $0x4] sm:$0xf] %vm121_vm3, %v136_v20 }

// kernel: _lambda_.16
= control target key start
LH: loop header
LB: loop body
LE: loop exit
PB: predicated region body
PF: predicated region fallthrough
CT: control target
= control target key end

     0   :  { %s1196_s12 = smov 0   ;;  %s1198_s13 = smov 0   ;;  %s1366_s0 = inlined_call_operand.vmem [shape: bf16[2,8,32], index: 0, kind: input, shape index: {}]   ;;  %s1367_s1 = inlined_call_operand.vmem [shape: bf16[2,16,32], index: 1, kind: input, shape index: {}]   ;;  %s1368_s2 = inlined_call_operand.vmem [shape: bf16[2,16,32], index: 2, kind: input, shape index: {}]   ;;  %s1369_s3 = inlined_call_operand.vmem [shape: bf16[2,8,32], index: 3, kind: output, shape index: {}]  }
   0x1   :  { %s1200_s14 = smov 0  }
   0x2 LB: > { %s32_s15 = sadd.s32 1, %s1160_s13  ;;  %p994_p0 = scmp.ge.s32.totalorder %s1164_s14, 1  ;;  %s1164_s14 = sphi %s1200_s14, %s13_s14   ;;  %s1160_s13 = sphi %s1198_s13, %s1371_s13   ;;  %s1156_s12 = sphi %s1196_s12, %s1370_s12  }
   0x3   : > { %p34_p1 = scmp.ge.s32.totalorder %s32_s15, 2  ;;  %p196_p2 = scmp.lt.s32.totalorder %s1164_s14, 3 }
   0x5   : > { %s1373_s15 = smov (%p34_p1, %s32_s15), 0  ;;  %p197_p3 = pnand %p994_p0, %p196_p2 }
   0x6   : > { %p242_p4 = scmp.lt.s32.totalorder (!%p197_p3), %s1156_s12, 1  ;;  %v1166_v0 = vmov (!%p197_p3), 0.0   ;;  %vm1167_vm0 = vmmov (!%p197_p3), 0   ;;  %vm305_vm1 = vcmask (!%p197_p3), 64512   ;;  %vm282_vm2 = vcmask (!%p197_p3), 7168   ;;  %s1170_s24 = smov (!%p197_p3), 120  }
   0x7   : > { %200 = sbr.rel (%p197_p3) target bundleno = 1410 (0x582), region = 32  ;;  %1032 = vmatprep.subr.bf16.mxu0 (!%p197_p3), %v1166_v0  ;;  %1034 = vmatprep.mubr.msk.bf16.mxu0 (!%p197_p3), %vm1167_vm0, %v1166_v0  ;;  %v1168_v5 = vmov (!%p197_p3), -inf   ;;  %287 = vst.msk [vmem:[#allocation3] sm:$0xff] (!%p197_p3), %vm282_vm2, %v1166_v0  ;;  %288 = vst.msk [vmem:[#allocation3 + $0x8] sm:$0xff] (!%p197_p3), %vm282_vm2, %v1166_v0  ;;  %vm353_vm3 = vcmask (!%p197_p3), 130048   ;;  %v1169_v11 = vmov (!%p197_p3), 0  }
   0x8   : > { %1038 = vmatprep.subr.bf16.mxu1 (!%p197_p3), %v1166_v0  ;;  %1040 = vmatprep.mubr.msk.bf16.mxu1 (!%p197_p3), %vm1167_vm0, %v1166_v0  ;;  %283 = vst.msk [vmem:[#allocation2] sm:$0xff] (!%p197_p3), %vm282_vm2, %v1168_v5  ;;  %284 = vst.msk [vmem:[#allocation2 + $0x8] sm:$0xff] (!%p197_p3), %vm282_vm2, %v1168_v5  ;;  %s1171_s25 = smov (!%p197_p3), 112   ;;  %s1172_s26 = smov (!%p197_p3), 104   ;;  %vm291_vm4 = vcmask (!%p197_p3), 261120   ;;  %vm822_vm5 = vcmask (!%p197_p3), 195584  }
   0x9   : > { %285 = vst.msk [vmem:[#allocation2 + $0x10] sm:$0xff] (!%p197_p3), %vm282_vm2, %v1168_v5  ;;  %286 = vst.msk [vmem:[#allocation2 + $0x18] sm:$0xff] (!%p197_p3), %vm282_vm2, %v1168_v5  ;;  %1114 = vset.pattern.permute.xlu0 (!%p197_p3), %v1169_v11  ;;  %1115 = vset.pattern.permute.xlu1 (!%p197_p3), %v1169_v11  ;;  %s1173_s30 = smov (!%p197_p3), 8   ;;  %s1174_s4 = smov (!%p197_p3), 16   ;;  %vm875_vm6 = vcmask (!%p197_p3), 257024  }
   0xa   : > { %289 = vst.msk [vmem:[#allocation3 + $0x10] sm:$0xff] (!%p197_p3), %vm282_vm2, %v1166_v0  ;;  %290 = vst.msk [vmem:[#allocation3 + $0x18] sm:$0xff] (!%p197_p3), %vm282_vm2, %v1166_v0  ;;  %s1175_s5 = smov (!%p197_p3), 24  }
   0xb   : > { %292 = vst.msk [vmem:[#allocation4] sm:$0xff] (!%p197_p3), %vm291_vm4, %v1166_v0 }
   0xe   : > { %s1375_s12 = smov (!%p242_p4, %s1156_s12), 1 }
   0xf   : > { %s1014_s16 = sshll.u32 %s1375_s12, 3  ;;  %s995_s17 = sshll.u32 %s1375_s12, 2  ;;  %v1258_v13 = vld [vmem:[#allocation2] sm:$0xff]  ;;  %v487_v51 = vld [vmem:[#allocation2 + $0x8] sm:$0xff] }
  0x10   : > { %s257_s20 = scalar_lea.vmem %s1367_s1, %s1014_s16  ;;  %s248_s23 = scalar_lea.vmem %s1366_s0, %s995_s17  ;;  %v1302_v55 = vld [vmem:[#allocation2 + $0x10] sm:$0xff]  ;;  %v743_v59 = vld [vmem:[#allocation2 + $0x18] sm:$0xff] }
  0x11   : > { %v1116_v1 = vld [vmem:[%s257_s20] sm:$0xff]   ;;  %s267_s29 = scalar_lea.vmem %s1368_s2, %s1014_s16  ;;  %s275_s8 = scalar_lea.vmem %s1369_s3, %s995_s17 }
  0x12   : > { %v310_v2 = vsel %vm305_vm1, %v1116_v1, 0  ;;  %v293_v3 = vld [vmem:[%s248_s23] sm:$0xf]  ;;  %438 = vrot.lane.b32.xlu1 %v1116_v1, %s1170_s24 }
  0x13   : > { %1033 = vmatpush3.bf16.xpose.msra.mxu0 %v310_v2  ;;  %v294_v4 = vmul.bf16 1052065461, %v293_v3  ;;  %v1273_v17 = vld [vmem:[%s267_s29] sm:$0xff]  }
  0x14   : > { %1050 = vmatprep.subr.bf16.mxu0 %v1166_v0  ;;  %1039 = vmatpush3.bf16.msra.mxu1 %v1273_v17 }
  0x15   : > { %v1005_v12 = vcombine.low %v294_v4, %v294_v4  ;;  %1044 = vmatprep.subr.bf16.mxu1 %v1166_v0 }
  0x17   : > { %436 = vrot.lane.b32.xlu1 %v1005_v12, %s1170_s24 }
  0x1a   : > { %1035 = vmatmul.mubr.msk.bf16.vlgmr.msra.gmra.mrb[0].mxu0 %vm305_vm1, %v294_v4 }
  0x1b   : > { %1052 = vmatprep.mubr.msk.bf16.mxu0 %vm1167_vm0, %v1166_v0  ;;  %566 = vrot.lane.b32.xlu1 %v1116_v1, %s1171_s25 }
  0x1f   : > { %564 = vrot.lane.b32.xlu1 %v1005_v12, %s1171_s25 }
  0x23   : > { %694 = vrot.lane.b32.xlu1 %v1116_v1, %s1172_s26 }
  0x27   : > { %692 = vrot.lane.b32.xlu1 %v1005_v12, %s1172_s26 }
  0x84   : > { %v439_v21 = vpop.permute.xlu1 %438 }
  0x85   : > { %v444_v24 = vsel %vm305_vm1, %v439_v21, 0 }
  0x89   : > { %v437_v22 = vpop.permute.xlu1 %436 }
  0x8d   : > { %v567_v26 = vpop.permute.xlu1 %566 }
  0x8e   : > { %v572_v28 = vsel %vm305_vm1, %v567_v26, 0 }
  0x91   : > { %v565_v27 = vpop.permute.xlu1 %564 }
  0x95   : > { %v695_v29 = vpop.permute.xlu1 %694 }
  0x96   : > { %v700_v30 = vsel %vm305_vm1, %v695_v29, 0 }
  0x99   : > { %v693_v31 = vpop.permute.xlu1 %692 }
  0xed   : > { %v346_v6 = vpop.f32.mrb[0].mxu0 }
  0xee   : > { %v1036_v7 = vpop.f32.mrb[1].mxu0  ;;  %v354_v8 = vsel %vm353_vm3, %v346_v6, -inf }
  0xef   : > { %355 = vmax.xlane.f32.xlu0 %v354_v8  ;;  %v349_v9 = vpop.f32.mrb[2].mxu0 }
  0xf0   : > { %v1037_v10 = vpop.f32.mrb[3].mxu0 }
 0x17c   : > { %v356_v14 = vpop.xlane.xlu0 %355 }
 0x17d   : > { %v1261_v15 = vmax.f32 %v1258_v13, %v356_v14 }
 0x17f   : > { %v358_v16 = vsub.f32 %v1258_v13, %v1261_v15  ;;  %376 = vst.msk [vmem:[#allocation2] sm:$0xff] %vm282_vm2, %v1261_v15  ;;  %363 = vperm.xlu0 %1114, %v1261_v15   ;;  %v504_v15 = vld [vmem:[#allocation3 + $0x8] sm:$0xff] }
 0x181   : > { %v359_v29 = vmul.f32 1.442695, %v358_v16 }
 0x1fe   : > { %v364_v18 = vpop.permute.xlu0 %363 }
 0x1ff   : > { %v366_v19 = vsub.f32 %v346_v6, %v364_v18 }
 0x201   : > { %v367_v20 = vmul.f32 1.442695, %v366_v19 }
 0x203   : > { %1118 = vpow2.f32 %v367_v20 }
 0x20d   : > { %v1277_v23 = vpop.eup %1118 }
 0x20e   : > { %v378_v25 = vpack.c.bf16 %v1277_v23, %v1277_v23  ;;  %v371_v62 = vsel %vm353_vm3, %v1277_v23, 0.0 }
 0x210   : > { %1041 = vmatmul.mubr.msk.bf16.vlgmr.msra.gmra.mrb[0].mxu1 %vm353_vm3, %v378_v25 }
 0x211   : > { %1045 = vmatpush3.bf16.xpose.msra.mxu1 %v444_v24  ;;  %1046 = vmatprep.mubr.msk.bf16.mxu1 %vm1167_vm0, %v1166_v0 }
 0x212   : > { %1056 = vmatprep.subr.bf16.mxu1 %v1166_v0 }
 0x218   : > { %1047 = vmatmul.mubr.msk.bf16.vlgmr.msra.gmra.mrb[4].mxu1 %vm305_vm1, %v437_v22 }
 0x219   : > { %1057 = vmatpush3.bf16.xpose.msra.mxu1 %v572_v28  ;;  %1058 = vmatprep.mubr.msk.bf16.mxu1 %vm1167_vm0, %v1166_v0 }
 0x21a   : > { %1068 = vmatprep.subr.bf16.mxu1 %v1166_v0 }
 0x220   : > { %1059 = vmatmul.mubr.msk.bf16.vlgmr.msra.gmra.mrb[8].mxu1 %vm305_vm1, %v565_v27 }
 0x221   : > { %1069 = vmatpush3.bf16.xpose.msra.mxu1 %v700_v30  ;;  %1070 = vmatprep.mubr.msk.bf16.mxu1 %vm1167_vm0, %v1166_v0 }
 0x228   : > { %1071 = vmatmul.mubr.msk.bf16.vlgmr.msra.gmra.mrb[12].mxu1 %vm305_vm1, %v693_v31 }
 0x2e3   : > { %v1296_v32 = vpop.f32.mrb[0].mxu1 }
 0x2e4   : > { %v1042_v33 = vpop.f32.mrb[1].mxu1 }
 0x2e5   : > { %v425_v34 = vpop.f32.mrb[2].mxu1 }
 0x2e6   : > { %v1043_v35 = vpop.f32.mrb[3].mxu1  ;;  %v369_v34 = vld [vmem:[#allocation3] sm:$0xff] }
 0x2eb   : > { %v480_v36 = vpop.f32.mrb[4].mxu1 }
 0x2ec   : > { %v1048_v37 = vpop.f32.mrb[5].mxu1  ;;  %v488_v38 = vsel %vm353_vm3, %v480_v36, -inf }
 0x2ed   : > { %489 = vmax.xlane.f32.xlu1 %v488_v38  ;;  %v483_v39 = vpop.f32.mrb[6].mxu1 }
 0x2ee   : > { %v1049_v40 = vpop.f32.mrb[7].mxu1 }
 0x2f3   : > { %v608_v41 = vpop.f32.mrb[8].mxu1 }
 0x2f4   : > { %v1060_v42 = vpop.f32.mrb[9].mxu1  ;;  %v616_v43 = vsel %vm353_vm3, %v608_v41, -inf }
 0x2f5   : > { %617 = vmax.xlane.f32.xlu0 %v616_v43  ;;  %v611_v44 = vpop.f32.mrb[10].mxu1  ;;  %v760_v43 = vld [vmem:[#allocation3 + $0x18] sm:$0xff] }
 0x2f6   : > { %v1061_v45 = vpop.f32.mrb[11].mxu1 }
 0x2fb   : > { %v736_v46 = vpop.f32.mrb[12].mxu1 }
 0x2fc   : > { %v1072_v47 = vpop.f32.mrb[13].mxu1  ;;  %v744_v48 = vsel %vm353_vm3, %v736_v46, -inf }
 0x2fd   : > { %745 = vmax.xlane.f32.xlu1 %v744_v48  ;;  %v739_v49 = vpop.f32.mrb[14].mxu1 }
 0x2fe   : > { %v1073_v50 = vpop.f32.mrb[15].mxu1 }
 0x37a   : > { %v490_v52 = vpop.xlane.xlu1 %489 }
 0x37b   : > { %v491_v53 = vmax.f32 %v487_v51, %v490_v52 }
 0x37d   : > { %v492_v54 = vsub.f32 %v487_v51, %v491_v53  ;;  %510 = vst.msk [vmem:[#allocation2 + $0x8] sm:$0xff] %vm282_vm2, %v491_v53  ;;  %497 = vperm.xlu1 %1115, %v491_v53  }
 0x37f   : > { %v493_v63 = vmul.f32 1.442695, %v492_v54 }
 0x381   : > { %1120 = vpow2.f32 %v493_v63 }
 0x382   : > { %v618_v56 = vpop.xlane.xlu0 %617 }
 0x383   : > { %v619_v57 = vmax.f32 %v1302_v55, %v618_v56 }
 0x385   : > { %v620_v58 = vsub.f32 %v1302_v55, %v619_v57  ;;  %638 = vst.msk [vmem:[#allocation2 + $0x10] sm:$0xff] %vm282_vm2, %v619_v57  ;;  %625 = vperm.xlu0 %1114, %v619_v57  }
 0x387   : > { %v621_v30 = vmul.f32 1.442695, %v620_v58 }
 0x38a   : > { %v746_v60 = vpop.xlane.xlu1 %745 }
 0x38b   : > { %v747_v61 = vmax.f32 %v743_v59, %v746_v60  ;;  %v1121_v3 = vpop.eup %1120 }
 0x38c   : > { %v505_v16 = vmul.f32 %v1121_v3, %v504_v15 }
 0x38d   : > { %766 = vst.msk [vmem:[#allocation2 + $0x18] sm:$0xff] %vm282_vm2, %v747_v61  ;;  %753 = vperm.xlu1 %1115, %v747_v61   ;;  %v748_v1 = vsub.f32 %v743_v59, %v747_v61 }
 0x38f   : > { %v749_v2 = vmul.f32 1.442695, %v748_v1 }
 0x391   : > { %513 = vrot.lane.b32.xlu1 %v1273_v17, %s1170_s24  ;;  %1122 = vpow2.f32 %v749_v2 }
 0x395   : > { %641 = vrot.lane.b32.xlu1 %v1273_v17, %s1171_s25 }
 0x399   : > { %769 = vrot.lane.b32.xlu1 %v1273_v17, %s1172_s26 }
 0x39b   : > { %v1316_v4 = vpop.eup %1122 }
 0x39c   : > { %v761_v45 = vmul.f32 %v1316_v4, %v760_v43 }
 0x3bd   : > { %372 = vadd.xlane.f32.xlu1 %v371_v62 }
 0x3ce   : > { %561 = vperm.xlu1 %1115, %v1121_v3  }
 0x3d2   : > { %817 = vperm.xlu1 %1115, %v1316_v4  }
 0x3fc   : > { %v498_v5 = vpop.permute.xlu1 %497 }
 0x3fd   : > { %v500_v6 = vsub.f32 %v480_v36, %v498_v5 }
 0x3ff   : > { %v501_v7 = vmul.f32 1.442695, %v500_v6 }
 0x401   : > { %1124 = vpow2.f32 %v501_v7 }
 0x404   : > { %v626_v8 = vpop.permute.xlu0 %625 }
 0x405   : > { %v628_v9 = vsub.f32 %v608_v41, %v626_v8 }
 0x407   : > { %v629_v10 = vmul.f32 1.442695, %v628_v9  ;;  %v299_v9 = vld [vmem:[#allocation4] sm:$0xff] }
 0x409   : > { %1126 = vpow2.f32 %v629_v10 }
 0x40b   : > { %v1125_v11 = vpop.eup %1124 }
 0x40c   : > { %v754_v12 = vpop.permute.xlu1 %753  ;;  %v506_v14 = vsel %vm353_vm3, %v1125_v11, 0.0  ;;  %v512_v20 = vpack.c.bf16 %v1125_v11, %v1125_v11 }
 0x40d   : > { %v756_v17 = vsub.f32 %v736_v46, %v754_v12  ;;  %507 = vadd.xlane.f32.xlu0 %v506_v14 }
 0x40f   : > { %v757_v18 = vmul.f32 1.442695, %v756_v17 }
 0x410   : > { %v514_v19 = vpop.permute.xlu1 %513 }
 0x411   : > { %1128 = vpow2.f32 %v757_v18  ;;  %1051 = vmatpush3.bf16.msra.mxu0 %v514_v19 }
 0x412   : > { %1062 = vmatprep.subr.bf16.mxu0 %v1166_v0  ;;  %1130 = vpow2.f32 %v359_v29 }
 0x413   : > { %v1127_v21 = vpop.eup %1126  ;;  %1132 = vpow2.f32 %v621_v30 }
 0x414   : > { %1053 = vmatmul.mubr.msk.bf16.vlgmr.msra.gmra.mrb[4].mxu0 %vm353_vm3, %v512_v20  ;;  %v634_v22 = vsel %vm353_vm3, %v1127_v21, 0.0  ;;  %v642_v23 = vpop.permute.xlu1 %641  ;;  %v640_v24 = vpack.c.bf16 %v1127_v21, %v1127_v21 }
 0x415   : > { %635 = vadd.xlane.f32.xlu0 %v634_v22  ;;  %1063 = vmatpush3.bf16.msra.mxu0 %v642_v23 }
 0x416   : > { %1064 = vmatprep.mubr.msk.bf16.mxu0 %vm1167_vm0, %v1166_v0  ;;  %1074 = vmatprep.subr.bf16.mxu0 %v1166_v0 }
 0x418   : > { %v770_v25 = vpop.permute.xlu1 %769 }
 0x41b   : > { %v1129_v26 = vpop.eup %1128 }
 0x41c   : > { %1065 = vmatmul.mubr.msk.bf16.vlgmr.msra.gmra.mrb[8].mxu0 %vm353_vm3, %v640_v24  ;;  %v762_v27 = vsel %vm353_vm3, %v1129_v26, 0.0  ;;  %v768_v28 = vpack.c.bf16 %v1129_v26, %v1129_v26  ;;  %v1131_v31 = vpop.eup %1130 }
 0x41d   : > { %763 = vadd.xlane.f32.xlu0 %v762_v27  ;;  %1075 = vmatpush3.bf16.msra.mxu0 %v770_v25  ;;  %v1133_v33 = vpop.eup %1132  ;;  %v370_v35 = vmul.f32 %v1131_v31, %v369_v34 }
 0x41e   : > { %1076 = vmatprep.mubr.msk.bf16.mxu0 %vm1167_vm0, %v1166_v0  ;;  %v632_v0 = vld [vmem:[#allocation3 + $0x10] sm:$0xff] }
 0x41f   : > { %v633_v40 = vmul.f32 %v1133_v33, %v632_v0 }
 0x424   : > { %1077 = vmatmul.mubr.msk.bf16.vlgmr.msra.gmra.mrb[12].mxu0 %vm353_vm3, %v768_v28 }
 0x433   : > { %430 = vperm.xlu0 %1114, %v1131_v31  }
 0x437   : > { %689 = vperm.xlu0 %1114, %v1133_v33  }
 0x44a   : > { %v373_v36 = vpop.xlane.xlu1 %372 }
 0x44b   : > { %v374_v37 = vadd.f32 %v373_v36, %v370_v35 }
 0x44d   : > { %377 = vst.msk [vmem:[#allocation3] sm:$0xff] %vm282_vm2, %v374_v37  ;;  %1134 = vrcp.f32 %v374_v37 }
 0x44e   : > { %v562_v62 = vpop.permute.xlu1 %561 }
 0x452   : > { %v818_v63 = vpop.permute.xlu1 %817 }
 0x457   : > { %v1135_v13 = vpop.eup %1134 }
 0x458   : > { %849 = vperm.xlu0 %1114, %v1135_v13  }
 0x49a   : > { %v508_v38 = vpop.xlane.xlu0 %507 }
 0x49b   : > { %v509_v39 = vadd.f32 %v508_v38, %v505_v16 }
 0x49d   : > { %511 = vst.msk [vmem:[#allocation3 + $0x8] sm:$0xff] %vm282_vm2, %v509_v39  ;;  %1136 = vrcp.f32 %v509_v39 }
 0x4a2   : > { %v636_v41 = vpop.xlane.xlu0 %635 }
 0x4a3   : > { %v637_v42 = vadd.f32 %v636_v41, %v633_v40 }
 0x4a5   : > { %639 = vst.msk [vmem:[#allocation3 + $0x10] sm:$0xff] %vm282_vm2, %v637_v42  ;;  %1138 = vrcp.f32 %v637_v42 }
 0x4a7   : > { %v1137_v44 = vpop.eup %1136 }
 0x4a8   : > { %855 = vperm.xlu1 %1115, %v1137_v44  }
 0x4aa   : > { %v764_v46 = vpop.xlane.xlu0 %763 }
 0x4ab   : > { %v765_v47 = vadd.f32 %v764_v46, %v761_v45 }
 0x4ad   : > { %767 = vst.msk [vmem:[#allocation3 + $0x18] sm:$0xff] %vm282_vm2, %v765_v47  ;;  %1140 = vrcp.f32 %v765_v47 }
 0x4af   : > { %v1139_v48 = vpop.eup %1138 }
 0x4b0   : > { %861 = vperm.xlu0 %1114, %v1139_v48  }
 0x4b2   : > { %v431_v1 = vpop.permute.xlu0 %430 }
 0x4b3   : > { %v820_v5 = vsel %vm305_vm1, %v431_v1, %v562_v62 }
 0x4b6   : > { %v690_v3 = vpop.permute.xlu0 %689 }
 0x4b7   : > { %v1141_v61 = vpop.eup %1140  ;;  %v821_v6 = vsel %vm353_vm3, %v820_v5, %v690_v3 }
 0x4b8   : > { %v823_v8 = vsel %vm822_vm5, %v821_v6, %v818_v63 }
 0x4b9   : > { %v824_v12 = vmul.f32 %v823_v8, %v299_v9 }
 0x4d7   : > { %v850_v19 = vpop.permute.xlu0 %849 }
 0x4e7   : > { %v553_v49 = vpop.f32.mrb[4].mxu0 }
 0x4e8   : > { %826 = vrot.lane.b32.xlu1 %v553_v49, %s1173_s30  ;;  %v1054_v50 = vpop.f32.mrb[5].mxu0 }
 0x4e9   : > { %v556_v51 = vpop.f32.mrb[6].mxu0 }
 0x4ea   : > { %v1055_v52 = vpop.f32.mrb[7].mxu0 }
 0x4ef   : > { %v681_v53 = vpop.f32.mrb[8].mxu0 }
 0x4f0   : > { %830 = vrot.lane.b32.xlu1 %v681_v53, %s1174_s4  ;;  %v1066_v54 = vpop.f32.mrb[9].mxu0 }
 0x4f1   : > { %v684_v55 = vpop.f32.mrb[10].mxu0 }
 0x4f2   : > { %v1067_v56 = vpop.f32.mrb[11].mxu0 }
 0x4f7   : > { %v809_v57 = vpop.f32.mrb[12].mxu0 }
 0x4f8   : > { %834 = vrot.lane.b32.xlu1 %v809_v57, %s1175_s5  ;;  %v1078_v58 = vpop.f32.mrb[13].mxu0 }
 0x4f9   : > { %v812_v59 = vpop.f32.mrb[14].mxu0 }
 0x4fa   : > { %v1079_v60 = vpop.f32.mrb[15].mxu0 }
 0x4fc   : > { %867 = vperm.xlu1 %1115, %v1141_v61  }
 0x527   : > { %v856_v2 = vpop.permute.xlu1 %855 }
 0x528   : > { %v870_v21 = vsel %vm305_vm1, %v850_v19, %v856_v2 }
 0x52f   : > { %v862_v20 = vpop.permute.xlu0 %861 }
 0x530   : > { %v871_v22 = vsel %vm353_vm3, %v870_v21, %v862_v20 }
 0x55a   : > { %v827_v4 = vpop.permute.xlu1 %826 }
 0x55b   : > { %v837_v10 = vsel %vm305_vm1, %v1296_v32, %v827_v4 }
 0x562   : > { %v831_v7 = vpop.permute.xlu1 %830 }
 0x563   : > { %v838_v11 = vsel %vm353_vm3, %v837_v10, %v831_v7 }
 0x56a   : > { %v835_v14 = vpop.permute.xlu1 %834 }
 0x56b   : > { %v839_v17 = vsel %vm822_vm5, %v838_v11, %v835_v14 }
 0x56c   : > { %v840_v18 = vadd.f32 %v839_v17, %v824_v12 }
 0x56e   : > { %842 = vst.msk [vmem:[#allocation4] sm:$0xff] %vm291_vm4, %v840_v18 }
 0x57b   : > { %v868_v23 = vpop.permute.xlu1 %867 }
 0x57c   : > { %v872_v24 = vsel %vm822_vm5, %v871_v22, %v868_v23 }
 0x57d   : > { %v873_v25 = vmul.f32 %v872_v24, %v840_v18 }
 0x57f   : > { %v874_v32 = vpack.c.bf16 %v873_v25, %v873_v25 }
 0x581   : > { %876 = vst.msk [vmem:[%s275_s8] sm:$0xf] %vm875_vm6, %v874_v32 }
 0x582 PF: > { %s13_s14 = sadd.s32 1, %s1164_s14   ;;  %s1370_s12 = smov %s1160_s13 }
 0x583   : > { %p10_p5 = scmp.ge.s32.totalorder %s13_s14, 4   ;;  %s1371_s13 = smov %s1373_s15 }
 0x585   :  { %12 = sbr.rel (!%p10_p5) target bundleno = 2 (0x2), region = 82 }

// kernel: _lambda_.19
= control target key start
LH: loop header
LB: loop body
LE: loop exit
PB: predicated region body
PF: predicated region fallthrough
CT: control target
= control target key end

     0   :  { %vm28_vm0 = vcmask 261120   ;;  %v228_v0 = vmov 0.0   ;;  %vm229_vm1 = vmmov 0   ;;  %vm72_vm2 = vcmask 523264   ;;  %s311_s1 = inlined_call_operand.vmem [shape: bf16[64,32], index: 1, kind: input, shape index: {}]   ;;  %s312_s0 = inlined_call_operand.vmem [shape: bf16[16,64], index: 0, kind: input, shape index: {}]   ;;  %s313_s2 = inlined_call_operand.vmem [shape: f32[1,32], index: 2, kind: input, shape index: {}]   ;;  %s314_s3 = inlined_call_operand.vmem [shape: f32[16,32], index: 3, kind: input, shape index: {}]   ;;  %s315_s4 = inlined_call_operand.vmem [shape: f32[1,32], index: 4, kind: input, shape index: {}]   ;;  %s316_s5 = inlined_call_operand.vmem [shape: f32[1,32], index: 5, kind: input, shape index: {}]   ;;  %s317_s6 = inlined_call_operand.vmem [shape: f32[16,32], index: 6, kind: output, shape index: {}]  }
   0x1   :  { %205 = vmatprep.subr.bf16.mxu0 %v228_v0  ;;  %v219_v1 = vld [vmem:[%s311_s1] sm:$0xff]   ;;  %213 = vmatprep.mubr.msk.bf16.mxu0 %vm229_vm1, %v228_v0  ;;  %29 = vst.msk [vmem:[#allocation2] sm:$0xff] %vm28_vm0, %v228_v0  ;;  %30 = vst.msk [vmem:[#allocation2 + $0x8] sm:$0xff] %vm28_vm0, %v228_v0  ;;  %v220_v2 = vld [vmem:[%s311_s1 + $0x8] sm:$0xff]  }
   0x2   :  { %206 = vmatpush3.bf16.msra.mxu0 %v219_v1  ;;  %v221_v3 = vld [vmem:[%s311_s1 + $0x10] sm:$0xff]   ;;  %v222_v4 = vld [vmem:[%s311_s1 + $0x18] sm:$0xff]   ;;  %v223_v5 = vld [vmem:[%s312_s0] sm:$0xff]  }
   0x3   :  { %207 = vmatprep.subr.bf16.mxu0 %v228_v0  ;;  %v197_v14 = vld [vmem:[%s313_s2] ss:$0 sm:$0xff]  ;;  %v137_v19 = vld [vmem:[%s314_s3 + $0x8] sm:$0xff] }
   0x4   :  { %v136_v16 = vld [vmem:[%s314_s3] sm:$0xff] }
   0x5   :  { %v198_v42 = vld [vmem:[%s315_s4] ss:$0 sm:$0xff] }
   0x6   :  { %208 = vmatpush3.bf16.msra.mxu0 %v220_v2  ;;  %v199_v44 = vld [vmem:[%s316_s5] ss:$0 sm:$0xff] }
   0x7   :  { %209 = vmatprep.subr.bf16.mxu0 %v228_v0 }
   0x8   :  { %v31_v6 = vld [vmem:[#allocation2] sm:$0xff]  ;;  %v32_v8 = vld [vmem:[#allocation2 + $0x8] sm:$0xff] }
   0xa   :  { %210 = vmatpush3.bf16.msra.mxu0 %v221_v3 }
   0xb   :  { %211 = vmatprep.subr.bf16.mxu0 %v228_v0 }
   0xe   :  { %212 = vmatpush3.bf16.msra.mxu0 %v222_v4 }
  0x11   :  { %214 = vmatmul.mubr.msk.bf16.vlgmr.msra.gmra.mrb[0].mxu0 %vm72_vm2, %v223_v5 }
  0xe4   :  { %v110_v7 = vpop.f32.mrb[0].mxu0 }
  0xe5   :  { %v117_v9 = vadd.f32 %v110_v7, %v31_v6  ;;  %v215_v10 = vpop.f32.mrb[1].mxu0 }
  0xe6   :  { %v113_v11 = vpop.f32.mrb[2].mxu0 }
  0xe7   :  { %120 = vst.msk [vmem:[#allocation2] sm:$0xff] %vm28_vm0, %v117_v9  ;;  %v118_v12 = vadd.f32 %v113_v11, %v32_v8  ;;  %v216_v13 = vpop.f32.mrb[3].mxu0 }
  0xe9   :  { %121 = vst.msk [vmem:[#allocation2 + $0x8] sm:$0xff] %vm28_vm0, %v118_v12 }
  0xee   :  { %v125_v15 = vld [vmem:[#allocation2] sm:$0xff] }
  0xef   :  { %v134_v17 = vadd.f32 %v197_v14, %v125_v15 }
  0xf0   :  { %v126_v18 = vld [vmem:[#allocation2 + $0x8] sm:$0xff] }
  0xf1   :  { %v138_v20 = vadd.f32 %v136_v16, %v134_v17  ;;  %v135_v21 = vadd.f32 %v197_v14, %v126_v18 }
  0xf3   :  { %v140_v22 = vsel %vm28_vm0, %v138_v20, 0.0  ;;  %v139_v23 = vadd.f32 %v137_v19, %v135_v21 }
  0xf4   :  { %141 = vadd.xlane.f32.xlu0 %v140_v22 }
  0xf5   :  { %v143_v24 = vsel %vm28_vm0, %v139_v23, 0.0 }
  0xf8   :  { %144 = vadd.xlane.f32.xlu0 %v143_v24 }
 0x181   :  { %v142_v25 = vpop.xlane.xlu0 %141 }
 0x182   :  { %v147_v26 = vmul.f32 0.03125, %v142_v25 }
 0x184   :  { %v149_v27 = vsub.f32 %v138_v20, %v147_v26 }
 0x185   :  { %v145_v28 = vpop.xlane.xlu0 %144 }
 0x186   :  { %v148_v29 = vmul.f32 0.03125, %v145_v28  ;;  %v151_v30 = vmul.f32 %v149_v27, %v149_v27 }
 0x188   :  { %v150_v31 = vsub.f32 %v139_v23, %v148_v29  ;;  %v153_v32 = vsel %vm28_vm0, %v151_v30, 0.0 }
 0x189   :  { %154 = vadd.xlane.f32.xlu1 %v153_v32 }
 0x18a   :  { %v152_v33 = vmul.f32 %v150_v31, %v150_v31 }
 0x18c   :  { %v156_v34 = vsel %vm28_vm0, %v152_v33, 0.0 }
 0x18d   :  { %157 = vadd.xlane.f32.xlu1 %v156_v34 }
 0x216   :  { %v155_v35 = vpop.xlane.xlu1 %154 }
 0x217   :  { %v159_v36 = vmul.f32 0.03125, %v155_v35 }
 0x219   :  { %v161_v37 = vadd.f32 1e-06, %v159_v36 }
 0x21a   :  { %v158_v38 = vpop.xlane.xlu1 %157 }
 0x21b   :  { %224 = vrsqrt.f32 %v161_v37  ;;  %v160_v39 = vmul.f32 0.03125, %v158_v38 }
 0x21d   :  { %v162_v40 = vadd.f32 1e-06, %v160_v39 }
 0x21f   :  { %226 = vrsqrt.f32 %v162_v40 }
 0x225   :  { %v225_v41 = vpop.eup %224 }
 0x226   :  { %v165_v43 = vmul.f32 %v225_v41, %v149_v27 }
 0x228   :  { %v174_v45 = vmul.f32 %v198_v42, %v165_v43 }
 0x229   :  { %v227_v46 = vpop.eup %226 }
 0x22a   :  { %v183_v47 = vadd.f32 %v199_v44, %v174_v45  ;;  %v166_v48 = vmul.f32 %v227_v46, %v150_v31 }
 0x22c   :  { %185 = vst.msk [vmem:[%s317_s6] sm:$0xff] %vm28_vm0, %v183_v47  ;;  %v175_v49 = vmul.f32 %v198_v42, %v166_v48 }
 0x22e   :  { %v184_v50 = vadd.f32 %v199_v44, %v175_v49 }
 0x230   :  { %186 = vst.msk [vmem:[%s317_s6 + $0x8] sm:$0xff] %vm28_vm0, %v184_v50 }

</bundles_post_ra>
